<compile_context>
chip_gen: v6e
topology: v6e:2x2x1
jax: 0.10.0
libtpu: 0.0.40
codegen_flags: <defaults>
</compile_context>

<pallas_src>
import functools
import math

import jax
import jax.numpy as jnp
from jax.experimental import pallas as pl
from jax.experimental.pallas import tpu as pltpu


# ----------------------------------------------------------------------------
# helpers
# ----------------------------------------------------------------------------
def _lcm(a, b):
    return a * b // math.gcd(a, b)


def _pick_tile(total, multiple, cap):
    """Largest tile t <= cap with total % t == 0 and t % multiple == 0.

    Prefers a tile giving an EVEN grid-step count (v7x megacore balance) when
    that tile is at least half of the largest valid tile.  Falls back to the
    full extent when nothing divides cleanly.
    """
    cands = [t for t in range(multiple, min(total, cap) + 1, multiple)
             if total % t == 0]
    if not cands:
        return total
    best = max(cands)
    even = [t for t in cands if (total // t) % 2 == 0]
    if even and max(even) * 2 >= best:
        return max(even)
    return best


# ----------------------------------------------------------------------------
# Kernel A: fused attention path  (LN1 -> QKV -> RoPE -> window attn -> proj)
# ----------------------------------------------------------------------------
def _attn_path_kernel(xg_ref, pm_ref, g1_ref, b1_ref, cos_ref, sin_ref,
                      wqkv_ref, bqkv_ref, wproj_ref, bproj_ref, o_ref,
                      *, num_heads, head_dim, window, scale, eps,
                      compute_dtype):
    H, d, W = num_heads, head_dim, window
    C = H * d
    xg = xg_ref[...].astype(jnp.float32)                  # (tq, C) gathered rows
    tq = xg.shape[0]
    nw = tq // W                                          # whole windows per tile

    # ---- LayerNorm1 (padding rows bypass: they carry the learned padding) ----
    mu = jnp.mean(xg, axis=-1, keepdims=True)
    var = jnp.mean(jnp.square(xg - mu), axis=-1, keepdims=True)
    xn = (xg - mu) * jax.lax.rsqrt(var + eps) * g1_ref[...] + b1_ref[...]
    xw = jnp.where(pm_ref[...] > 0.5, xg, xn)             # (tq, C)

    # ---- QKV projection: single lane-dense MXU matmul -------------------------
    qkv = jnp.dot(xw.astype(compute_dtype), wqkv_ref[...].astype(compute_dtype),
                  preferred_element_type=jnp.float32) + bqkv_ref[...]   # (tq, 3C)
    q = qkv[:, 0 * C:1 * C]
    k = qkv[:, 1 * C:2 * C]
    v = qkv[:, 2 * C:3 * C]

    # ---- RoPE: elementwise; per-head half-swap via static lane slices ---------
    # (sign of rotate_half folded into the swap -> plain sin table, no matmul)
    cos = jnp.concatenate([cos_ref[...]] * H, axis=-1)     # (tq, C), heads share
    sin = jnp.concatenate([sin_ref[...]] * H, axis=-1)

    def rotate_half(t):
        parts = []
        for h in range(H):
            lo = t[:, h * d:h * d + d // 2]
            hi = t[:, h * d + d // 2:(h + 1) * d]
            parts += [-hi, lo]
        return jnp.concatenate(parts, axis=-1)

    q = (q * cos + rotate_half(q) * sin) * scale
    k = k * cos + rotate_half(k) * sin

    # ---- per-window batched attention (block-diagonal mask is implicit) -------
    # No (tq, tq) scores, no -1e9 mask: each window only ever sees itself.
    q3 = q.reshape(nw, W, C).astype(compute_dtype)
    k3 = k.reshape(nw, W, C).astype(compute_dtype)
    v3 = v.reshape(nw, W, C).astype(compute_dtype)

    # Heads are static lane slices; num_heads is small here.
    # TODO(synk): for large num_heads put heads on a grid axis instead of a
    # Python unroll (bounds vreg live ranges at production C).
    outs = []
    for h in range(H):
        sl = slice(h * d, (h + 1) * d)
        s = jax.lax.dot_general(q3[:, :, sl], k3[:, :, sl],
                                (((2,), (2,)), ((0,), (0,))),
                                preferred_element_type=jnp.float32)   # (nw, W, W)
        m = jnp.max(s, axis=-1, keepdims=True)
        p = jnp.exp(s - m)
        p = p * pl.reciprocal(jnp.sum(p, axis=-1, keepdims=True), approx=True)
        outs.append(jax.lax.dot_general(p.astype(compute_dtype), v3[:, :, sl],
                                        (((2,), (1,)), ((0,), (0,))),
                                        preferred_element_type=jnp.float32))

    # Lane-concatenate heads once (values only, no scratch round-trip), then a
    # single K=C output-projection matmul.
    attn = jnp.concatenate(outs, axis=-1).reshape(tq, C)
    out = jnp.dot(attn.astype(compute_dtype), wproj_ref[...].astype(compute_dtype),
                  preferred_element_type=jnp.float32) + bproj_ref[...]
    o_ref[...] = out.astype(o_ref.dtype)


def fused_window_attention(xg, pad_mask, g1, b1, cos_d, sin_d,
                           wqkv, bqkv, wproj, bproj, *,
                           num_heads, window, scale, q_tile=None, eps=1e-5,
                           use_bf16_matmul=False):
    Lw, C = xg.shape
    head_dim = C // num_heads
    assert window % 8 == 0, "window must be a multiple of the sublane tile (8)"
    if q_tile is None:
        q_tile = _pick_tile(Lw, _lcm(window, 8), cap=512)
    assert Lw % q_tile == 0 and q_tile % window == 0
    assert q_tile % 8 == 0 or q_tile == Lw

    compute_dtype = jnp.bfloat16 if use_bf16_matmul else jnp.float32
    kernel = functools.partial(
        _attn_path_kernel, num_heads=num_heads, head_dim=head_dim,
        window=window, scale=scale, eps=eps, compute_dtype=compute_dtype)

    # TODO(synk): for production C, store weights in bf16 and/or mark the
    # constant-index weight specs single-buffered to keep v7x's 64 MiB budget.
    return pl.pallas_call(
        kernel,
        out_shape=jax.ShapeDtypeStruct((Lw, C), xg.dtype),
        grid=(Lw // q_tile,),
        in_specs=[
            pl.BlockSpec((q_tile, C), lambda i: (i, 0)),        # gathered x
            pl.BlockSpec((q_tile, 1), lambda i: (i, 0)),        # pad-row mask
            pl.BlockSpec((1, C), lambda i: (0, 0)),             # LN1 gamma
            pl.BlockSpec((1, C), lambda i: (0, 0)),             # LN1 beta
            pl.BlockSpec((q_tile, head_dim), lambda i: (i, 0)),  # rope cos (per head_dim)
            pl.BlockSpec((q_tile, head_dim), lambda i: (i, 0)),  # rope sin (per head_dim)
            pl.BlockSpec((C, 3 * C), lambda i: (0, 0)),         # qkv weight (in,out)
            pl.BlockSpec((1, 3 * C), lambda i: (0, 0)),         # qkv bias
            pl.BlockSpec((C, C), lambda i: (0, 0)),             # proj weight (in,out)
            pl.BlockSpec((1, C), lambda i: (0, 0)),             # proj bias
        ],
        out_specs=pl.BlockSpec((q_tile, C), lambda i: (i, 0)),
        compiler_params=pltpu.CompilerParams(
            dimension_semantics=("parallel",),
            vmem_limit_bytes=32 * 1024 * 1024),
    )(xg, pad_mask, g1, b1, cos_d, sin_d, wqkv, bqkv, wproj, bproj)


# ----------------------------------------------------------------------------
# Kernel B: fused MLP path  (residual -> LN2 -> FC1 -> GELU -> FC2 -> residual)
# ----------------------------------------------------------------------------
def _mlp_path_kernel(x_ref, a_ref, g2_ref, b2_ref, w1_ref, b1_ref, w2_ref,
                     bf2_ref, o_ref, *, eps, compute_dtype):
    h = x_ref[...].astype(jnp.float32) + a_ref[...].astype(jnp.float32)
    mu = jnp.mean(h, axis=-1, keepdims=True)
    var = jnp.mean(jnp.square(h - mu), axis=-1, keepdims=True)
    xn = (h - mu) * jax.lax.rsqrt(var + eps) * g2_ref[...] + b2_ref[...]
    u = jnp.dot(xn.astype(compute_dtype), w1_ref[...].astype(compute_dtype),
                preferred_element_type=jnp.float32) + b1_ref[...]
    # TODO(synk): PyTorch nn.GELU() is erf-exact; tanh approximation used since
    # lax.erf lowering is not guaranteed in Mosaic (max abs deviation ~1e-3).
    c = 0.7978845608028654  # sqrt(2/pi)
    u = 0.5 * u * (1.0 + jnp.tanh(c * (u + 0.044715 * u * u * u)))
    y = h + jnp.dot(u.astype(compute_dtype), w2_ref[...].astype(compute_dtype),
                    preferred_element_type=jnp.float32) + bf2_ref[...]
    o_ref[...] = y.astype(o_ref.dtype)


def fused_mlp_residual(x, a, g2, b2, w1, b1, w2, bf2, *, row_tile=None,
                       eps=1e-5, use_bf16_matmul=False):
    BL, C = x.shape
    hid = w1.shape[1]
    if row_tile is None:
        row_tile = _pick_tile(BL, 8, cap=512)
    assert BL % row_tile == 0 and (row_tile % 8 == 0 or row_tile == BL)

    compute_dtype = jnp.bfloat16 if use_bf16_matmul else jnp.float32
    kernel = functools.partial(_mlp_path_kernel, eps=eps,
                               compute_dtype=compute_dtype)
    return pl.pallas_call(
        kernel,
        out_shape=jax.ShapeDtypeStruct((BL, C), x.dtype),
        grid=(BL // row_tile,),
        in_specs=[
            pl.BlockSpec((row_tile, C), lambda i: (i, 0)),  # x (residual stream)
            pl.BlockSpec((row_tile, C), lambda i: (i, 0)),  # attention output
            pl.BlockSpec((1, C), lambda i: (0, 0)),         # LN2 gamma
            pl.BlockSpec((1, C), lambda i: (0, 0)),         # LN2 beta
            pl.BlockSpec((C, hid), lambda i: (0, 0)),       # fc1 weight (in,out)
            pl.BlockSpec((1, hid), lambda i: (0, 0)),       # fc1 bias
            pl.BlockSpec((hid, C), lambda i: (0, 0)),       # fc2 weight (in,out)
            pl.BlockSpec((1, C), lambda i: (0, 0)),         # fc2 bias
        ],
        out_specs=pl.BlockSpec((row_tile, C), lambda i: (i, 0)),
        compiler_params=pltpu.CompilerParams(
            dimension_semantics=("parallel",),
            vmem_limit_bytes=32 * 1024 * 1024),
    )(x, a, g2, b2, w1, b1, w2, bf2)


# ----------------------------------------------------------------------------
# Module glue (parameter init + Block forward)
# ----------------------------------------------------------------------------
def init_params(key, embed_dim, num_heads, mlp_ratio=4.0):
    head_dim = embed_dim // num_heads
    hidden = head_dim * num_heads
    mlp_hidden = int(embed_dim * mlp_ratio)
    ks = jax.random.split(key, 12)
    w = lambda k, s: jax.random.normal(k, s, jnp.float32) * 0.02
    return dict(
        ln1_g=1.0 + 0.05 * jax.random.normal(ks[8], (1, embed_dim), jnp.float32),
        ln1_b=0.05 * jax.random.normal(ks[9], (1, embed_dim), jnp.float32),
        ln2_g=1.0 + 0.05 * jax.random.normal(ks[10], (1, embed_dim), jnp.float32),
        ln2_b=0.05 * jax.random.normal(ks[11], (1, embed_dim), jnp.float32),
        # attention weights, stored PRE-TRANSPOSED as (in, out)
        qkv_w=w(ks[0], (embed_dim, 3 * hidden)),
        qkv_b=w(ks[1], (1, 3 * hidden)),
        proj_w=w(ks[2], (hidden, embed_dim)),
        proj_b=w(ks[3], (1, embed_dim)),
        padding=jnp.zeros((1, embed_dim), jnp.float32),   # nn.Parameter(zeros)
        # MLP weights, pre-transposed (in, out)
        fc1_w=w(ks[4], (embed_dim, mlp_hidden)),
        fc1_b=w(ks[5], (1, mlp_hidden)),
        fc2_w=w(ks[6], (mlp_hidden, embed_dim)),
        fc2_b=w(ks[7], (1, embed_dim)),
    )


def block_forward(params, x, indices, rope_cos, rope_sin, *,
                  num_heads, window, q_tile=None, row_tile=None, eps=1e-5,
                  use_bf16_matmul=False):
    """Block forward: x: (B*L, C) -> (B*L, C).  rope tables are (Lw, head_dim)."""
    BL, C = x.shape
    head_dim = C // num_heads
    scale = head_dim ** (-0.5)

    if indices is not None:
        # Window re-ordering + learned padding row (cat([x, padding])[indices]).
        # LayerNorm1 is folded into kernel A (pad rows bypass the norm).
        # TODO(synk): fuse this gather and the scatter below into the kernels
        # via manual per-row DMAs from SMEM-prefetched indices to remove the
        # extra HBM passes at production sequence lengths.
        pad_mask = (indices == BL).astype(jnp.float32)[:, None]        # (Lw, 1)
        xg = jnp.concatenate([x, params["padding"]], axis=0)[indices]  # (Lw, C)
    else:
        pad_mask = jnp.zeros((BL, 1), jnp.float32)
        xg = x

    attn_w = fused_window_attention(
        xg, pad_mask, params["ln1_g"], params["ln1_b"], rope_cos, rope_sin,
        params["qkv_w"], params["qkv_b"], params["proj_w"], params["proj_b"],
        num_heads=num_heads, window=window, scale=scale, q_tile=q_tile, eps=eps,
        use_bf16_matmul=use_bf16_matmul)

    if indices is not None:
        scat = jnp.zeros((BL + 1, C), attn_w.dtype).at[indices].set(attn_w)
        attn_out = scat[:BL]
    else:
        attn_out = attn_w

    return fused_mlp_residual(
        x, attn_out, params["ln2_g"], params["ln2_b"],
        params["fc1_w"], params["fc1_b"], params["fc2_w"], params["fc2_b"],
        row_tile=row_tile, eps=eps, use_bf16_matmul=use_bf16_matmul)


# ----------------------------------------------------------------------------
# Pure-JAX reference (mirrors the PyTorch Block), for a sanity check
# ----------------------------------------------------------------------------
def reference_block(params, x, indices, rope_cos, rope_sin, *,
                    num_heads, window, eps=1e-5):
    BL, C = x.shape
    d = C // num_heads
    scale = d ** (-0.5)

    def ln(z, g, b):
        mu = z.mean(-1, keepdims=True)
        var = ((z - mu) ** 2).mean(-1, keepdims=True)
        return (z - mu) / jnp.sqrt(var + eps) * g + b

    def gelu_tanh(z):
        c = 0.7978845608028654
        return 0.5 * z * (1.0 + jnp.tanh(c * (z + 0.044715 * z ** 3)))

    xn1 = ln(x, params["ln1_g"], params["ln1_b"])
    xw = jnp.concatenate([xn1, params["padding"]], axis=0)[indices]
    Lw = xw.shape[0]

    qkv = xw @ params["qkv_w"] + params["qkv_b"]
    qkv = qkv.reshape(Lw, 3, num_heads, d)
    q, k, v = qkv[:, 0], qkv[:, 1], qkv[:, 2]          # (Lw, H, d)

    def rope(t):
        t1, t2 = t[..., :d // 2], t[..., d // 2:]
        tr = jnp.concatenate([-t2, t1], axis=-1)
        return t * rope_cos[:, None, :] + tr * rope_sin[:, None, :]

    q, k = rope(q), rope(k)

    win = jnp.arange(Lw) // window
    bias = jnp.where(win[:, None] == win[None, :], 0.0, -1e9)
    s = jnp.einsum("qhd,khd->hqk", q, k) * scale + bias[None]
    p = jax.nn.softmax(s, axis=-1)
    o = jnp.einsum("hqk,khd->qhd", p, v).reshape(Lw, C)
    ao = o @ params["proj_w"] + params["proj_b"]

    scat = jnp.zeros((BL + 1, C), ao.dtype).at[indices].set(ao)
    h = x + scat[:BL]

    xn2 = ln(h, params["ln2_g"], params["ln2_b"])
    u = gelu_tanh(xn2 @ params["fc1_w"] + params["fc1_b"])
    return h + (u @ params["fc2_w"] + params["fc2_b"])


if __name__ == "__main__":
    # Lane-dense demo shapes (C = 128 so all blocks fill the 128-lane vreg).
    embed_dim = 128
    num_heads = 4
    head_dim = embed_dim // num_heads          # 32
    window = 16                                # tokens per attention window
    BL = 112                                   # B * L tokens
    n_pad = 16
    Lw = BL + n_pad                            # windowed sequence length (128)

    key = jax.random.PRNGKey(0)
    kx, kp, ki = jax.random.split(key, 3)
    params = init_params(kp, embed_dim, num_heads)
    x = jax.random.normal(kx, (BL, embed_dim), jnp.float32)

    # indices: every original token exactly once (in a shuffled window order),
    # extra slots reference the learned padding row (index BL).
    perm = jax.random.permutation(ki, Lw).astype(jnp.int32)
    indices = jnp.minimum(perm, BL)            # (Lw,)

    # RoPE tables (the external `rope` callable in PyTorch), per head_dim.
    pos = jnp.arange(Lw, dtype=jnp.float32)[:, None]
    inv_freq = 1.0 / (10000.0 ** (
        jnp.arange(0, head_dim, 2, dtype=jnp.float32) / head_dim))
    ang = pos * inv_freq[None, :]
    ang = jnp.concatenate([ang, ang], axis=-1)          # (Lw, head_dim)
    rope_cos = jnp.cos(ang)
    rope_sin = jnp.sin(ang)

    # Tiles are auto-picked (largest window-aligned tiles, even grid steps):
    # q_tile = 64 (2 steps), row_tile = 56 (2 steps).
    out = block_forward(params, x, indices, rope_cos, rope_sin,
                        num_heads=num_heads, window=window)
    jax.block_until_ready(out)

    ref = reference_block(params, x, indices, rope_cos, rope_sin,
                          num_heads=num_heads, window=window)
    assert out.shape == (BL, embed_dim)
    err = float(jnp.max(jnp.abs(out - ref)))
    assert jnp.allclose(out, ref, atol=1e-3, rtol=1e-3), f"max abs err {err}"
    print("KERNEL_OK")
</pallas_src>

<mosaic_0001>
module attributes {stable_mosaic.version = 11 : i64} {
  func.func @_attn_path_kernel(%arg0: i32, %arg1: memref<64x128xf32, #tpu.memory_space<vmem>>, %arg2: memref<64x1xf32, #tpu.memory_space<vmem>>, %arg3: memref<1x128xf32, #tpu.memory_space<vmem>>, %arg4: memref<1x128xf32, #tpu.memory_space<vmem>>, %arg5: memref<64x32xf32, #tpu.memory_space<vmem>>, %arg6: memref<64x32xf32, #tpu.memory_space<vmem>>, %arg7: memref<128x384xf32, #tpu.memory_space<vmem>>, %arg8: memref<1x384xf32, #tpu.memory_space<vmem>>, %arg9: memref<128x128xf32, #tpu.memory_space<vmem>>, %arg10: memref<1x128xf32, #tpu.memory_space<vmem>>, %arg11: memref<64x128xf32, #tpu.memory_space<vmem>>) attributes {dimension_semantics = [#tpu.dimension_semantics<parallel>], iteration_bounds = array<i64: 2>, scalar_prefetch = 0 : i64, scratch_operands = 0 : i64, tpu.core_type = #tpu.core_type<tc>, window_params = [{transform_indices = @transform_0, window_bounds = array<i64: 64, 128>}, {transform_indices = @transform_1, window_bounds = array<i64: 64, 1>}, {pipeline_mode = #tpu.pipeline_mode<synchronous>, transform_indices = @transform_2, window_bounds = array<i64: 1, 128>}, {pipeline_mode = #tpu.pipeline_mode<synchronous>, transform_indices = @transform_3, window_bounds = array<i64: 1, 128>}, {transform_indices = @transform_4, window_bounds = array<i64: 64, 32>}, {transform_indices = @transform_5, window_bounds = array<i64: 64, 32>}, {pipeline_mode = #tpu.pipeline_mode<synchronous>, transform_indices = @transform_6, window_bounds = array<i64: 128, 384>}, {pipeline_mode = #tpu.pipeline_mode<synchronous>, transform_indices = @transform_7, window_bounds = array<i64: 1, 384>}, {pipeline_mode = #tpu.pipeline_mode<synchronous>, transform_indices = @transform_8, window_bounds = array<i64: 128, 128>}, {pipeline_mode = #tpu.pipeline_mode<synchronous>, transform_indices = @transform_9, window_bounds = array<i64: 1, 128>}, {transform_indices = @transform_10, window_bounds = array<i64: 64, 128>}]} {
    %c0 = arith.constant 0 : index
    %c0_0 = arith.constant 0 : index
    %0 = vector.load %arg1[%c0, %c0_0] : memref<64x128xf32, #tpu.memory_space<vmem>>, vector<64x128xf32>
    %cst = arith.constant dense<0.000000e+00> : vector<64xf32>
    %1 = vector.multi_reduction <add>, %0, %cst [1] : vector<64x128xf32> to vector<64xf32>
    %2 = vector.shape_cast %1 : vector<64xf32> to vector<64x1xf32>
    %cst_1 = arith.constant 1.280000e+02 : f32
    %3 = vector.broadcast %cst_1 : f32 to vector<64x1xf32>
    %4 = arith.divf %2, %3 : vector<64x1xf32>
    %5 = vector.broadcast %4 : vector<64x1xf32> to vector<64x128xf32>
    %6 = arith.subf %0, %5 : vector<64x128xf32>
    %7 = arith.mulf %6, %6 : vector<64x128xf32>
    %cst_2 = arith.constant dense<0.000000e+00> : vector<64xf32>
    %8 = vector.multi_reduction <add>, %7, %cst_2 [1] : vector<64x128xf32> to vector<64xf32>
    %9 = vector.shape_cast %8 : vector<64xf32> to vector<64x1xf32>
    %cst_3 = arith.constant 1.280000e+02 : f32
    %10 = vector.broadcast %cst_3 : f32 to vector<64x1xf32>
    %11 = arith.divf %9, %10 : vector<64x1xf32>
    %12 = vector.broadcast %4 : vector<64x1xf32> to vector<64x128xf32>
    %13 = arith.subf %0, %12 : vector<64x128xf32>
    %cst_4 = arith.constant 9.99999974E-6 : f32
    %14 = vector.broadcast %cst_4 : f32 to vector<64x1xf32>
    %15 = arith.addf %11, %14 : vector<64x1xf32>
    %16 = math.rsqrt %15 : vector<64x1xf32>
    %17 = vector.broadcast %16 : vector<64x1xf32> to vector<64x128xf32>
    %18 = arith.mulf %13, %17 : vector<64x128xf32>
    %c0_5 = arith.constant 0 : index
    %c0_6 = arith.constant 0 : index
    %19 = vector.load %arg3[%c0_5, %c0_6] : memref<1x128xf32, #tpu.memory_space<vmem>>, vector<1x128xf32>
    %20 = vector.broadcast %19 : vector<1x128xf32> to vector<64x128xf32>
    %21 = arith.mulf %18, %20 : vector<64x128xf32>
    %c0_7 = arith.constant 0 : index
    %c0_8 = arith.constant 0 : index
    %22 = vector.load %arg4[%c0_7, %c0_8] : memref<1x128xf32, #tpu.memory_space<vmem>>, vector<1x128xf32>
    %23 = vector.broadcast %22 : vector<1x128xf32> to vector<64x128xf32>
    %24 = arith.addf %21, %23 : vector<64x128xf32>
    %c0_9 = arith.constant 0 : index
    %c0_10 = arith.constant 0 : index
    %25 = vector.load %arg2[%c0_9, %c0_10] : memref<64x1xf32, #tpu.memory_space<vmem>>, vector<64x1xf32>
    %cst_11 = arith.constant 5.000000e-01 : f32
    %26 = vector.broadcast %cst_11 : f32 to vector<64x1xf32>
    %27 = arith.cmpf ogt, %25, %26 : vector<64x1xf32>
    %28 = vector.shape_cast %27 : vector<64x1xi1> to vector<64x1xi1>
    %29 = vector.broadcast %28 : vector<64x1xi1> to vector<64x128xi1>
    %30 = arith.select %29, %0, %24 : vector<64x128xi1>, vector<64x128xf32>
    %c0_12 = arith.constant 0 : index
    %c0_13 = arith.constant 0 : index
    %31 = vector.load %arg7[%c0_12, %c0_13] : memref<128x384xf32, #tpu.memory_space<vmem>>, vector<128x384xf32>
    %cst_14 = arith.constant dense<0.000000e+00> : vector<64x384xf32>
    %32 = tpu.matmul %30, %31, %cst_14 {dimension_numbers = #tpu.dot_dimension_numbers<[1], [0], [0], [1], [0, 0, 1, 1], [], []>} : vector<64x128xf32>, vector<128x384xf32>, vector<64x384xf32> -> vector<64x384xf32>
    %c0_15 = arith.constant 0 : index
    %c0_16 = arith.constant 0 : index
    %33 = vector.load %arg8[%c0_15, %c0_16] : memref<1x384xf32, #tpu.memory_space<vmem>>, vector<1x384xf32>
    %34 = vector.broadcast %33 : vector<1x384xf32> to vector<64x384xf32>
    %35 = arith.addf %32, %34 : vector<64x384xf32>
    %36 = vector.extract_strided_slice %35 {offsets = [0, 0], sizes = [64, 128], strides = [1, 1]} : vector<64x384xf32> to vector<64x128xf32>
    %37 = vector.extract_strided_slice %35 {offsets = [0, 128], sizes = [64, 128], strides = [1, 1]} : vector<64x384xf32> to vector<64x128xf32>
    %38 = vector.extract_strided_slice %35 {offsets = [0, 256], sizes = [64, 128], strides = [1, 1]} : vector<64x384xf32> to vector<64x128xf32>
    %c0_17 = arith.constant 0 : index
    %c0_18 = arith.constant 0 : index
    %39 = vector.load %arg5[%c0_17, %c0_18] : memref<64x32xf32, #tpu.memory_space<vmem>>, vector<64x32xf32>
    %40 = tpu.concatenate %39, %39, %39, %39 in 1 : vector<64x32xf32>, vector<64x32xf32>, vector<64x32xf32>, vector<64x32xf32> -> vector<64x128xf32>
    %c0_19 = arith.constant 0 : index
    %c0_20 = arith.constant 0 : index
    %41 = vector.load %arg6[%c0_19, %c0_20] : memref<64x32xf32, #tpu.memory_space<vmem>>, vector<64x32xf32>
    %42 = tpu.concatenate %41, %41, %41, %41 in 1 : vector<64x32xf32>, vector<64x32xf32>, vector<64x32xf32>, vector<64x32xf32> -> vector<64x128xf32>
    %43 = arith.mulf %36, %40 : vector<64x128xf32>
    %44 = vector.extract_strided_slice %36 {offsets = [0, 0], sizes = [64, 16], strides = [1, 1]} : vector<64x128xf32> to vector<64x16xf32>
    %45 = vector.extract_strided_slice %36 {offsets = [0, 16], sizes = [64, 16], strides = [1, 1]} : vector<64x128xf32> to vector<64x16xf32>
    %cst_21 = arith.constant 0.000000e+00 : f32
    %46 = vector.broadcast %cst_21 : f32 to vector<64x16xf32>
    %47 = arith.subf %46, %45 : vector<64x16xf32>
    %48 = vector.extract_strided_slice %36 {offsets = [0, 32], sizes = [64, 16], strides = [1, 1]} : vector<64x128xf32> to vector<64x16xf32>
    %49 = vector.extract_strided_slice %36 {offsets = [0, 48], sizes = [64, 16], strides = [1, 1]} : vector<64x128xf32> to vector<64x16xf32>
    %cst_22 = arith.constant 0.000000e+00 : f32
    %50 = vector.broadcast %cst_22 : f32 to vector<64x16xf32>
    %51 = arith.subf %50, %49 : vector<64x16xf32>
    %52 = vector.extract_strided_slice %36 {offsets = [0, 64], sizes = [64, 16], strides = [1, 1]} : vector<64x128xf32> to vector<64x16xf32>
    %53 = vector.extract_strided_slice %36 {offsets = [0, 80], sizes = [64, 16], strides = [1, 1]} : vector<64x128xf32> to vector<64x16xf32>
    %cst_23 = arith.constant 0.000000e+00 : f32
    %54 = vector.broadcast %cst_23 : f32 to vector<64x16xf32>
    %55 = arith.subf %54, %53 : vector<64x16xf32>
    %56 = vector.extract_strided_slice %36 {offsets = [0, 96], sizes = [64, 16], strides = [1, 1]} : vector<64x128xf32> to vector<64x16xf32>
    %57 = vector.extract_strided_slice %36 {offsets = [0, 112], sizes = [64, 16], strides = [1, 1]} : vector<64x128xf32> to vector<64x16xf32>
    %cst_24 = arith.constant 0.000000e+00 : f32
    %58 = vector.broadcast %cst_24 : f32 to vector<64x16xf32>
    %59 = arith.subf %58, %57 : vector<64x16xf32>
    %60 = tpu.concatenate %47, %44, %51, %48, %55, %52, %59, %56 in 1 : vector<64x16xf32>, vector<64x16xf32>, vector<64x16xf32>, vector<64x16xf32>, vector<64x16xf32>, vector<64x16xf32>, vector<64x16xf32>, vector<64x16xf32> -> vector<64x128xf32>
    %61 = arith.mulf %60, %42 : vector<64x128xf32>
    %62 = arith.addf %43, %61 : vector<64x128xf32>
    %cst_25 = arith.constant 0.176776692 : f32
    %63 = vector.broadcast %cst_25 : f32 to vector<64x128xf32>
    %64 = arith.mulf %62, %63 : vector<64x128xf32>
    %65 = arith.mulf %37, %40 : vector<64x128xf32>
    %66 = vector.extract_strided_slice %37 {offsets = [0, 0], sizes = [64, 16], strides = [1, 1]} : vector<64x128xf32> to vector<64x16xf32>
    %67 = vector.extract_strided_slice %37 {offsets = [0, 16], sizes = [64, 16], strides = [1, 1]} : vector<64x128xf32> to vector<64x16xf32>
    %cst_26 = arith.constant 0.000000e+00 : f32
    %68 = vector.broadcast %cst_26 : f32 to vector<64x16xf32>
    %69 = arith.subf %68, %67 : vector<64x16xf32>
    %70 = vector.extract_strided_slice %37 {offsets = [0, 32], sizes = [64, 16], strides = [1, 1]} : vector<64x128xf32> to vector<64x16xf32>
    %71 = vector.extract_strided_slice %37 {offsets = [0, 48], sizes = [64, 16], strides = [1, 1]} : vector<64x128xf32> to vector<64x16xf32>
    %cst_27 = arith.constant 0.000000e+00 : f32
    %72 = vector.broadcast %cst_27 : f32 to vector<64x16xf32>
    %73 = arith.subf %72, %71 : vector<64x16xf32>
    %74 = vector.extract_strided_slice %37 {offsets = [0, 64], sizes = [64, 16], strides = [1, 1]} : vector<64x128xf32> to vector<64x16xf32>
    %75 = vector.extract_strided_slice %37 {offsets = [0, 80], sizes = [64, 16], strides = [1, 1]} : vector<64x128xf32> to vector<64x16xf32>
    %cst_28 = arith.constant 0.000000e+00 : f32
    %76 = vector.broadcast %cst_28 : f32 to vector<64x16xf32>
    %77 = arith.subf %76, %75 : vector<64x16xf32>
    %78 = vector.extract_strided_slice %37 {offsets = [0, 96], sizes = [64, 16], strides = [1, 1]} : vector<64x128xf32> to vector<64x16xf32>
    %79 = vector.extract_strided_slice %37 {offsets = [0, 112], sizes = [64, 16], strides = [1, 1]} : vector<64x128xf32> to vector<64x16xf32>
    %cst_29 = arith.constant 0.000000e+00 : f32
    %80 = vector.broadcast %cst_29 : f32 to vector<64x16xf32>
    %81 = arith.subf %80, %79 : vector<64x16xf32>
    %82 = tpu.concatenate %69, %66, %73, %70, %77, %74, %81, %78 in 1 : vector<64x16xf32>, vector<64x16xf32>, vector<64x16xf32>, vector<64x16xf32>, vector<64x16xf32>, vector<64x16xf32>, vector<64x16xf32>, vector<64x16xf32> -> vector<64x128xf32>
    %83 = arith.mulf %82, %42 : vector<64x128xf32>
    %84 = arith.addf %65, %83 : vector<64x128xf32>
    %85 = vector.shape_cast %64 : vector<64x128xf32> to vector<4x16x128xf32>
    %86 = vector.shape_cast %84 : vector<64x128xf32> to vector<4x16x128xf32>
    %87 = vector.shape_cast %38 : vector<64x128xf32> to vector<4x16x128xf32>
    %88 = vector.extract_strided_slice %85 {offsets = [0, 0, 0], sizes = [4, 16, 32], strides = [1, 1, 1]} : vector<4x16x128xf32> to vector<4x16x32xf32>
    %89 = vector.extract_strided_slice %86 {offsets = [0, 0, 0], sizes = [4, 16, 32], strides = [1, 1, 1]} : vector<4x16x128xf32> to vector<4x16x32xf32>
    %cst_30 = arith.constant dense<0.000000e+00> : vector<4x16x16xf32>
    %90 = tpu.matmul %88, %89, %cst_30 {dimension_numbers = #tpu.dot_dimension_numbers<[2], [2], [1], [1], [0, 0, 0, 1, 1, 1], [0], [0]>} : vector<4x16x32xf32>, vector<4x16x32xf32>, vector<4x16x16xf32> -> vector<4x16x16xf32>
    %cst_31 = arith.constant dense<0xFF800000> : vector<4x16xf32>
    %91 = vector.multi_reduction <maximumf>, %90, %cst_31 [2] : vector<4x16x16xf32> to vector<4x16xf32>
    %92 = vector.shape_cast %91 : vector<4x16xf32> to vector<4x16x1xf32>
    %93 = vector.broadcast %92 : vector<4x16x1xf32> to vector<4x16x16xf32>
    %94 = arith.subf %90, %93 : vector<4x16x16xf32>
    %95 = math.exp %94 : vector<4x16x16xf32>
    %cst_32 = arith.constant dense<0.000000e+00> : vector<4x16xf32>
    %96 = vector.multi_reduction <add>, %95, %cst_32 [2] : vector<4x16x16xf32> to vector<4x16xf32>
    %97 = vector.shape_cast %96 : vector<4x16xf32> to vector<4x16x1xf32>
    %98 = tpu.reciprocal %97 {approx = true} : vector<4x16x1xf32> -> vector<4x16x1xf32>
    %99 = vector.broadcast %98 : vector<4x16x1xf32> to vector<4x16x16xf32>
    %100 = arith.mulf %95, %99 : vector<4x16x16xf32>
    %101 = vector.extract_strided_slice %87 {offsets = [0, 0, 0], sizes = [4, 16, 32], strides = [1, 1, 1]} : vector<4x16x128xf32> to vector<4x16x32xf32>
    %cst_33 = arith.constant dense<0.000000e+00> : vector<4x16x32xf32>
    %102 = tpu.matmul %100, %101, %cst_33 {dimension_numbers = #tpu.dot_dimension_numbers<[2], [1], [1], [2], [0, 0, 0, 1, 1, 2], [0], [0]>} : vector<4x16x16xf32>, vector<4x16x32xf32>, vector<4x16x32xf32> -> vector<4x16x32xf32>
    %103 = vector.extract_strided_slice %85 {offsets = [0, 0, 32], sizes = [4, 16, 32], strides = [1, 1, 1]} : vector<4x16x128xf32> to vector<4x16x32xf32>
    %104 = vector.extract_strided_slice %86 {offsets = [0, 0, 32], sizes = [4, 16, 32], strides = [1, 1, 1]} : vector<4x16x128xf32> to vector<4x16x32xf32>
    %cst_34 = arith.constant dense<0.000000e+00> : vector<4x16x16xf32>
    %105 = tpu.matmul %103, %104, %cst_34 {dimension_numbers = #tpu.dot_dimension_numbers<[2], [2], [1], [1], [0, 0, 0, 1, 1, 1], [0], [0]>} : vector<4x16x32xf32>, vector<4x16x32xf32>, vector<4x16x16xf32> -> vector<4x16x16xf32>
    %cst_35 = arith.constant dense<0xFF800000> : vector<4x16xf32>
    %106 = vector.multi_reduction <maximumf>, %105, %cst_35 [2] : vector<4x16x16xf32> to vector<4x16xf32>
    %107 = vector.shape_cast %106 : vector<4x16xf32> to vector<4x16x1xf32>
    %108 = vector.broadcast %107 : vector<4x16x1xf32> to vector<4x16x16xf32>
    %109 = arith.subf %105, %108 : vector<4x16x16xf32>
    %110 = math.exp %109 : vector<4x16x16xf32>
    %cst_36 = arith.constant dense<0.000000e+00> : vector<4x16xf32>
    %111 = vector.multi_reduction <add>, %110, %cst_36 [2] : vector<4x16x16xf32> to vector<4x16xf32>
    %112 = vector.shape_cast %111 : vector<4x16xf32> to vector<4x16x1xf32>
    %113 = tpu.reciprocal %112 {approx = true} : vector<4x16x1xf32> -> vector<4x16x1xf32>
    %114 = vector.broadcast %113 : vector<4x16x1xf32> to vector<4x16x16xf32>
    %115 = arith.mulf %110, %114 : vector<4x16x16xf32>
    %116 = vector.extract_strided_slice %87 {offsets = [0, 0, 32], sizes = [4, 16, 32], strides = [1, 1, 1]} : vector<4x16x128xf32> to vector<4x16x32xf32>
    %cst_37 = arith.constant dense<0.000000e+00> : vector<4x16x32xf32>
    %117 = tpu.matmul %115, %116, %cst_37 {dimension_numbers = #tpu.dot_dimension_numbers<[2], [1], [1], [2], [0, 0, 0, 1, 1, 2], [0], [0]>} : vector<4x16x16xf32>, vector<4x16x32xf32>, vector<4x16x32xf32> -> vector<4x16x32xf32>
    %118 = vector.extract_strided_slice %85 {offsets = [0, 0, 64], sizes = [4, 16, 32], strides = [1, 1, 1]} : vector<4x16x128xf32> to vector<4x16x32xf32>
    %119 = vector.extract_strided_slice %86 {offsets = [0, 0, 64], sizes = [4, 16, 32], strides = [1, 1, 1]} : vector<4x16x128xf32> to vector<4x16x32xf32>
    %cst_38 = arith.constant dense<0.000000e+00> : vector<4x16x16xf32>
    %120 = tpu.matmul %118, %119, %cst_38 {dimension_numbers = #tpu.dot_dimension_numbers<[2], [2], [1], [1], [0, 0, 0, 1, 1, 1], [0], [0]>} : vector<4x16x32xf32>, vector<4x16x32xf32>, vector<4x16x16xf32> -> vector<4x16x16xf32>
    %cst_39 = arith.constant dense<0xFF800000> : vector<4x16xf32>
    %121 = vector.multi_reduction <maximumf>, %120, %cst_39 [2] : vector<4x16x16xf32> to vector<4x16xf32>
    %122 = vector.shape_cast %121 : vector<4x16xf32> to vector<4x16x1xf32>
    %123 = vector.broadcast %122 : vector<4x16x1xf32> to vector<4x16x16xf32>
    %124 = arith.subf %120, %123 : vector<4x16x16xf32>
    %125 = math.exp %124 : vector<4x16x16xf32>
    %cst_40 = arith.constant dense<0.000000e+00> : vector<4x16xf32>
    %126 = vector.multi_reduction <add>, %125, %cst_40 [2] : vector<4x16x16xf32> to vector<4x16xf32>
    %127 = vector.shape_cast %126 : vector<4x16xf32> to vector<4x16x1xf32>
    %128 = tpu.reciprocal %127 {approx = true} : vector<4x16x1xf32> -> vector<4x16x1xf32>
    %129 = vector.broadcast %128 : vector<4x16x1xf32> to vector<4x16x16xf32>
    %130 = arith.mulf %125, %129 : vector<4x16x16xf32>
    %131 = vector.extract_strided_slice %87 {offsets = [0, 0, 64], sizes = [4, 16, 32], strides = [1, 1, 1]} : vector<4x16x128xf32> to vector<4x16x32xf32>
    %cst_41 = arith.constant dense<0.000000e+00> : vector<4x16x32xf32>
    %132 = tpu.matmul %130, %131, %cst_41 {dimension_numbers = #tpu.dot_dimension_numbers<[2], [1], [1], [2], [0, 0, 0, 1, 1, 2], [0], [0]>} : vector<4x16x16xf32>, vector<4x16x32xf32>, vector<4x16x32xf32> -> vector<4x16x32xf32>
    %133 = vector.extract_strided_slice %85 {offsets = [0, 0, 96], sizes = [4, 16, 32], strides = [1, 1, 1]} : vector<4x16x128xf32> to vector<4x16x32xf32>
    %134 = vector.extract_strided_slice %86 {offsets = [0, 0, 96], sizes = [4, 16, 32], strides = [1, 1, 1]} : vector<4x16x128xf32> to vector<4x16x32xf32>
    %cst_42 = arith.constant dense<0.000000e+00> : vector<4x16x16xf32>
    %135 = tpu.matmul %133, %134, %cst_42 {dimension_numbers = #tpu.dot_dimension_numbers<[2], [2], [1], [1], [0, 0, 0, 1, 1, 1], [0], [0]>} : vector<4x16x32xf32>, vector<4x16x32xf32>, vector<4x16x16xf32> -> vector<4x16x16xf32>
    %cst_43 = arith.constant dense<0xFF800000> : vector<4x16xf32>
    %136 = vector.multi_reduction <maximumf>, %135, %cst_43 [2] : vector<4x16x16xf32> to vector<4x16xf32>
    %137 = vector.shape_cast %136 : vector<4x16xf32> to vector<4x16x1xf32>
    %138 = vector.broadcast %137 : vector<4x16x1xf32> to vector<4x16x16xf32>
    %139 = arith.subf %135, %138 : vector<4x16x16xf32>
    %140 = math.exp %139 : vector<4x16x16xf32>
    %cst_44 = arith.constant dense<0.000000e+00> : vector<4x16xf32>
    %141 = vector.multi_reduction <add>, %140, %cst_44 [2] : vector<4x16x16xf32> to vector<4x16xf32>
    %142 = vector.shape_cast %141 : vector<4x16xf32> to vector<4x16x1xf32>
    %143 = tpu.reciprocal %142 {approx = true} : vector<4x16x1xf32> -> vector<4x16x1xf32>
    %144 = vector.broadcast %143 : vector<4x16x1xf32> to vector<4x16x16xf32>
    %145 = arith.mulf %140, %144 : vector<4x16x16xf32>
    %146 = vector.extract_strided_slice %87 {offsets = [0, 0, 96], sizes = [4, 16, 32], strides = [1, 1, 1]} : vector<4x16x128xf32> to vector<4x16x32xf32>
    %cst_45 = arith.constant dense<0.000000e+00> : vector<4x16x32xf32>
    %147 = tpu.matmul %145, %146, %cst_45 {dimension_numbers = #tpu.dot_dimension_numbers<[2], [1], [1], [2], [0, 0, 0, 1, 1, 2], [0], [0]>} : vector<4x16x16xf32>, vector<4x16x32xf32>, vector<4x16x32xf32> -> vector<4x16x32xf32>
    %148 = tpu.concatenate %102, %117, %132, %147 in 2 : vector<4x16x32xf32>, vector<4x16x32xf32>, vector<4x16x32xf32>, vector<4x16x32xf32> -> vector<4x16x128xf32>
    %149 = vector.shape_cast %148 : vector<4x16x128xf32> to vector<64x128xf32>
    %c0_46 = arith.constant 0 : index
    %c0_47 = arith.constant 0 : index
    %150 = vector.load %arg9[%c0_46, %c0_47] : memref<128x128xf32, #tpu.memory_space<vmem>>, vector<128x128xf32>
    %cst_48 = arith.constant dense<0.000000e+00> : vector<64x128xf32>
    %151 = tpu.matmul %149, %150, %cst_48 {dimension_numbers = #tpu.dot_dimension_numbers<[1], [0], [0], [1], [0, 0, 1, 1], [], []>} : vector<64x128xf32>, vector<128x128xf32>, vector<64x128xf32> -> vector<64x128xf32>
    %c0_49 = arith.constant 0 : index
    %c0_50 = arith.constant 0 : index
    %152 = vector.load %arg10[%c0_49, %c0_50] : memref<1x128xf32, #tpu.memory_space<vmem>>, vector<1x128xf32>
    %153 = vector.broadcast %152 : vector<1x128xf32> to vector<64x128xf32>
    %154 = arith.addf %151, %153 : vector<64x128xf32>
    %c0_51 = arith.constant 0 : index
    %c0_52 = arith.constant 0 : index
    %155 = vector.load %arg11[%c0_51, %c0_52] : memref<64x128xf32, #tpu.memory_space<vmem>>, vector<64x128xf32>
    tpu.vector_store %arg11[%c0_51, %c0_52], %154 {strides = array<i32>} : memref<64x128xf32, #tpu.memory_space<vmem>>, vector<64x128xf32>,
    return
  }
  func.func @transform_0(%arg0: i32) -> (i32, i32) {
    %c0_i32 = arith.constant 0 : i32
    %c0_i32_0 = arith.constant 0 : i32
    return %arg0, %c0_i32 : i32, i32
  }
  func.func @transform_1(%arg0: i32) -> (i32, i32) {
    %c0_i32 = arith.constant 0 : i32
    %c0_i32_0 = arith.constant 0 : i32
    return %arg0, %c0_i32 : i32, i32
  }
  func.func @transform_2(%arg0: i32) -> (i32, i32) {
    %c0_i32 = arith.constant 0 : i32
    %c0_i32_0 = arith.constant 0 : i32
    %c0_i32_1 = arith.constant 0 : i32
    return %c0_i32, %c0_i32_0 : i32, i32
  }
  func.func @transform_3(%arg0: i32) -> (i32, i32) {
    %c0_i32 = arith.constant 0 : i32
    %c0_i32_0 = arith.constant 0 : i32
    %c0_i32_1 = arith.constant 0 : i32
    return %c0_i32, %c0_i32_0 : i32, i32
  }
  func.func @transform_4(%arg0: i32) -> (i32, i32) {
    %c0_i32 = arith.constant 0 : i32
    %c0_i32_0 = arith.constant 0 : i32
    return %arg0, %c0_i32 : i32, i32
  }
  func.func @transform_5(%arg0: i32) -> (i32, i32) {
    %c0_i32 = arith.constant 0 : i32
    %c0_i32_0 = arith.constant 0 : i32
    return %arg0, %c0_i32 : i32, i32
  }
  func.func @transform_6(%arg0: i32) -> (i32, i32) {
    %c0_i32 = arith.constant 0 : i32
    %c0_i32_0 = arith.constant 0 : i32
    %c0_i32_1 = arith.constant 0 : i32
    return %c0_i32, %c0_i32_0 : i32, i32
  }
  func.func @transform_7(%arg0: i32) -> (i32, i32) {
    %c0_i32 = arith.constant 0 : i32
    %c0_i32_0 = arith.constant 0 : i32
    %c0_i32_1 = arith.constant 0 : i32
    return %c0_i32, %c0_i32_0 : i32, i32
  }
  func.func @transform_8(%arg0: i32) -> (i32, i32) {
    %c0_i32 = arith.constant 0 : i32
    %c0_i32_0 = arith.constant 0 : i32
    %c0_i32_1 = arith.constant 0 : i32
    return %c0_i32, %c0_i32_0 : i32, i32
  }
  func.func @transform_9(%arg0: i32) -> (i32, i32) {
    %c0_i32 = arith.constant 0 : i32
    %c0_i32_0 = arith.constant 0 : i32
    %c0_i32_1 = arith.constant 0 : i32
    return %c0_i32, %c0_i32_0 : i32, i32
  }
  func.func @transform_10(%arg0: i32) -> (i32, i32) {
    %c0_i32 = arith.constant 0 : i32
    %c0_i32_0 = arith.constant 0 : i32
    return %arg0, %c0_i32 : i32, i32
  }
}

</mosaic_0001>

<bundles_post_ra>
// kernel: tpu_custom_call.1
= control target key start
LH: loop header
LB: loop body
LE: loop exit
PB: predicated region body
PF: predicated region fallthrough
CT: control target
= control target key end

     0   :  { %s8074_s0 = inlined_call_operand.hbm [shape: f32[128,128], index: 0, kind: input, shape index: {}]   ;;  %s8075_s1 = inlined_call_operand.vmem [shape: f32[128,1], index: 1, kind: input, shape index: {}]   ;;  %s8076_s2 = inlined_call_operand.vmem [shape: f32[1,128], index: 2, kind: input, shape index: {}]   ;;  %s8077_s3 = inlined_call_operand.vmem [shape: f32[1,128], index: 3, kind: input, shape index: {}]   ;;  %s8078_s4 = inlined_call_operand.vmem [shape: f32[128,32], index: 4, kind: input, shape index: {}]   ;;  %s8079_s5 = inlined_call_operand.vmem [shape: f32[128,32], index: 5, kind: input, shape index: {}]   ;;  %s8080_s6 = inlined_call_operand.vmem [shape: f32[128,384], index: 6, kind: input, shape index: {}]   ;;  %s8081_s7 = inlined_call_operand.vmem [shape: f32[1,384], index: 7, kind: input, shape index: {}]   ;;  %s8082_s8 = inlined_call_operand.hbm [shape: f32[128,128], index: 8, kind: input, shape index: {}]   ;;  %s8083_s9 = inlined_call_operand.vmem [shape: f32[1,128], index: 9, kind: input, shape index: {}]   ;;  %s8084_s10 = inlined_call_operand.hbm [shape: f32[128,128], index: 10, kind: output, shape index: {}]  }
   0x1   :  { %8108 = sst [smem:[#allocation38_spill]] %s8082_s8 }
   0x2   :  { %15 = vsyncpa [#allocation3], 0 }
   0x3   :  { %17 = vsyncpa [#allocation3 + $0x1], 0 }
   0x4   :  { %18 = vsyncpa [#allocation6], 0 }
   0x5   :  { %19 = vsyncpa [#allocation4], 0 }
   0x6   :  { %21 = vsyncpa [#allocation4 + $0x1], 0  ;;  %s6147_s13 = smov 0   ;;  %s6149_s14 = smov 0  }
   0x7   :  { %s6151_s15 = smov 0   ;;  %s6153_s16 = smov 0  }
   0x8 LB: > { %8109 = sst [smem:[#allocation11_spill]] %s6064_s13  ;;  %s6168_s17 = sadd.s32 4294967295, %s6076_s16   ;;  %s6076_s16 = sphi %s6153_s16, %s8179_s16   ;;  %s6072_s15 = sphi %s6151_s15, %s8182_s15   ;;  %s6068_s14 = sphi %s6149_s14, %s8181_s14   ;;  %s6064_s13 = sphi %s6147_s13, %s8180_s13  }
   0x9   : > { %s5035_s18 = sadd.s32 4294967294, %s6076_s16   ;;  %p47_p0 = scmp.ne.s32.totalorder %s6068_s14, %s6064_s13 }
   0xa   : > { %p8090_p1 = scmp.eq.s32.totalorder %s6168_s17, 0  ;;  %p281_p3 = scmp.eq.s32.totalorder %s5035_s18, 1 }
   0xb   : > { %p5036_p5 = scmp.ge.s32.totalorder %s6076_s16, 1  ;;  %p288_p7 = scmp.lt.s32.totalorder %s6076_s16, 3 }
   0xc   : > { %p6177_p4 = por %p8090_p1, %p47_p0  ;;  %p6182_p6 = por %p281_p3, %p47_p0 }
   0xd   : > { %p6187_p8 = pnand %p5036_p5, %p288_p7  ;;  %s6078_s22 = smov [#allocation5]  }
   0xe   : > { %s8110_s19 = scalar_select %p6177_p4, 1, 0 }
   0xf   : > { %s8111_s20 = scalar_select %p6182_p6, 1, 0 }
  0x10   : > { %s8113_s21 = scalar_select %p6187_p8, 1, 0 }
  0x11   : > { %8112 = sst [smem:[#allocation12_spill]] %s8111_s20  ;;  %s312_s23 = sshll.u32 %s6078_s22, 4  ;;  %s313_s23 = int_to_ptr.vmem [resolvable:$true] %s312_s23 }
  0x12   : > { %p5686_p9 = pneg %p6187_p8  ;;  %s6201_s25 = sadd.s32 1, %s6076_s16  }
  0x13   : > { %8115 = sst [smem:[#allocation13_spill]] %s6201_s25  ;;  %s34_s26 = sadd.s32 1, %s6072_s15 }
  0x14   : > { %p6196_p11 = pnand %p5686_p9, %p8090_p1  ;;  %s31_s27 = ssub.s32 %s6076_s16, %s6201_s25 }
  0x15   : > { %s5965_s28 = scalar_lea.vmem %s313_s23, 2048  ;;  %p5973_p5 = scmp.lt.s32.totalorder %s313_s23, %s313_s23 }
  0x16   : > { %p5956_p12 = pneg %p6196_p11  ;;  %p5966_p13 = scmp.ne.s32.totalorder %s313_s23, %s5965_s28 }
  0x17   : > { %p5974_p7 = scmp.lt.s32.totalorder %s5965_s28, %s5965_s28 }
  0x18   : > { %p5968_p0 = pnand %p5966_p13, %p5956_p12 }
  0x19   : > { %p5975_p10 = por %p5974_p7, %p5973_p5 }
  0x1a   : > { %p5969_p3 = pneg %p5968_p0 }
  0x1c   : > { %p5976_p2 = pnand %p5975_p10, %p5969_p3 }
  0x1e   : > { %5979 = shalt.err (!%p5976_p2)
}
  0x1f   : > { %s8089_s29 = smov 128   ;;  %s8091_s30 = smov 8  }
  0x20   : > { %s8116_s8 = sld [smem:[#allocation38_spill]]  ;;  %p32_p2 = scmp.eq.s32.totalorder %s31_s27, 0 }
  0x21   : > { %p41_p9 = scmp.ne.s32.totalorder %s6072_s15, %s6068_s14  ;;  %p42_p10 = scmp.eq.s32.totalorder %s6076_s16, 0 }
  0x22   : > { %p5699_p12 = scmp.lt.s32.totalorder %s6076_s16, 2  ;;  %p8117_p0 = scmp.eq.s32.totalorder %s6168_s17, 1 }
  0x23   : > { %s6221_s18 = scalar_select %p32_p2, %s6072_s15, %s34_s26  }
  0x24   : > { %p43_p13 = por %p42_p10, %p41_p9  ;;  %p6225_p3 = por %p8117_p0, %p41_p9 }
  0x25   : > { %s329_s24 = sand.u32 1, %s6072_s15   ;;  %s5156_s28 = sshll.u32 %s6076_s16, 10 }
  0x26   : > { %5689 = dma.hbm_to_vmem [thread:$0]  (!%p6196_p11), %s8116_s8, 2048, %s313_s23, [#allocation6], %s8089_s29, %s8089_s29, %s8091_s30  }
  0x27   : > { %s8118_s22 = scalar_select %p6225_p3, 1, 0 }
  0x28   : > { %s5039_s25 = sshll.u32 %s329_s24, 6  ;;  %s6234_s11 = scalar_lea.hbm %s8074_s0, %s5156_s28 }
  0x29   : > { %s333_s23 = scalar_lea.vmem [#allocation2], %s5039_s25  ;;  %p6236_p11 = pnand %p5699_p12, %p43_p13 }
  0x2a   : > { %s340_s26 = sshll.u32 %s333_s23, 4  ;;  %s6242_s12 = scalar_lea.sflag [#allocation3], %s329_s24  ;;  %s6240_s26 = int_to_ptr.vmem [resolvable:$true] %s340_s26 }
  0x2b   : > { %s5980_s29 = scalar_lea.hbm %s6234_s11, 1024  ;;  %p5982_p7 = pneg %p6236_p11 }
  0x2c   : > { %p5981_p5 = scmp.ne.s32.totalorder %s6234_s11, %s5980_s29  ;;  %s5985_s25 = scalar_lea.hbm %s8074_s0, 2048 }
  0x2d   : > { %p5986_p10 = scmp.lt.s32.totalorder %s6234_s11, %s8074_s0  ;;  %p5987_p12 = scmp.lt.s32.totalorder %s5985_s25, %s5980_s29 }
  0x2e   : > { %p5983_p2 = pnand %p5982_p7, %p5981_p5 }
  0x2f   : > { %p5988_p13 = por %p5987_p12, %p5986_p10 }
  0x30   : > { %p5984_p9 = pneg %p5983_p2 }
  0x32   : > { %p5989_p0 = pnand %p5988_p13, %p5984_p9 }
  0x34   : > { %5992 = shalt.err (!%p5989_p0)
}
  0x35   : > { %s5993_s24 = scalar_lea.vmem %s6240_s26, 1024  ;;  %s6081_s30 = smov [#allocation2]  }
  0x36   : > { %p5994_p1 = scmp.ne.s32.totalorder %s6240_s26, %s5993_s24  ;;  %s5998_s8 = sshll.u32 %s6081_s30, 4  ;;  %s5999_s8 = int_to_ptr.vmem [resolvable:$false] %s5998_s8 }
  0x37   : > { %s6000_s13 = scalar_lea.vmem %s5999_s8, 2048  ;;  %p6001_p2 = scmp.lt.s32.totalorder %s6240_s26, %s5999_s8 }
  0x38   : > { %p5996_p6 = pnand %p5994_p1, %p5982_p7  ;;  %p6002_p3 = scmp.lt.s32.totalorder %s6000_s13, %s5993_s24 }
  0x3a   : > { %p5997_p5 = pneg %p5996_p6  ;;  %p6003_p4 = por %p6002_p3, %p6001_p2 }
  0x3c   : > { %p6004_p8 = pnand %p6003_p4, %p5997_p5 }
  0x3e   : > { %6007 = shalt.err (!%p6004_p8)
}
  0x3f   : > { %s8120_s29 = smov 8   ;;  %s8121_s20 = smov 128  }
  0x40   : > { %5693 = dma.hbm_to_vmem [thread:$0]  (!%p6236_p11), %s6234_s11, 1024, %s6240_s26, %s6242_s12, %s8121_s20, %s8121_s20, %s8120_s29  }
  0x41   : > { %p8122_p1 = scmp.ne.s32.totalorder %s8113_s21, 0 }
  0x43   : > { %379 = sbr.rel (%p8122_p1) target bundleno = 3419 (0xd5b), region = 60 }
  0x48   : > { %s6269_s30 = sand.u32 1, %s6068_s14   ;;  %p8123_p4 = scmp.ne.s32.totalorder %s8110_s19, 0 }
  0x49   : > { %s5043_s8 = sshll.u32 %s6269_s30, 6  ;;  %s382_s25 = scalar_lea.sflag [#allocation3], %s6269_s30 }
  0x4a   : > { %s385_s27 = scalar_lea.vmem [#allocation2], %s5043_s8 }
  0x4b   : > { %6051 = dma.done.wait (%p8123_p4), %s382_s25, 1024  }
  0x4c   : > { %6053 = vsyncadd (%p8123_p4), %s382_s25, 4294966272  ;;  %p8124_p6 = scmp.eq.s32.totalorder %s6168_s17, 0 }
  0x4e   : > { %6055 = dma.done.wait (%p8124_p6), [#allocation6], 2048   ;;  %p8125_p8 = pmov %p8124_p6 }
  0x4f   : > { %v6283_v0 = vld [vmem:[%s385_s27] sm:$0xff]  ;;  %v6285_v1 = vld [vmem:[%s385_s27 + $0x10] sm:$0xff]  ;;  %v6289_v2 = vld [vmem:[%s385_s27 + $0x8] sm:$0xff]  ;;  %v6082_v8 = vmov 0   ;;  %s5046_s28 = sshll.u32 %s6168_s17, 3  ;;  %s6086_s19 = smov 96  }
  0x50   : > { %6057 = vsyncadd (%p8125_p8), [#allocation6], 4294965248  ;;  %469 = vadd.xlane.f32.xlu0 %v6283_v0  ;;  %473 = vadd.xlane.f32.xlu1 %v6285_v1  ;;  %v6291_v3 = vld [vmem:[%s385_s27 + $0x18] sm:$0xff]  ;;  %v6295_v4 = vld [vmem:[%s385_s27 + $0x20] sm:$0xff]  ;;  %p443_p3 = scmp.lt.s32.totalorder %s5046_s28, 15  ;;  %s6087_s21 = smov 16  }
  0x51   : > { %v6297_v5 = vld [vmem:[%s385_s27 + $0x28] sm:$0xff]  ;;  %v6301_v6 = vld [vmem:[%s385_s27 + $0x30] sm:$0xff]  ;;  %v6303_v7 = vld [vmem:[%s385_s27 + $0x38] sm:$0xff]  ;;  %5747 = vset.pattern.permute.xlu1 %v6082_v8  ;;  %5746 = vset.pattern.permute.xlu0 %v6082_v8  ;;  %s6084_s27 = smov 32   ;;  %s6088_s11 = smov 112  }
  0x52   : > { %v698_v9 = vld [vmem:[%s8080_s6 + $0x170] sm:$0xff]  ;;  %v697_v10 = vld [vmem:[%s8080_s6 + $0x168] sm:$0xff]  ;;  %v695_v11 = vld [vmem:[%s8080_s6 + $0x158] sm:$0xff]  ;;  %s8184_s28 = smov (!%p443_p3, %s5046_s28), 15  ;;  %s4903_s24 = scalar_lea.sflag [#allocation4], %s6269_s30 }
  0x53   : > { %717 = vmatprep.subr.mxu1 %v698_v9  ;;  %v694_v12 = vld [vmem:[%s8080_s6 + $0x150] sm:$0xff]  ;;  %v6324_v13 = vld [vmem:[%s8080_s6 + $0x178] sm:$0xff]  ;;  %v692_v14 = vld [vmem:[%s8080_s6 + $0x140] sm:$0xff]  ;;  %s6404_s23 = sshll.u32 %s8184_s28, 3  ;;  %s6085_s28 = smov 64  }
  0x54   : > { %471 = vadd.xlane.f32.xlu0 %v6289_v2  ;;  %475 = vadd.xlane.f32.xlu1 %v6291_v3  ;;  %v6333_v15 = vld [vmem:[%s8080_s6 + $0x160] sm:$0xff]  ;;  %v691_v16 = vld [vmem:[%s8080_s6 + $0x138] sm:$0xff]  ;;  %v689_v17 = vld [vmem:[%s8080_s6 + $0x128] sm:$0xff]  ;;  %s6427_s26 = scalar_lea.vmem %s8075_s1, %s6404_s23  ;;  %s6581_s25 = scalar_lea.vmem %s8079_s5, %s6404_s23 }
  0x55   : > { %718 = vmatpush1.msra.mxu1 %v697_v10  ;;  %5334 = vmatprep.subr.mxu0 %v6324_v13  ;;  %v688_v45 = vld [vmem:[%s8080_s6 + $0x120] sm:$0xff]  ;;  %v686_v47 = vld [vmem:[%s8080_s6 + $0x110] sm:$0xff]  ;;  %v6389_v48 = vld [vmem:[%s8080_s6 + $0x148] sm:$0xff]  ;;  %s6610_s12 = scalar_lea.vmem %s8078_s4, %s6404_s23  ;;  %p8174_p7 = scmp.ne.s32.totalorder %s8118_s22, 0 }
  0x56   : > { %719 = vmatprep.subr.mxu1 %v695_v11  ;;  %5335 = vmatpush3.msra.mxu0 %v6324_v13  ;;  %v685_v49 = vld [vmem:[%s8080_s6 + $0x108] sm:$0xff]  ;;  %v683_v50 = vld [vmem:[%s8080_s6 + $0xf8] sm:$0xff]  ;;  %v6401_v51 = vld [vmem:[%s8080_s6 + $0x130] sm:$0xff] }
  0x57   : > { %720 = vmatpush1.msra.mxu1 %v694_v12  ;;  %5336 = vmatprep.subr.mxu0 %v6333_v15  ;;  %v682_v52 = vld [vmem:[%s8080_s6 + $0xf0] sm:$0xff]  ;;  %v680_v53 = vld [vmem:[%s8080_s6 + $0xe0] sm:$0xff]  ;;  %v6417_v54 = vld [vmem:[%s8080_s6 + $0x118] sm:$0xff] }
  0x58   : > { %477 = vadd.xlane.f32.xlu0 %v6295_v4  ;;  %479 = vadd.xlane.f32.xlu1 %v6297_v5  ;;  %v679_v55 = vld [vmem:[%s8080_s6 + $0xd8] sm:$0xff]  ;;  %v677_v56 = vld [vmem:[%s8080_s6 + $0xc8] sm:$0xff]  ;;  %v6436_v57 = vld [vmem:[%s8080_s6 + $0x100] sm:$0xff] }
  0x59   : > { %721 = vmatprep.subr.mxu1 %v692_v14  ;;  %5337 = vmatpush3.msra.mxu0 %v6333_v15  ;;  %v676_v58 = vld [vmem:[%s8080_s6 + $0xc0] sm:$0xff]  ;;  %v674_v59 = vld [vmem:[%s8080_s6 + $0xb0] sm:$0xff]  ;;  %v6449_v60 = vld [vmem:[%s8080_s6 + $0xe8] sm:$0xff] }
  0x5a   : > { %722 = vmatpush1.msra.mxu1 %v691_v16  ;;  %5338 = vmatprep.subr.mxu0 %v6389_v48  ;;  %v589_v61 = vld [vmem:[%s6427_s26 + $0x8] sm:$0xff]  ;;  %v671_v63 = vld [vmem:[%s8080_s6 + $0x98] sm:$0xff]  ;;  %v6463_v9 = vld [vmem:[%s8080_s6 + $0xd0] sm:$0xff] }
  0x5b   : > { %723 = vmatprep.subr.mxu1 %v689_v17  ;;  %5339 = vmatpush3.msra.mxu0 %v6389_v48  ;;  %v673_v62 = vld [vmem:[%s8080_s6 + $0xa8] sm:$0xff]  ;;  %v670_v10 = vld [vmem:[%s8080_s6 + $0x90] sm:$0xff]  ;;  %vm597_vm0 = vcmp.gt.f32.partialorder %v589_v61, 0.5  ;;  %v668_v11 = vld [vmem:[%s8080_s6 + $0x80] sm:$0xff] }
  0x5c   : > { %481 = vadd.xlane.f32.xlu0 %v6301_v6  ;;  %483 = vadd.xlane.f32.xlu1 %v6303_v7  ;;  %v6476_v12 = vld [vmem:[%s8080_s6 + $0xb8] sm:$0xff]  ;;  %v590_v14 = vld [vmem:[%s6427_s26 + $0x10] sm:$0xff]  ;;  %v588_v17 = vld [vmem:[%s6427_s26] sm:$0xff] }
  0x5d   : > { %724 = vmatpush1.msra.mxu1 %v688_v45  ;;  %5340 = vmatprep.subr.mxu0 %v6401_v51  ;;  %v667_v16 = vld [vmem:[%s8080_s6 + $0x78] sm:$0xff]  ;;  %vm598_vm1 = vcmp.gt.f32.partialorder %v590_v14, 0.5  ;;  %vm596_vm2 = vcmp.gt.f32.partialorder %v588_v17, 0.5  ;;  %v652_v45 = vld [vmem:[%s8080_s6] sm:$0xff] }
  0x5e   : > { %725 = vmatprep.subr.mxu1 %v686_v47  ;;  %5341 = vmatpush3.msra.mxu0 %v6401_v51  ;;  %v6559_v47 = vld [vmem:[%s8080_s6 + $0x28] sm:$0xff]  ;;  %v6631_v17 = vld [vmem:[%s6610_s12] sm:$0xff] }
  0x5f   : > { %726 = vmatpush1.msra.mxu1 %v685_v49  ;;  %5342 = vmatprep.subr.mxu0 %v6417_v54  ;;  %v6083_v49 = vmov 0.0  }
  0x60   : > { %727 = vmatprep.subr.mxu1 %v683_v50  ;;  %5343 = vmatpush3.msra.mxu0 %v6417_v54 }
  0x61   : > { %728 = vmatpush1.msra.mxu1 %v682_v52  ;;  %5344 = vmatprep.subr.mxu0 %v6436_v57  ;;  %v6567_v52 = vld [vmem:[%s8080_s6 + $0x10] sm:$0xff] }
  0x62   : > { %729 = vmatprep.subr.mxu1 %v680_v53  ;;  %5345 = vmatpush3.msra.mxu0 %v6436_v57  ;;  %v594_v53 = vld [vmem:[%s6427_s26 + $0x30] sm:$0xff] }
  0x63   : > { %730 = vmatpush1.msra.mxu1 %v679_v55  ;;  %5346 = vmatprep.subr.mxu0 %v6449_v60  ;;  %vm602_vm6 = vcmp.gt.f32.partialorder %v594_v53, 0.5 }
  0x64   : > { %731 = vmatprep.subr.mxu1 %v677_v56  ;;  %5347 = vmatpush3.msra.mxu0 %v6449_v60  ;;  %v610_v56 = vsel %vm602_vm6, 1, %v6082_v8  ;;  %vm1293_vm6 = vcmask 916480  }
  0x65   : > { %732 = vmatpush1.msra.mxu1 %v676_v58  ;;  %5348 = vmatprep.subr.mxu0 %v6463_v9  ;;  %v6584_v58 = vld [vmem:[%s6581_s25 + $0x8] sm:$0xff] }
  0x66   : > { %733 = vmatprep.subr.mxu1 %v674_v59  ;;  %5349 = vmatpush3.msra.mxu0 %v6463_v9 }
  0x67   : > { %734 = vmatpush1.msra.mxu1 %v673_v62  ;;  %5350 = vmatprep.subr.mxu0 %v6476_v12 }
  0x68   : > { %735 = vmatprep.subr.mxu1 %v671_v63  ;;  %5351 = vmatpush3.msra.mxu0 %v6476_v12 }
  0x69   : > { %736 = vmatpush1.msra.mxu1 %v670_v10  ;;  %781 = vmatprep.mubr.f32.mxu1 %v6083_v49  ;;  %v595_v10 = vld [vmem:[%s6427_s26 + $0x38] sm:$0xff] }
  0x6a   : > { %737 = vmatprep.subr.mxu1 %v668_v11  ;;  %v6599_v11 = vld [vmem:[%s6581_s25] sm:$0xff]  ;;  %vm603_vm7 = vcmp.gt.f32.partialorder %v595_v10, 0.5 }
  0x6b   : > { %738 = vmatpush1.msra.mxu1 %v667_v16  ;;  %v611_v14 = vsel %vm603_vm7, 1, %v6082_v8  ;;  %v6613_v16 = vld [vmem:[%s6610_s12 + $0x8] sm:$0xff] }
  0xd9   : > { %v470_v18 = vpop.xlane.xlu0 %469  ;;  %v474_v19 = vpop.xlane.xlu1 %473 }
  0xda   : > { %v486_v20 = vmul.f32 0.0078125, %v470_v18  ;;  %v488_v21 = vmul.f32 0.0078125, %v474_v19  ;;  %v665_v18 = vld [vmem:[%s8080_s6 + $0x68] sm:$0xff]  ;;  %v6491_v19 = vld [vmem:[%s8080_s6 + $0xa0] sm:$0xff] }
  0xdb   : > { %739 = vmatprep.subr.mxu1 %v665_v18  ;;  %5352 = vmatprep.subr.mxu0 %v6491_v19  ;;  %v6636_v18 = vld [vmem:[%s6610_s12 + $0x28] sm:$0xff] }
  0xdc   : > { %v6345_v22 = vsub.f32 %v6283_v0, %v486_v20  ;;  %v6348_v23 = vsub.f32 %v6285_v1, %v488_v21  ;;  %v605_v20 = vsel %vm597_vm0, 1, %v6082_v8  ;;  %v664_v21 = vld [vmem:[%s8080_s6 + $0x60] sm:$0xff]  ;;  %5353 = vmatpush3.msra.mxu0 %v6491_v19  ;;  %vm1023_vm0 = vcmask 261120  }
  0xdd   : > { %v472_v24 = vpop.xlane.xlu0 %471  ;;  %v476_v25 = vpop.xlane.xlu1 %475  ;;  %740 = vmatpush1.msra.mxu1 %v664_v21  ;;  %v6652_v21 = vld [vmem:[%s6610_s12 + $0x18] sm:$0xff] }
  0xde   : > { %v487_v26 = vmul.f32 0.0078125, %v472_v24  ;;  %v502_v27 = vmul.f32 %v6345_v22, %v6345_v22  ;;  %v489_v28 = vmul.f32 0.0078125, %v476_v25  ;;  %v504_v29 = vmul.f32 %v6348_v23, %v6348_v23  ;;  %v662_v24 = vld [vmem:[%s8080_s6 + $0x50] sm:$0xff]  ;;  %v6505_v25 = vld [vmem:[%s8080_s6 + $0x88] sm:$0xff] }
  0xdf   : > { %741 = vmatprep.subr.mxu1 %v662_v24  ;;  %5354 = vmatprep.subr.mxu0 %v6505_v25 }
  0xe0   : > { %510 = vadd.xlane.f32.xlu0 %v502_v27  ;;  %v6355_v30 = vsub.f32 %v6289_v2, %v487_v26  ;;  %v6358_v31 = vsub.f32 %v6291_v3, %v489_v28  ;;  %v661_v26 = vld [vmem:[%s8080_s6 + $0x48] sm:$0xff]  ;;  %v591_v27 = vld [vmem:[%s6427_s26 + $0x18] sm:$0xff]  ;;  %5355 = vmatpush3.msra.mxu0 %v6505_v25 }
  0xe1   : > { %v478_v32 = vpop.xlane.xlu0 %477  ;;  %v480_v33 = vpop.xlane.xlu1 %479  ;;  %v659_v28 = vld [vmem:[%s8080_s6 + $0x38] sm:$0xff]  ;;  %742 = vmatpush1.msra.mxu1 %v661_v26  ;;  %vm599_vm3 = vcmp.gt.f32.partialorder %v591_v27, 0.5  ;;  %v6667_v27 = vld [vmem:[%s6610_s12 + $0x10] sm:$0xff] }
  0xe2   : > { %v490_v34 = vmul.f32 0.0078125, %v478_v32  ;;  %v503_v35 = vmul.f32 %v6355_v30, %v6355_v30  ;;  %v491_v36 = vmul.f32 0.0078125, %v480_v33  ;;  %v505_v37 = vmul.f32 %v6358_v31, %v6358_v31  ;;  %743 = vmatprep.subr.mxu1 %v659_v28  ;;  %v658_v33 = vld [vmem:[%s8080_s6 + $0x30] sm:$0xff] }
  0xe3   : > { %v606_v32 = vsel %vm598_vm1, 1, %v6082_v8  ;;  %744 = vmatpush1.msra.mxu1 %v658_v33  ;;  %vm1242_vm1 = vcmask 130048  }
  0xe4   : > { %514 = vadd.xlane.f32.xlu0 %v504_v29  ;;  %512 = vadd.xlane.f32.xlu1 %v503_v35  ;;  %v6366_v38 = vsub.f32 %v6295_v4, %v490_v34  ;;  %v6369_v39 = vsub.f32 %v6297_v5, %v491_v36  ;;  %v6518_v29 = vld [vmem:[%s8080_s6 + $0x70] sm:$0xff]  ;;  %v656_v34 = vld [vmem:[%s8080_s6 + $0x20] sm:$0xff]  ;;  %v6531_v35 = vld [vmem:[%s8080_s6 + $0x58] sm:$0xff]  ;;  %v604_v36 = vsel %vm596_vm2, 1, %v6082_v8  ;;  %vm1032_vm2 = vcmask 523264  }
  0xe5   : > { %v482_v40 = vpop.xlane.xlu0 %481  ;;  %5356 = vmatprep.subr.mxu0 %v6518_v29  ;;  %745 = vmatprep.subr.mxu1 %v656_v34  ;;  %v484_v59 = vpop.xlane.xlu1 %483 }
  0xe6   : > { %v492_v41 = vmul.f32 0.0078125, %v482_v40  ;;  %v506_v42 = vmul.f32 %v6366_v38, %v6366_v38  ;;  %v507_v43 = vmul.f32 %v6369_v39, %v6369_v39  ;;  %v592_v40 = vld [vmem:[%s6427_s26 + $0x20] sm:$0xff]  ;;  %5357 = vmatpush3.msra.mxu0 %v6518_v29  ;;  %v493_v61 = vmul.f32 0.0078125, %v484_v59 }
  0xe7   : > { %5358 = vmatprep.subr.mxu0 %v6531_v35  ;;  %vm600_vm4 = vcmp.gt.f32.partialorder %v592_v40, 0.5  ;;  %v6675_v40 = vld [vmem:[%s6581_s25 + $0x10] sm:$0xff] }
  0xe8   : > { %516 = vadd.xlane.f32.xlu1 %v505_v37  ;;  %518 = vadd.xlane.f32.xlu0 %v506_v42  ;;  %v6376_v44 = vsub.f32 %v6301_v6, %v492_v41  ;;  %v655_v37 = vld [vmem:[%s8080_s6 + $0x18] sm:$0xff]  ;;  %v653_v41 = vld [vmem:[%s8080_s6 + $0x8] sm:$0xff]  ;;  %v6547_v42 = vld [vmem:[%s8080_s6 + $0x40] sm:$0xff]  ;;  %v608_v50 = vsel %vm600_vm4, 1, %v6082_v8  ;;  %v6593_v62 = vsub.f32 %v6303_v7, %v493_v61  ;;  %vm1041_vm4 = vcmask 785408  }
  0xe9   : > { %746 = vmatpush1.msra.mxu1 %v655_v37  ;;  %5359 = vmatpush3.msra.mxu0 %v6531_v35 }
  0xea   : > { %v508_v46 = vmul.f32 %v6376_v44, %v6376_v44  ;;  %747 = vmatprep.subr.mxu1 %v653_v41  ;;  %5360 = vmatprep.subr.mxu0 %v6547_v42  ;;  %v509_v63 = vmul.f32 %v6593_v62, %v6593_v62 }
  0xeb   : > { %748 = vmatpush1.msra.mxu1 %v652_v45  ;;  %5361 = vmatpush3.msra.mxu0 %v6547_v42  ;;  %v1057_v45 = vld [vmem:[%s6581_s25 + $0x38] sm:$0xff] }
  0xec   : > { %520 = vadd.xlane.f32.xlu1 %v507_v43  ;;  %522 = vadd.xlane.f32.xlu0 %v508_v46  ;;  %v607_v43 = vsel %vm599_vm3, 1, %v6082_v8  ;;  %v593_v46 = vld [vmem:[%s6427_s26 + $0x28] sm:$0xff]  ;;  %vm1259_vm3 = vcmask 392192  }
  0xed   : > { %5646 = vmatprep.subr.mxu1 %v6324_v13  ;;  %vm601_vm5 = vcmp.gt.f32.partialorder %v593_v46, 0.5  ;;  %5362 = vmatprep.subr.mxu0 %v6559_v47 }
  0xee   : > { %5363 = vmatpush3.msra.mxu0 %v6559_v47  ;;  %v609_v55 = vsel %vm601_vm5, 1, %v6082_v8  ;;  %v6618_v8 = vld [vmem:[%s6581_s25 + $0x18] sm:$0xff]  ;;  %vm1276_vm5 = vcmask 654336  }
  0xef   : > { %5364 = vmatprep.subr.mxu0 %v6567_v52 }
  0xf0   : > { %5365 = vmatpush3.msra.mxu0 %v6567_v52 }
  0xfd   : > { %616 = vperm.xlu1 %5747, %v605_v20   ;;  %v6643_v20 = vld [vmem:[%s6581_s25 + $0x28] sm:$0xff] }
 0x101   : > { %619 = vperm.xlu1 %5747, %v606_v32   ;;  %v942_v32 = vld [vmem:[%s6610_s12 + $0x38] sm:$0xff] }
 0x102   : > { %613 = vperm.xlu0 %5746, %v604_v36  }
 0x105   : > { %622 = vperm.xlu1 %5747, %v607_v43  }
 0x106   : > { %1068 = vrot.lane.b32.xlu0 %v6584_v58, %s6084_s27 }
 0x109   : > { %625 = vperm.xlu1 %5747, %v608_v50  }
 0x10a   : > { %1092 = vrot.lane.b32.xlu0 %v6584_v58, %s6085_s28 }
 0x10d   : > { %628 = vperm.xlu1 %5747, %v609_v55  }
 0x10e   : > { %1116 = vrot.lane.b32.xlu0 %v6584_v58, %s6086_s19 }
 0x111   : > { %631 = vperm.xlu1 %5747, %v610_v56  }
 0x112   : > { %1066 = vrot.lane.b32.xlu0 %v6599_v11, %s6084_s27 }
 0x116   : > { %1090 = vrot.lane.b32.xlu0 %v6599_v11, %s6085_s28 }
 0x11a   : > { %1114 = vrot.lane.b32.xlu0 %v6599_v11, %s6086_s19 }
 0x11e   : > { %1072 = vrot.lane.b32.xlu0 %v6618_v8, %s6084_s27 }
 0x122   : > { %1096 = vrot.lane.b32.xlu0 %v6618_v8, %s6085_s28 }
 0x126   : > { %1120 = vrot.lane.b32.xlu0 %v6618_v8, %s6086_s19 }
 0x12a   : > { %961 = vrot.lane.b32.xlu0 %v6636_v18, %s6084_s27 }
 0x12e   : > { %1076 = vrot.lane.b32.xlu0 %v6643_v20, %s6084_s27 }
 0x132   : > { %985 = vrot.lane.b32.xlu0 %v6636_v18, %s6085_s28 }
 0x135   : > { %524 = vadd.xlane.f32.xlu1 %v509_v63 }
 0x136   : > { %1100 = vrot.lane.b32.xlu0 %v6643_v20, %s6085_s28 }
 0x13a   : > { %1009 = vrot.lane.b32.xlu0 %v6636_v18, %s6086_s19 }
 0x13e   : > { %1124 = vrot.lane.b32.xlu0 %v6643_v20, %s6086_s19 }
 0x142   : > { %965 = vrot.lane.b32.xlu0 %v942_v32, %s6084_s27 }
 0x146   : > { %634 = vperm.xlu1 %5747, %v611_v14   ;;  %1080 = vrot.lane.b32.xlu0 %v1057_v45, %s6084_s27 }
 0x14a   : > { %953 = vrot.lane.b32.xlu1 %v6613_v16, %s6084_s27  ;;  %989 = vrot.lane.b32.xlu0 %v942_v32, %s6085_s28 }
 0x14e   : > { %977 = vrot.lane.b32.xlu1 %v6613_v16, %s6085_s28  ;;  %1104 = vrot.lane.b32.xlu0 %v1057_v45, %s6085_s28 }
 0x152   : > { %1001 = vrot.lane.b32.xlu1 %v6613_v16, %s6086_s19  ;;  %1013 = vrot.lane.b32.xlu0 %v942_v32, %s6086_s19 }
 0x156   : > { %951 = vrot.lane.b32.xlu1 %v6631_v17, %s6084_s27  ;;  %1128 = vrot.lane.b32.xlu0 %v1057_v45, %s6086_s19 }
 0x15a   : > { %975 = vrot.lane.b32.xlu1 %v6631_v17, %s6085_s28 }
 0x15e   : > { %999 = vrot.lane.b32.xlu1 %v6631_v17, %s6086_s19 }
 0x162   : > { %957 = vrot.lane.b32.xlu1 %v6652_v21, %s6084_s27 }
 0x166   : > { %981 = vrot.lane.b32.xlu1 %v6652_v21, %s6085_s28 }
 0x169   : > { %v511_v24 = vpop.xlane.xlu0 %510 }
 0x16a   : > { %v526_v26 = vmul.f32 0.0078125, %v511_v24  ;;  %1005 = vrot.lane.b32.xlu1 %v6652_v21, %s6086_s19 }
 0x16c   : > { %v534_v28 = vadd.f32 1e-05, %v526_v26 }
 0x16d   : > { %v513_v33 = vpop.xlane.xlu1 %512  ;;  %v515_v34 = vpop.xlane.xlu0 %514 }
 0x16e   : > { %5808 = vrsqrt.f32 %v534_v28  ;;  %v527_v36 = vmul.f32 0.0078125, %v513_v33  ;;  %v528_v37 = vmul.f32 0.0078125, %v515_v34  ;;  %955 = vrot.lane.b32.xlu1 %v6667_v27, %s6084_s27  ;;  %v6690_v34 = vld [vmem:[%s8076_s2] ss:$0 sm:$0xff] }
 0x170   : > { %v535_v41 = vadd.f32 1e-05, %v527_v36  ;;  %v536_v43 = vadd.f32 1e-05, %v528_v37 }
 0x171   : > { %v517_v46 = vpop.xlane.xlu1 %516  ;;  %v519_v50 = vpop.xlane.xlu0 %518 }
 0x172   : > { %5810 = vrsqrt.f32 %v535_v41  ;;  %v529_v53 = vmul.f32 0.0078125, %v517_v46  ;;  %v530_v55 = vmul.f32 0.0078125, %v519_v50  ;;  %1070 = vrot.lane.b32.xlu1 %v6675_v40, %s6084_s27 }
 0x173   : > { %5812 = vrsqrt.f32 %v536_v43  ;;  %v6697_v43 = vld [vmem:[%s8077_s3] ss:$0 sm:$0xff] }
 0x174   : > { %v537_v56 = vadd.f32 1e-05, %v529_v53  ;;  %v538_v59 = vadd.f32 1e-05, %v530_v55 }
 0x175   : > { %v521_v61 = vpop.xlane.xlu1 %520  ;;  %v523_v63 = vpop.xlane.xlu0 %522 }
 0x176   : > { %5814 = vrsqrt.f32 %v537_v56  ;;  %v531_v10 = vmul.f32 0.0078125, %v521_v61  ;;  %v532_v14 = vmul.f32 0.0078125, %v523_v63  ;;  %979 = vrot.lane.b32.xlu1 %v6667_v27, %s6085_s28 }
 0x177   : > { %5816 = vrsqrt.f32 %v538_v59 }
 0x178   : > { %v539_v24 = vadd.f32 1e-05, %v531_v10  ;;  %v540_v28 = vadd.f32 1e-05, %v532_v14  ;;  %v6712_v14 = vld [vmem:[%s6610_s12 + $0x20] sm:$0xff] }
 0x179   : > { %v617_v26 = vpop.permute.xlu1 %616 }
 0x17a   : > { %5818 = vrsqrt.f32 %v539_v24  ;;  %1094 = vrot.lane.b32.xlu1 %v6675_v40, %s6085_s28  ;;  %vm637_vm9 = vcmp.eq.s32.totalorder %v617_v26, 1  ;;  %v6729_v26 = vld [vmem:[%s6581_s25 + $0x20] sm:$0xff] }
 0x17b   : > { %v5809_v33 = vpop.eup %5808  ;;  %5820 = vrsqrt.f32 %v540_v28 }
 0x17c   : > { %v550_v36 = vmul.f32 %v5809_v33, %v6345_v22 }
 0x17d   : > { %v620_v37 = vpop.permute.xlu1 %619  ;;  %v614_v41 = vpop.permute.xlu0 %613 }
 0x17e   : > { %v565_v46 = vmul.f32 %v6690_v34, %v550_v36  ;;  %1003 = vrot.lane.b32.xlu1 %v6667_v27, %s6086_s19  ;;  %vm636_vm8 = vcmp.eq.s32.totalorder %v614_v41, 1  ;;  %vm638_vm10 = vcmp.eq.s32.totalorder %v620_v37, 1 }
 0x17f   : > { %v5811_v50 = vpop.eup %5810 }
 0x180   : > { %v5813_v53 = vpop.eup %5812  ;;  %v580_v22 = vadd.f32 %v6697_v43, %v565_v46  ;;  %v551_v55 = vmul.f32 %v5811_v50, %v6355_v30 }
 0x181   : > { %v552_v56 = vmul.f32 %v5813_v53, %v6348_v23  ;;  %v623_v59 = vpop.permute.xlu1 %622 }
 0x182   : > { %v644_v61 = vsel %vm636_vm8, %v6283_v0, %v580_v22  ;;  %v566_v63 = vmul.f32 %v6690_v34, %v551_v55  ;;  %1118 = vrot.lane.b32.xlu1 %v6675_v40, %s6086_s19  ;;  %vm639_vm11 = vcmp.eq.s32.totalorder %v623_v59, 1 }
 0x183   : > { %v5815_v10 = vpop.eup %5814  ;;  %782 = vmatmul.mubr.f32.vlgmr.msra.gmra.mxu1 %v644_v61  ;;  %5366 = vmatprep.mubr.f32.mxu0 %v644_v61  ;;  %v567_v32 = vmul.f32 %v6690_v34, %v552_v56 }
 0x184   : > { %v5817_v24 = vpop.eup %5816  ;;  %787 = vmatprep.mubr.f32.mxu1 %v6083_v49  ;;  %v581_v23 = vadd.f32 %v6697_v43, %v566_v63  ;;  %v553_v30 = vmul.f32 %v5815_v10, %v6358_v31  ;;  %5662 = vmatpush3.msra.mxu1 %v6324_v13 }
 0x185   : > { %v582_v0 = vadd.f32 %v6697_v43, %v567_v32  ;;  %5647 = vmatprep.subr.mxu1 %v6333_v15  ;;  %v554_v36 = vmul.f32 %v5817_v24, %v6366_v38  ;;  %v626_v45 = vpop.permute.xlu1 %625 }
 0x186   : > { %v645_v28 = vsel %vm637_vm9, %v6289_v2, %v581_v23  ;;  %v568_v33 = vmul.f32 %v6690_v34, %v553_v30  ;;  %5663 = vmatpush3.msra.mxu1 %v6333_v15  ;;  %959 = vrot.lane.b32.xlu1 %v6712_v14, %s6084_s27  ;;  %vm640_vm12 = vcmp.eq.s32.totalorder %v626_v45, 1 }
 0x187   : > { %v5819_v13 = vpop.eup %5818  ;;  %788 = vmatmul.mubr.f32.gmra.mxu1 %v645_v28  ;;  %5367 = vmatmul.mubr.f32.vlgmr.msra.gmra.mxu0 %v645_v28  ;;  %v646_v31 = vsel %vm638_vm10, %v6285_v1, %v582_v0  ;;  %v569_v38 = vmul.f32 %v6690_v34, %v554_v36 }
 0x188   : > { %5369 = vmatprep.mubr.f32.mxu0 %v646_v31  ;;  %793 = vmatprep.mubr.f32.mxu1 %v6083_v49  ;;  %v583_v2 = vadd.f32 %v6697_v43, %v568_v33  ;;  %v555_v37 = vmul.f32 %v5819_v13, %v6369_v39  ;;  %v5821_v1 = vpop.eup %5820 }
 0x189   : > { %5648 = vmatprep.subr.mxu1 %v6389_v48  ;;  %v629_v41 = vpop.permute.xlu1 %628  ;;  %v556_v39 = vmul.f32 %v5821_v1, %v6376_v44 }
 0x18a   : > { %v647_v15 = vsel %vm639_vm11, %v6291_v3, %v583_v2  ;;  %5664 = vmatpush3.msra.mxu1 %v6389_v48  ;;  %1074 = vrot.lane.b32.xlu1 %v6729_v26, %s6084_s27  ;;  %v584_v3 = vadd.f32 %v6697_v43, %v569_v38  ;;  %v570_v46 = vmul.f32 %v6690_v34, %v555_v37  ;;  %vm641_vm13 = vcmp.eq.s32.totalorder %v629_v41, 1 }
 0x18b   : > { %794 = vmatmul.mubr.f32.gmra.mxu1 %v646_v31  ;;  %5370 = vmatmul.mubr.f32.gmra.mxu0 %v647_v15  ;;  %v571_v50 = vmul.f32 %v6690_v34, %v556_v39 }
 0x18c   : > { %799 = vmatprep.mubr.f32.mxu1 %v6083_v49  ;;  %5649 = vmatprep.subr.mxu1 %v6401_v51  ;;  %v648_v48 = vsel %vm640_vm12, %v6295_v4, %v584_v3 }
 0x18d   : > { %5665 = vmatpush3.msra.mxu1 %v6401_v51  ;;  %v585_v51 = vadd.f32 %v6697_v43, %v570_v46  ;;  %v632_v44 = vpop.permute.xlu1 %631 }
 0x18e   : > { %5650 = vmatprep.subr.mxu1 %v6417_v54  ;;  %983 = vrot.lane.b32.xlu1 %v6712_v14, %s6085_s28  ;;  %vm642_vm14 = vcmp.eq.s32.totalorder %v632_v44, 1 }
 0x18f   : > { %800 = vmatmul.mubr.f32.gmra.mxu1 %v647_v15  ;;  %v649_v4 = vsel %vm641_vm13, %v6297_v5, %v585_v51 }
 0x190   : > { %805 = vmatprep.mubr.f32.mxu1 %v6083_v49  ;;  %5666 = vmatpush3.msra.mxu1 %v6417_v54  ;;  %v586_v54 = vadd.f32 %v6697_v43, %v571_v50 }
 0x191   : > { %5651 = vmatprep.subr.mxu1 %v6436_v57 }
 0x192   : > { %5667 = vmatpush3.msra.mxu1 %v6436_v57  ;;  %1098 = vrot.lane.b32.xlu1 %v6729_v26, %s6085_s28  ;;  %v650_v57 = vsel %vm642_vm14, %v6301_v6, %v586_v54 }
 0x193   : > { %806 = vmatmul.mubr.f32.gmra.mxu1 %v648_v48  ;;  %5652 = vmatprep.subr.mxu1 %v6449_v60 }
 0x194   : > { %811 = vmatprep.mubr.f32.mxu1 %v6083_v49  ;;  %5668 = vmatpush3.msra.mxu1 %v6449_v60 }
 0x195   : > { %5653 = vmatprep.subr.mxu1 %v6463_v9 }
 0x196   : > { %5669 = vmatpush3.msra.mxu1 %v6463_v9  ;;  %1007 = vrot.lane.b32.xlu1 %v6712_v14, %s6086_s19  ;;  %v6789_v9 = vld [vmem:[%s6610_s12 + $0x30] sm:$0xff] }
 0x197   : > { %812 = vmatmul.mubr.f32.gmra.mxu1 %v649_v4  ;;  %5654 = vmatprep.subr.mxu1 %v6476_v12  ;;  %8126 = vst [vmem:[#allocation14_spill] sm:$0xff] %v6789_v9 }
 0x198   : > { %817 = vmatprep.mubr.f32.mxu1 %v6083_v49  ;;  %5670 = vmatpush3.msra.mxu1 %v6476_v12 }
 0x199   : > { %5655 = vmatprep.subr.mxu1 %v6491_v19 }
 0x19a   : > { %5671 = vmatpush3.msra.mxu1 %v6491_v19  ;;  %1122 = vrot.lane.b32.xlu1 %v6729_v26, %s6086_s19 }
 0x19b   : > { %818 = vmatmul.mubr.f32.gmra.mxu1 %v650_v57  ;;  %5656 = vmatprep.subr.mxu1 %v6505_v25 }
 0x19c   : > { %5672 = vmatpush3.msra.mxu1 %v6505_v25  ;;  %823 = vmatprep.mubr.f32.mxu1 %v6083_v49 }
 0x19d   : > { %5657 = vmatprep.subr.mxu1 %v6518_v29 }
 0x19e   : > { %5673 = vmatpush3.msra.mxu1 %v6518_v29  ;;  %963 = vrot.lane.b32.xlu1 %v6789_v9, %s6084_s27 }
 0x19f   : > { %5658 = vmatprep.subr.mxu1 %v6531_v35 }
 0x1a0   : > { %5674 = vmatpush3.msra.mxu1 %v6531_v35 }
 0x1a1   : > { %5659 = vmatprep.subr.mxu1 %v6547_v42 }
 0x1a2   : > { %5675 = vmatpush3.msra.mxu1 %v6547_v42 }
 0x1a3   : > { %5660 = vmatprep.subr.mxu1 %v6559_v47 }
 0x1a4   : > { %5676 = vmatpush3.msra.mxu1 %v6559_v47  ;;  %v702_v47 = vlaneseq }
 0x1a5   : > { %5661 = vmatprep.subr.mxu1 %v6567_v52 }
 0x1a6   : > { %5677 = vmatpush3.msra.mxu1 %v6567_v52  ;;  %v6799_v52 = vshrl.u32 %v702_v47, 7 }
 0x1a8   : > { %8127 = vst [vmem:[#allocation15_spill] sm:$0xff] %v6799_v52  ;;  %v708_v53 = vsub.s32 1, %v6799_v52 }
 0x1be   : > { %v525_v5 = vpop.xlane.xlu1 %524 }
 0x1bf   : > { %v533_v6 = vmul.f32 0.0078125, %v525_v5 }
 0x1c1   : > { %v541_v60 = vadd.f32 1e-05, %v533_v6 }
 0x1c2   : > { %v635_v25 = vpop.permute.xlu1 %634 }
 0x1c3   : > { %5822 = vrsqrt.f32 %v541_v60  ;;  %vm643_vm15 = vcmp.eq.s32.totalorder %v635_v25, 1 }
 0x1c6   : > { %v6797_v49 = vpop.permute.xlu1 %953 }
 0x1d0   : > { %v5823_v12 = vpop.eup %5822 }
 0x1d1   : > { %v557_v19 = vmul.f32 %v5823_v12, %v6593_v62  ;;  %v704_v62 = vsub.s32 0, %v6799_v52 }
 0x1d3   : > { %v572_v29 = vmul.f32 %v6690_v34, %v557_v19  ;;  %v6805_v34 = vld [vmem:[%s8081_s7] sm:$0x7] }
 0x1d4   : > { %8128 = vst [vmem:[#allocation16_spill] sm:$0xff] %v6805_v34  ;;  %v6813_v22 = vrot.slane %v6805_v34, %v704_v62  ;;  %v6816_v55 = vrot.slane %v6805_v34, %v708_v53 }
 0x1d5   : > { %v587_v35 = vadd.f32 %v6697_v43, %v572_v29  ;;  %v6807_v43 = vpop.permute.xlu1 %977 }
 0x1d7   : > { %v651_v42 = vsel %vm643_vm15, %v6303_v7, %v587_v35  ;;  %v6809_v7 = vpop.permute.xlu0 %1068 }
 0x1d8   : > { %824 = vmatmul.mubr.f32.gmra.mxu1 %v651_v42 }
 0x1d9   : > { %5372 = vmatprep.mubr.f32.mxu1 %v648_v48  ;;  %v6818_v59 = vpop.permute.xlu1 %1001 }
 0x1db   : > { %v6820_v61 = vpop.permute.xlu0 %1092 }
 0x1dc   : > { %5373 = vmatmul.mubr.f32.vlgmr.msra.gmra.mxu1 %v649_v4 }
 0x1dd   : > { %5375 = vmatprep.mubr.f32.mxu1 %v650_v57  ;;  %v6832_v0 = vpop.permute.xlu1 %951 }
 0x1df   : > { %v6834_v28 = vpop.permute.xlu0 %1116 }
 0x1e0   : > { %5376 = vmatmul.mubr.f32.gmra.mxu1 %v651_v42 }
 0x1e1   : > { %v6849_v15 = vpop.permute.xlu1 %975 }
 0x1e3   : > { %v6851_v38 = vpop.permute.xlu0 %1066 }
 0x1e5   : > { %v6861_v46 = vpop.permute.xlu1 %999 }
 0x1e7   : > { %v6863_v39 = vpop.permute.xlu0 %1090 }
 0x1e9   : > { %v6878_v4 = vpop.permute.xlu1 %957 }
 0x1eb   : > { %v6880_v54 = vpop.permute.xlu0 %1114 }
 0x1ed   : > { %v6893_v19 = vpop.permute.xlu1 %981 }
 0x1ef   : > { %v6895_v25 = vpop.permute.xlu0 %1072 }
 0x1f1   : > { %v6907_v62 = vpop.permute.xlu1 %1005 }
 0x1f3   : > { %v6909_v53 = vpop.permute.xlu0 %1096 }
 0x243   : > { %v783_v56 = vpop.f32.mrf.mxu1 }
 0x244   : > { %v6823_v63 = vadd.f32 %v783_v56, %v6813_v22 }
 0x245   : > { %v785_v10 = vpop.f32.mrf.mxu1 }
 0x246   : > { %v6826_v32 = vadd.f32 %v785_v10, %v6816_v55  ;;  %1218 = vrot.lane.b32.xlu0 %v6823_v63, %s6087_s21  ;;  %v1170_v24 = vsub.f32 0.0, %v6823_v63 }
 0x247   : > { %v789_v23 = vpop.f32.mrf.mxu1 }
 0x248   : > { %1186 = vrot.lane.b32.xlu1 %v1170_v24, %s6088_s11  ;;  %v6837_v33 = vadd.f32 %v789_v23, %v6813_v22  ;;  %v1334_v36 = vsub.f32 0.0, %v6826_v32 }
 0x249   : > { %v791_v30 = vpop.f32.mrf.mxu1 }
 0x24a   : > { %1382 = vrot.lane.b32.xlu0 %v6826_v32, %s6087_s21  ;;  %v6844_v45 = vadd.f32 %v791_v30, %v6816_v55  ;;  %v1171_v2 = vsub.f32 0.0, %v6837_v33  ;;  %v6923_v30 = vpop.permute.xlu1 %955 }
 0x24b   : > { %v795_v13 = vpop.f32.mrf.mxu1 }
 0x24c   : > { %1350 = vrot.lane.b32.xlu1 %v1334_v36, %s6088_s11  ;;  %v1335_v1 = vsub.f32 0.0, %v6844_v45  ;;  %v6858_v41 = vadd.f32 %v795_v13, %v6813_v22  ;;  %v6925_v36 = vpop.permute.xlu0 %1120 }
 0x24d   : > { %v797_v31 = vpop.f32.mrf.mxu1 }
 0x24e   : > { %1220 = vrot.lane.b32.xlu0 %v6837_v33, %s6087_s21  ;;  %v6866_v48 = vadd.f32 %v797_v31, %v6816_v55  ;;  %v1172_v44 = vsub.f32 0.0, %v6858_v41 }
 0x24f   : > { %v801_v37 = vpop.f32.mrf.mxu1 }
 0x250   : > { %1188 = vrot.lane.b32.xlu1 %v1171_v2, %s6088_s11  ;;  %v6871_v51 = vadd.f32 %v801_v37, %v6813_v22  ;;  %v1336_v6 = vsub.f32 0.0, %v6866_v48 }
 0x251   : > { %v803_v3 = vpop.f32.mrf.mxu1 }
 0x252   : > { %1384 = vrot.lane.b32.xlu0 %v6844_v45, %s6087_s21  ;;  %8129 = vst [vmem:[#allocation17_spill] sm:$0xff] %v6871_v51  ;;  %v6883_v57 = vadd.f32 %v803_v3, %v6816_v55  ;;  %v1173_v29 = vsub.f32 0.0, %v6871_v51  ;;  %v6938_v3 = vpop.permute.xlu0 %961 }
 0x253   : > { %v807_v50 = vpop.f32.mrf.mxu1 }
 0x254   : > { %1352 = vrot.lane.b32.xlu1 %v1335_v1, %s6088_s11  ;;  %v6890_v60 = vadd.f32 %v807_v50, %v6813_v22  ;;  %v1337_v47 = vsub.f32 0.0, %v6883_v57  ;;  %v6936_v1 = vpop.permute.xlu1 %1070 }
 0x255   : > { %v809_v5 = vpop.f32.mrf.mxu1 }
 0x256   : > { %1222 = vrot.lane.b32.xlu0 %v6858_v41, %s6087_s21  ;;  %8130 = vst [vmem:[#allocation18_spill] sm:$0xff] %v6890_v60  ;;  %v6916_v10 = vadd.f32 %v809_v5, %v6816_v55  ;;  %v1174_v13 = vsub.f32 0.0, %v6890_v60 }
 0x257   : > { %v813_v12 = vpop.f32.mrf.mxu1 }
 0x258   : > { %1386 = vrot.lane.b32.xlu1 %v6866_v48, %s6087_s21  ;;  %v6901_v35 = vadd.f32 %v813_v12, %v6813_v22  ;;  %8133 = vst [vmem:[#allocation21_spill] sm:$0xff] %v6916_v10  ;;  %v1338_v37 = vsub.f32 0.0, %v6916_v10  ;;  %v6948_v5 = vpop.permute.xlu1 %979 }
 0x259   : > { %v815_v42 = vpop.f32.mrf.mxu1 }
 0x25a   : > { %1224 = vrot.lane.b32.xlu0 %v6871_v51, %s6087_s21  ;;  %8131 = vst [vmem:[#allocation19_spill] sm:$0xff] %v6901_v35  ;;  %v6912_v56 = vadd.f32 %v815_v42, %v6816_v55 }
 0x25b   : > { %v819_v23 = vpop.f32.mrf.mxu1 }
 0x25c   : > { %1190 = vrot.lane.b32.xlu1 %v1172_v44, %s6088_s11  ;;  %8132 = vst [vmem:[#allocation20_spill] sm:$0xff] %v6912_v56  ;;  %v1339_v24 = vsub.f32 0.0, %v6912_v56  ;;  %v6930_v31 = vadd.f32 %v819_v23, %v6813_v22  ;;  %v1175_v44 = vsub.f32 0.0, %v6901_v35  ;;  %v6955_v42 = vpop.permute.xlu1 %1094 }
 0x25d   : > { %v821_v2 = vpop.f32.mrf.mxu1 }
 0x25e   : > { %1388 = vrot.lane.b32.xlu0 %v6883_v57, %s6087_s21  ;;  %8134 = vst [vmem:[#allocation22_spill] sm:$0xff] %v6930_v31  ;;  %v6941_v50 = vadd.f32 %v821_v2, %v6816_v55  ;;  %v1176_v12 = vsub.f32 0.0, %v6930_v31 }
 0x260   : > { %1354 = vrot.lane.b32.xlu1 %v1336_v6, %s6088_s11  ;;  %8135 = vst [vmem:[#allocation23_spill] sm:$0xff] %v6941_v50  ;;  %v6950_v6 = vpop.permute.xlu0 %1076 }
 0x262   : > { %1226 = vrot.lane.b32.xlu0 %v6890_v60, %s6087_s21 }
 0x264   : > { %1192 = vrot.lane.b32.xlu1 %v1173_v29, %s6088_s11  ;;  %v1340_v29 = vsub.f32 0.0, %v6941_v50 }
 0x266   : > { %1228 = vrot.lane.b32.xlu0 %v6901_v35, %s6087_s21 }
 0x268   : > { %1356 = vrot.lane.b32.xlu1 %v1337_v47, %s6088_s11  ;;  %v6957_v47 = vpop.permute.xlu0 %985 }
 0x26a   : > { %1392 = vrot.lane.b32.xlu0 %v6912_v56, %s6087_s21 }
 0x26c   : > { %1390 = vrot.lane.b32.xlu1 %v6916_v10, %s6087_s21  ;;  %v6962_v23 = vpop.permute.xlu0 %1100 }
 0x26e   : > { %1360 = vrot.lane.b32.xlu0 %v1339_v24, %s6088_s11  ;;  %v6960_v24 = vpop.permute.xlu1 %1003 }
 0x270   : > { %1194 = vrot.lane.b32.xlu1 %v1174_v13, %s6088_s11  ;;  %v6966_v2 = vpop.permute.xlu0 %1009 }
 0x272   : > { %1230 = vrot.lane.b32.xlu0 %v6930_v31, %s6087_s21  ;;  %v6964_v13 = vpop.permute.xlu1 %1118 }
 0x274   : > { %1358 = vrot.lane.b32.xlu1 %v1338_v37, %s6088_s11  ;;  %v6968_v37 = vpop.permute.xlu0 %1124 }
 0x275   : > { %8136 = vst [vmem:[#allocation24_spill] sm:$0xff] %v6968_v37 }
 0x276   : > { %1394 = vrot.lane.b32.xlu0 %v6941_v50, %s6087_s21 }
 0x278   : > { %1196 = vrot.lane.b32.xlu1 %v1175_v44, %s6088_s11  ;;  %v6970_v44 = vpop.permute.xlu1 %959 }
 0x27c   : > { %1198 = vrot.lane.b32.xlu1 %v1176_v12, %s6088_s11  ;;  %v6972_v12 = vpop.permute.xlu0 %965  ;;  %v6974_v50 = vpop.permute.xlu1 %1074 }
 0x27d   : > { %8137 = vst [vmem:[#allocation25_spill] sm:$0xff] %v6972_v12 }
 0x280   : > { %1362 = vrot.lane.b32.xlu1 %v1340_v29, %s6088_s11  ;;  %v6982_v34 = vpop.permute.xlu0 %1080  ;;  %v6988_v12 = vpop.permute.xlu1 %983 }
 0x281   : > { %8139 = vst [vmem:[#allocation27_spill] sm:$0xff] %v6982_v34 }
 0x298   : > { %v825_v31 = vpop.f32.mrf.mxu1 }
 0x299   : > { %v6977_v29 = vadd.f32 %v825_v31, %v6813_v22  ;;  %v6995_v31 = vpop.permute.xlu0 %989 }
 0x29a   : > { %v827_v35 = vpop.f32.mrf.mxu1  ;;  %8141 = vst [vmem:[#allocation29_spill] sm:$0xff] %v6995_v31 }
 0x29b   : > { %8138 = vst [vmem:[#allocation26_spill] sm:$0xff] %v6977_v29  ;;  %v1177_v10 = vsub.f32 0.0, %v6977_v29  ;;  %1232 = vrot.lane.b32.xlu0 %v6977_v29, %s6087_s21  ;;  %v6985_v60 = vadd.f32 %v827_v35, %v6816_v55  ;;  %v6998_v29 = vpop.permute.xlu1 %1098  ;;  %v7001_v55 = vld [vmem:[%s6581_s25 + $0x30] sm:$0xff] }
 0x29c   : > { %8142 = vst [vmem:[#allocation30_spill] sm:$0xff] %v6998_v29  ;;  %8143 = vst [vmem:[#allocation31_spill] sm:$0xff] %v7001_v55 }
 0x29d   : > { %8140 = vst [vmem:[#allocation28_spill] sm:$0xff] %v6985_v60  ;;  %1200 = vrot.lane.b32.xlu1 %v1177_v10, %s6088_s11  ;;  %v1341_v22 = vsub.f32 0.0, %v6985_v60  ;;  %v7007_v35 = vpop.permute.xlu0 %1104 }
 0x29e   : > { %8144 = vst [vmem:[#allocation32_spill] sm:$0xff] %v7007_v35  ;;  %v1024_v35 = vsel %vm1023_vm0, %v6631_v17, %v6832_v0 }
 0x29f   : > { %1396 = vrot.lane.b32.xlu0 %v6985_v60, %s6087_s21  ;;  %v7009_v10 = vpop.permute.xlu1 %1007 }
 0x2a0   : > { %8145 = vst [vmem:[#allocation33_spill] sm:$0xff] %v7009_v10 }
 0x2a1   : > { %987 = vrot.lane.b32.xlu1 %v6789_v9, %s6085_s28  ;;  %v7013_v60 = vpop.permute.xlu0 %1013 }
 0x2a2   : > { %8146 = vst [vmem:[#allocation34_spill] sm:$0xff] %v7013_v60  ;;  %v1138_v60 = vsel %vm1023_vm0, %v6599_v11, %v6851_v38 }
 0x2a3   : > { %1364 = vrot.lane.b32.xlu0 %v1341_v22, %s6088_s11  ;;  %v7015_v22 = vpop.permute.xlu1 %1122  ;;  %v1146_v17 = vsel %vm1032_vm2, %v1138_v60, %v6863_v39 }
 0x2a4   : > { %8147 = vst [vmem:[#allocation35_spill] sm:$0xff] %v7015_v22 }
 0x2a5   : > { %1011 = vrot.lane.b32.xlu1 %v6789_v9, %s6086_s19  ;;  %v7019_v31 = vpop.permute.xlu0 %1128 }
 0x2a6   : > { %8148 = vst [vmem:[#allocation36_spill] sm:$0xff] %v7019_v31 }
 0x2a7   : > { %1078 = vrot.lane.b32.xlu0 %v7001_v55, %s6084_s27  ;;  %v7021_v9 = vpop.permute.xlu1 %963 }
 0x2a8   : > { %8149 = vst [vmem:[#allocation37_spill] sm:$0xff] %v7021_v9  ;;  %v1033_v9 = vsel %vm1032_vm2, %v1024_v35, %v6849_v15 }
 0x2a9   : > { %v1042_v11 = vsel %vm1041_vm4, %v1033_v9, %v6861_v46 }
 0x2ab   : > { %1102 = vrot.lane.b32.xlu0 %v7001_v55, %s6085_s28 }
 0x2af   : > { %1126 = vrot.lane.b32.xlu0 %v7001_v55, %s6086_s19 }
 0x2b8   : > { %v1219_v34 = vpop.permute.xlu0 %1218 }
 0x2ba   : > { %v1187_v52 = vpop.permute.xlu1 %1186 }
 0x2bb   : > { %v1243_v55 = vsel %vm1242_vm1, %v1187_v52, %v1219_v34 }
 0x2bc   : > { %v1251_v31 = vsel %vm1023_vm0, %v1243_v55, %v1187_v52  ;;  %v1383_v22 = vpop.permute.xlu0 %1382 }
 0x2bd   : > { %v1260_v56 = vsel %vm1259_vm3, %v1251_v31, %v1219_v34  ;;  %v1154_v31 = vsel %vm1041_vm4, %v1146_v17, %v6880_v54 }
 0x2be   : > { %v1268_v0 = vsel %vm1032_vm2, %v1260_v56, %v1187_v52  ;;  %v1351_v51 = vpop.permute.xlu1 %1350  ;;  %v1162_v56 = vmul.f32 %v1042_v11, %v6823_v63  ;;  %v1025_v63 = vsel %vm1023_vm0, %v6613_v16, %v6797_v49 }
 0x2bf   : > { %v1277_v38 = vsel %vm1276_vm5, %v1268_v0, %v1219_v34  ;;  %v1406_v15 = vsel %vm1242_vm1, %v1351_v51, %v1383_v22  ;;  %v1034_v16 = vsel %vm1032_vm2, %v1025_v63, %v6807_v43 }
 0x2c0   : > { %v1285_v35 = vsel %vm1041_vm4, %v1277_v38, %v1187_v52  ;;  %v1414_v55 = vsel %vm1023_vm0, %v1406_v15, %v1351_v51  ;;  %v1221_v10 = vpop.permute.xlu0 %1220 }
 0x2c1   : > { %v1294_v39 = vsel %vm1293_vm6, %v1285_v35, %v1219_v34  ;;  %v1422_v60 = vsel %vm1259_vm3, %v1414_v55, %v1383_v22  ;;  %v1139_v55 = vsel %vm1023_vm0, %v6584_v58, %v6809_v7 }
 0x2c2   : > { %v1430_v9 = vsel %vm1032_vm2, %v1422_v60, %v1351_v51  ;;  %v1189_v46 = vpop.permute.xlu1 %1188  ;;  %v1302_v0 = vmul.f32 %v1294_v39, %v1154_v31  ;;  %v1147_v58 = vsel %vm1032_vm2, %v1139_v55, %v6820_v61  ;;  %v1043_v61 = vsel %vm1041_vm4, %v1034_v16, %v6818_v59 }
 0x2c3   : > { %v1244_v29 = vsel %vm1242_vm1, %v1189_v46, %v1221_v10  ;;  %v1438_v37 = vsel %vm1276_vm5, %v1430_v9, %v1383_v22  ;;  %v1327_v63 = vmul.f32 %v1043_v61, %v6844_v45 }
 0x2c4   : > { %v1252_v52 = vsel %vm1023_vm0, %v1244_v29, %v1189_v46  ;;  %v1385_v38 = vpop.permute.xlu0 %1384  ;;  %v1310_v15 = vadd.f32 %v1302_v0, %v1162_v56  ;;  %v1446_v60 = vsel %vm1041_vm4, %v1438_v37, %v1351_v51 }
 0x2c5   : > { %v1261_v54 = vsel %vm1259_vm3, %v1252_v52, %v1221_v10  ;;  %v1454_v51 = vsel %vm1293_vm6, %v1446_v60, %v1383_v22 }
 0x2c6   : > { %v1269_v34 = vsel %vm1032_vm2, %v1261_v54, %v1189_v46  ;;  %v1353_v17 = vpop.permute.xlu1 %1352  ;;  %v7054_v35 = vmul.f32 0.17677669, %v1310_v15  ;;  %v1026_v15 = vsel %vm1023_vm0, %v6667_v27, %v6923_v30  ;;  %v1462_v55 = vmul.f32 %v1454_v51, %v1154_v31 }
 0x2c7   : > { %v1278_v29 = vsel %vm1276_vm5, %v1269_v34, %v1221_v10  ;;  %v1407_v39 = vsel %vm1242_vm1, %v1353_v17, %v1385_v38  ;;  %v1140_v27 = vsel %vm1023_vm0, %v6675_v40, %v6936_v1  ;;  %v1035_v30 = vsel %vm1032_vm2, %v1026_v15, %v6948_v5 }
 0x2c8   : > { %v1415_v56 = vsel %vm1023_vm0, %v1407_v39, %v1353_v17  ;;  %5382 = vmatprep.mubr.msk.f32.mxu1 %vm1023_vm0, %v7054_v35  ;;  %v1223_v9 = vpop.permute.xlu0 %1222  ;;  %v1286_v49 = vsel %vm1041_vm4, %v1278_v29, %v1189_v46  ;;  %v1155_v46 = vsel %vm1041_vm4, %v1147_v58, %v6834_v28  ;;  %v1326_v28 = vmul.f32 %v1042_v11, %v6826_v32 }
 0x2c9   : > { %v1423_v0 = vsel %vm1259_vm3, %v1415_v56, %v1385_v38  ;;  %v1295_v34 = vsel %vm1293_vm6, %v1286_v49, %v1221_v10  ;;  %v1148_v60 = vsel %vm1032_vm2, %v1140_v27, %v6955_v42  ;;  %v1163_v40 = vmul.f32 %v1043_v61, %v6837_v33 }
 0x2ca   : > { %v1431_v7 = vsel %vm1032_vm2, %v1423_v0, %v1353_v17  ;;  %v7075_v52 = vpop.permute.xlu1 %1386  ;;  %v7111_v32 = vadd.f32 %v1462_v55, %v1326_v28  ;;  %v7115_v11 = vsel %vm1041_vm4, %v1035_v30, %v6960_v24  ;;  %v1156_v24 = vsel %vm1041_vm4, %v1148_v60, %v6964_v13 }
 0x2cb   : > { %v1439_v37 = vsel %vm1276_vm5, %v1431_v7, %v1385_v38  ;;  %v1164_v51 = vmul.f32 %v7115_v11, %v6858_v41  ;;  %v1141_v41 = vsel %vm1023_vm0, %v6618_v8, %v6895_v25  ;;  %v1027_v55 = vsel %vm1023_vm0, %v6652_v21, %v6878_v4 }
 0x2cc   : > { %v1447_v54 = vsel %vm1041_vm4, %v1439_v37, %v1353_v17  ;;  %v7083_v43 = vpop.permute.xlu0 %1224  ;;  %v1303_v17 = vmul.f32 %v1295_v34, %v1155_v46  ;;  %v1149_v21 = vsel %vm1032_vm2, %v1141_v41, %v6909_v53  ;;  %v1036_v28 = vsel %vm1032_vm2, %v1027_v55, %v6893_v19  ;;  %v8154_v55 = vld [vmem:[#allocation20_spill] sm:$0xff] }
 0x2cd   : > { %v1455_v22 = vsel %vm1293_vm6, %v1447_v54, %v1385_v38  ;;  %v1157_v60 = vsel %vm1041_vm4, %v1149_v21, %v6925_v36 }
 0x2ce   : > { %v1463_v29 = vmul.f32 %v1455_v22, %v1155_v46  ;;  %v1191_v39 = vpop.permute.xlu1 %1190  ;;  %v1311_v33 = vadd.f32 %v1303_v17, %v1163_v40 }
 0x2cf   : > { %v1245_v59 = vsel %vm1242_vm1, %v1191_v39, %v1223_v9 }
 0x2d0   : > { %v1253_v10 = vsel %vm1023_vm0, %v1245_v59, %v1191_v39  ;;  %v7100_v38 = vpop.permute.xlu0 %1388  ;;  %v7102_v45 = vadd.f32 %v1463_v29, %v1327_v63  ;;  %v7140_v46 = vmul.f32 0.17677669, %v1311_v33  ;;  %v1029_v29 = vsel %vm1023_vm0, %v6636_v18, %v6938_v3 }
 0x2d1   : > { %v1262_v31 = vsel %vm1259_vm3, %v1253_v10, %v1223_v9  ;;  %v1143_v18 = vsel %vm1023_vm0, %v6643_v20, %v6950_v6  ;;  %v1038_v17 = vsel %vm1032_vm2, %v1029_v29, %v6957_v47  ;;  %v1028_v20 = vsel %vm1023_vm0, %v6712_v14, %v6970_v44 }
 0x2d2   : > { %v1270_v1 = vsel %vm1032_vm2, %v1262_v31, %v1191_v39  ;;  %v1355_v5 = vpop.permute.xlu1 %1354  ;;  %5378 = vmatprep.subr.msk.mxu1 %vm1023_vm0, %v7102_v45  ;;  %v1151_v19 = vsel %vm1032_vm2, %v1143_v18, %v6962_v23  ;;  %v1045_v14 = vsel %vm1041_vm4, %v1036_v28, %v6907_v62  ;;  %v1142_v44 = vsel %vm1023_vm0, %v6729_v26, %v6974_v50  ;;  %v8156_v28 = vld [vmem:[#allocation35_spill] sm:$0xff] }
 0x2d3   : > { %v1279_v56 = vsel %vm1276_vm5, %v1270_v1, %v1223_v9  ;;  %v1408_v0 = vsel %vm1242_vm1, %v1355_v5, %v7075_v52  ;;  %5379 = vmatpush3.xpose.msk.msra.mxu1 %vm1023_vm0, %v7102_v45  ;;  %v7204_v1 = vsel %vm1041_vm4, %v1038_v17, %v6966_v2  ;;  %v1329_v26 = vmul.f32 %v1045_v14, %v6883_v57 }
 0x2d4   : > { %v1287_v42 = vsel %vm1041_vm4, %v1279_v56, %v1191_v39  ;;  %v1416_v16 = vsel %vm1023_vm0, %v1408_v0, %v1355_v5  ;;  %5380 = vmatprep.subr.msk.mxu1 %vm1023_vm0, %v7111_v32  ;;  %v7126_v58 = vpop.permute.xlu0 %1226  ;;  %v1331_v29 = vmul.f32 %v7204_v1, %v8154_v55 }
 0x2d5   : > { %v1296_v49 = vsel %vm1293_vm6, %v1287_v42, %v1223_v9  ;;  %v1424_v7 = vsel %vm1259_vm3, %v1416_v16, %v7075_v52  ;;  %v1328_v42 = vmul.f32 %v7115_v11, %v6866_v48  ;;  %v8150_v16 = vld [vmem:[#allocation24_spill] sm:$0xff] }
 0x2d6   : > { %v1432_v37 = vsel %vm1032_vm2, %v1424_v7, %v1355_v5  ;;  %v1193_v15 = vpop.permute.xlu1 %1192  ;;  %v1304_v54 = vmul.f32 %v1296_v49, %v1156_v24 }
 0x2d7   : > { %v1246_v61 = vsel %vm1242_vm1, %v1193_v15, %v7083_v43  ;;  %5381 = vmatpush3.xpose.msk.msra.mxu1 %vm1023_vm0, %v7111_v32  ;;  %v1440_v22 = vsel %vm1276_vm5, %v1432_v37, %v7075_v52 }
 0x2d8   : > { %v1254_v13 = vsel %vm1023_vm0, %v1246_v61, %v1193_v15  ;;  %v7143_v9 = vpop.permute.xlu0 %1228  ;;  %v1312_v34 = vadd.f32 %v1304_v54, %v1164_v51  ;;  %v1448_v4 = vsel %vm1041_vm4, %v1440_v22, %v1355_v5  ;;  %v8151_v51 = vld [vmem:[#allocation30_spill] sm:$0xff]  ;;  %v8153_v61 = vld [vmem:[#allocation17_spill] sm:$0xff] }
 0x2d9   : > { %v1263_v63 = vsel %vm1259_vm3, %v1254_v13, %v7083_v43  ;;  %v1456_v47 = vsel %vm1293_vm6, %v1448_v4, %v7075_v52  ;;  %v1037_v52 = vsel %vm1032_vm2, %v1028_v20, %v6988_v12  ;;  %v1159_v12 = vsel %vm1041_vm4, %v1151_v19, %v8150_v16  ;;  %v5368_v16 = vpop.f32.mrf.mxu0 }
 0x2da   : > { %v1271_v39 = vsel %vm1032_vm2, %v1263_v63, %v1193_v15  ;;  %v1357_v27 = vpop.permute.xlu1 %1356  ;;  %5383 = vmatmul.mubr.msk.f32.vlgmr.msra.gmra.mxu1 %vm1023_vm0, %v7140_v46  ;;  %v7161_v8 = vmul.f32 0.17677669, %v1312_v34  ;;  %v1464_v50 = vmul.f32 %v1456_v47, %v1156_v24  ;;  %v1150_v37 = vsel %vm1032_vm2, %v1142_v44, %v8151_v51 }
 0x2db   : > { %v1280_v25 = vsel %vm1276_vm5, %v1271_v39, %v7083_v43  ;;  %v1409_v30 = vsel %vm1242_vm1, %v1357_v27, %v7100_v38  ;;  %v1165_v13 = vmul.f32 %v1045_v14, %v8153_v61  ;;  %v1158_v17 = vsel %vm1041_vm4, %v1150_v37, %v8156_v28 }
 0x2dc   : > { %v1417_v3 = vsel %vm1023_vm0, %v1409_v30, %v1357_v27  ;;  %5389 = vmatprep.mubr.msk.f32.mxu1 %vm1023_vm0, %v7161_v8  ;;  %v1393_v59 = vpop.permute.xlu0 %1392  ;;  %v1288_v6 = vsel %vm1041_vm4, %v1280_v25, %v1193_v15  ;;  %v8152_v15 = vld [vmem:[#allocation33_spill] sm:$0xff]  ;;  %v7239_v63 = vadd.f32 %v1464_v50, %v1328_v42 }
 0x2dd   : > { %v1425_v53 = vsel %vm1259_vm3, %v1417_v3, %v7100_v38  ;;  %v1297_v5 = vsel %vm1293_vm6, %v1288_v6, %v7083_v43  ;;  %v1046_v48 = vsel %vm1041_vm4, %v1037_v52, %v8152_v15  ;;  %v8155_v3 = vld [vmem:[#allocation15_spill] sm:$0xff]  ;;  %v8157_v6 = vld [vmem:[#allocation18_spill] sm:$0xff]  ;;  %v8159_v50 = vld [vmem:[#allocation21_spill] sm:$0xff] }
 0x2de   : > { %v1433_v10 = vsel %vm1032_vm2, %v1425_v53, %v1357_v27  ;;  %v7187_v31 = vpop.permute.xlu1 %1390  ;;  %v1305_v49 = vmul.f32 %v1297_v5, %v1157_v60  ;;  %v8158_v5 = vld [vmem:[#allocation16_spill] sm:$0xff] }
 0x2df   : > { %v1441_v40 = vsel %vm1276_vm5, %v1433_v10, %v7100_v38  ;;  %v1166_v10 = vmul.f32 %v1046_v48, %v8157_v6 }
 0x2e0   : > { %v1449_v36 = vsel %vm1041_vm4, %v1441_v40, %v1357_v27  ;;  %v1361_v23 = vpop.permute.xlu0 %1360  ;;  %v1313_v4 = vadd.f32 %v1305_v49, %v1165_v13 }
 0x2e1   : > { %v1457_v62 = vsel %vm1293_vm6, %v1449_v36, %v7100_v38  ;;  %v1411_v56 = vsel %vm1242_vm1, %v1361_v23, %v1393_v59 }
 0x2e2   : > { %v1465_v0 = vmul.f32 %v1457_v62, %v1157_v60  ;;  %v1419_v2 = vsel %vm1023_vm0, %v1411_v56, %v1361_v23  ;;  %v1195_v33 = vpop.permute.xlu1 %1194 }
 0x2e3   : > { %v1427_v43 = vsel %vm1259_vm3, %v1419_v2, %v1393_v59  ;;  %v1247_v38 = vsel %vm1242_vm1, %v1195_v33, %v7126_v58 }
 0x2e4   : > { %v1435_v7 = vsel %vm1032_vm2, %v1427_v43, %v1361_v23  ;;  %v1255_v57 = vsel %vm1023_vm0, %v1247_v38, %v1195_v33  ;;  %v7225_v24 = vadd.f32 %v1465_v0, %v1329_v26  ;;  %v1330_v0 = vmul.f32 %v1046_v48, %v8159_v50  ;;  %v896_v48 = vpop.f32.mrf.mxu0 }
 0x2e5   : > { %v1443_v11 = vsel %vm1276_vm5, %v1435_v7, %v1393_v59  ;;  %v1264_v54 = vsel %vm1259_vm3, %v1255_v57, %v7126_v58  ;;  %v8160_v57 = vld [vmem:[#allocation19_spill] sm:$0xff] }
 0x2e6   : > { %v1451_v34 = vsel %vm1041_vm4, %v1443_v11, %v1361_v23  ;;  %v1272_v41 = vsel %vm1032_vm2, %v1264_v54, %v1195_v33  ;;  %v1359_v22 = vpop.permute.xlu1 %1358  ;;  %5385 = vmatprep.subr.msk.mxu1 %vm1023_vm0, %v7225_v24  ;;  %v7275_v23 = vmul.f32 0.17677669, %v1313_v4  ;;  %v1167_v51 = vmul.f32 %v7204_v1, %v8160_v57  ;;  %v5952_v4 = vld [vmem:[%s6610_s12 + $0x38] sm:$0xff]  ;;  %v8166_v57 = vld [vmem:[#allocation36_spill] sm:$0xff]  ;;  %s5157_s12 = sshll.u32 %s6168_s17, 10  ;;  %s6089_s17 = smov [#allocation7]  }
 0x2e7   : > { %v1459_v39 = vsel %vm1293_vm6, %v1451_v34, %v1393_v59  ;;  %v1281_v27 = vsel %vm1276_vm5, %v1272_v41, %v7126_v58  ;;  %v1410_v25 = vsel %vm1242_vm1, %v1359_v22, %v7187_v31  ;;  %5386 = vmatpush3.xpose.msk.msra.mxu1 %vm1023_vm0, %v7225_v24  ;;  %v712_v59 = vsub.s32 2, %v8155_v3  ;;  %v8161_v3 = vld [vmem:[#allocation25_spill] sm:$0xff]  ;;  %s8031_s26 = scalar_lea.hbm %s8084_s10, %s5157_s12  ;;  %s6012_s29 = sshll.u32 %s6089_s17, 4  ;;  %s6013_s29 = int_to_ptr.vmem [resolvable:$false] %s6012_s29 }
 0x2e8   : > { %v1467_v30 = vmul.f32 %v1459_v39, %v1159_v12  ;;  %v1289_v21 = vsel %vm1041_vm4, %v1281_v27, %v1195_v33  ;;  %v1418_v18 = vsel %vm1023_vm0, %v1410_v25, %v1359_v22  ;;  %5387 = vmatprep.subr.msk.mxu1 %vm1023_vm0, %v7239_v63  ;;  %s6014_s20 = scalar_lea.vmem %s6013_s29, 2048 }
 0x2e9   : > { %v1298_v53 = vsel %vm1293_vm6, %v1289_v21, %v7126_v58  ;;  %v1426_v20 = vsel %vm1259_vm3, %v1418_v18, %v7187_v31  ;;  %v7278_v62 = vrot.slane %v8158_v5, %v712_v59  ;;  %v1031_v59 = vsel %vm1023_vm0, %v5952_v4, %v8161_v3  ;;  %v8164_v5 = vld [vmem:[#allocation32_spill] sm:$0xff] }
 0x2ea   : > { %v1434_v60 = vsel %vm1032_vm2, %v1426_v20, %v1359_v22  ;;  %v1197_v19 = vpop.permute.xlu1 %1196  ;;  %v7263_v47 = vadd.f32 %v1467_v30, %v1331_v29  ;;  %v1306_v40 = vmul.f32 %v1298_v53, %v1158_v17  ;;  %v5953_v53 = vld [vmem:[%s6581_s25 + $0x38] sm:$0xff]  ;;  %v8162_v20 = vld [vmem:[#allocation27_spill] sm:$0xff] }
 0x2eb   : > { %v1442_v14 = vsel %vm1276_vm5, %v1434_v60, %v7187_v31  ;;  %v1248_v44 = vsel %vm1242_vm1, %v1197_v19, %v7143_v9  ;;  %5388 = vmatpush3.xpose.msk.msra.mxu1 %vm1023_vm0, %v7239_v63  ;;  %v7302_v7 = vadd.f32 %v5368_v16, %v7278_v62  ;;  %v7314_v54 = vadd.f32 %v896_v48, %v7278_v62  ;;  %v8165_v16 = vld [vmem:[#allocation34_spill] sm:$0xff] }
 0x2ec   : > { %v1450_v58 = vsel %vm1041_vm4, %v1442_v14, %v1359_v22  ;;  %v1256_v36 = vsel %vm1023_vm0, %v1248_v44, %v1197_v19  ;;  %5392 = vmatprep.subr.msk.mxu0 %vm1023_vm0, %v7263_v47  ;;  %v1314_v52 = vadd.f32 %v1306_v40, %v1166_v10  ;;  %v1145_v6 = vsel %vm1023_vm0, %v5953_v53, %v8162_v20  ;;  %v8163_v44 = vld [vmem:[#allocation29_spill] sm:$0xff] }
 0x2ed   : > { %v1458_v56 = vsel %vm1293_vm6, %v1450_v58, %v7187_v31  ;;  %v1265_v26 = vsel %vm1259_vm3, %v1256_v36, %v7143_v9  ;;  %5393 = vmatpush3.xpose.msk.msra.mxu0 %vm1023_vm0, %v7263_v47  ;;  %v1040_v58 = vsel %vm1032_vm2, %v1031_v59, %v8163_v44  ;;  %v8173_v44 = vld [vmem:[#allocation23_spill] sm:$0xff] }
 0x2ee   : > { %v1466_v2 = vmul.f32 %v1458_v56, %v1158_v17  ;;  %v1273_v33 = vsel %vm1032_vm2, %v1265_v26, %v1197_v19  ;;  %5390 = vmatmul.mubr.msk.f32.vlgmr.msra.gmra.mxu1 %vm1023_vm0, %v7275_v23  ;;  %v7290_v42 = vmul.f32 0.17677669, %v1314_v52  ;;  %v1199_v61 = vpop.permute.xlu1 %1198  ;;  %v1153_v56 = vsel %vm1032_vm2, %v1145_v6, %v8164_v5  ;;  %v5371_v5 = vpop.f32.mrf.mxu0 }
 0x2ef   : > { %v1282_v31 = vsel %vm1276_vm5, %v1273_v33, %v7143_v9 }
 0x2f0   : > { %v1290_v43 = vsel %vm1041_vm4, %v1282_v31, %v1197_v19  ;;  %5396 = vmatprep.mubr.msk.f32.mxu0 %vm1023_vm0, %v7290_v42  ;;  %v7297_v38 = vadd.f32 %v1466_v2, %v1330_v0  ;;  %v1049_v31 = vsel %vm1041_vm4, %v1040_v58, %v8165_v16 }
 0x2f1   : > { %v1299_v49 = vsel %vm1293_vm6, %v1290_v43, %v7143_v9  ;;  %v5374_v9 = vpop.f32.mrf.mxu1 }
 0x2f2   : > { %v1307_v37 = vmul.f32 %v1299_v49, %v1159_v12  ;;  %5394 = vmatprep.subr.msk.mxu0 %vm1023_vm0, %v7297_v38  ;;  %v7320_v1 = vadd.f32 %v5374_v9, %v7278_v62  ;;  %v1231_v12 = vpop.permute.xlu0 %1230  ;;  %v1363_v34 = vpop.permute.xlu1 %1362  ;;  %v8167_v9 = vld [vmem:[#allocation28_spill] sm:$0xff] }
 0x2f3   : > { %5395 = vmatpush3.xpose.msk.msra.mxu0 %vm1023_vm0, %v7297_v38  ;;  %v1249_v55 = vsel %vm1242_vm1, %v1199_v61, %v1231_v12 }
 0x2f4   : > { %v1315_v15 = vadd.f32 %v1307_v37, %v1167_v51  ;;  %5406 = vmatprep.subr.mxu0 %v7302_v7  ;;  %v1257_v21 = vsel %vm1023_vm0, %v1249_v55, %v1199_v61  ;;  %v1161_v51 = vsel %vm1041_vm4, %v1153_v56, %v8166_v57  ;;  %v1333_v55 = vmul.f32 %v1049_v31, %v8167_v9 }
 0x2f5   : > { %v1266_v10 = vsel %vm1259_vm3, %v1257_v21, %v1231_v12  ;;  %v8169_v21 = vld [vmem:[#allocation14_spill] sm:$0xff] }
 0x2f6   : > { %v7311_v11 = vmul.f32 0.17677669, %v1315_v15  ;;  %v1395_v13 = vpop.permute.xlu0 %1394  ;;  %v1274_v26 = vsel %vm1032_vm2, %v1266_v10, %v1199_v61  ;;  %v8171_v10 = vld [vmem:[#allocation26_spill] sm:$0xff] }
 0x2f7   : > { %v1412_v29 = vsel %vm1242_vm1, %v1363_v34, %v1395_v13  ;;  %v1283_v15 = vsel %vm1276_vm5, %v1274_v26, %v1231_v12 }
 0x2f8   : > { %5397 = vmatmul.mubr.msk.f32.vlgmr.msra.gmra.mxu0 %vm1023_vm0, %v7311_v11  ;;  %v1420_v18 = vsel %vm1023_vm0, %v1412_v29, %v1363_v34 }
 0x2f9   : > { %5407 = vmatpush3.msra.mxu0 %v7302_v7  ;;  %v1428_v60 = vsel %vm1259_vm3, %v1420_v18, %v1395_v13 }
 0x2fa   : > { %5408 = vmatprep.subr.mxu0 %v7314_v54  ;;  %v1436_v50 = vsel %vm1032_vm2, %v1428_v60, %v1363_v34  ;;  %v1169_v60 = vmul.f32 %v1049_v31, %v8171_v10 }
 0x2fb   : > { %5409 = vmatpush3.msra.mxu0 %v7314_v54  ;;  %v1444_v48 = vsel %vm1276_vm5, %v1436_v50, %v1395_v13 }
 0x2fc   : > { %5420 = vmatprep.subr.mxu0 %v7320_v1  ;;  %v1452_v59 = vsel %vm1041_vm4, %v1444_v48, %v1363_v34 }
 0x30d   : > { %v1233_v41 = vpop.permute.xlu0 %1232 }
 0x30f   : > { %v1201_v22 = vpop.permute.xlu1 %1200 }
 0x310   : > { %v1250_v39 = vsel %vm1242_vm1, %v1201_v22, %v1233_v41 }
 0x311   : > { %v1258_v27 = vsel %vm1023_vm0, %v1250_v39, %v1201_v22  ;;  %v1397_v25 = vpop.permute.xlu0 %1396 }
 0x312   : > { %v1267_v30 = vsel %vm1259_vm3, %v1258_v27, %v1233_v41 }
 0x313   : > { %v1275_v28 = vsel %vm1032_vm2, %v1267_v30, %v1201_v22  ;;  %v988_v40 = vpop.permute.xlu1 %987  ;;  %v8168_v30 = vld [vmem:[#allocation37_spill] sm:$0xff] }
 0x314   : > { %v1284_v36 = vsel %vm1276_vm5, %v1275_v28, %v1233_v41 }
 0x315   : > { %v1365_v17 = vpop.permute.xlu0 %1364  ;;  %v1292_v43 = vsel %vm1041_vm4, %v1284_v36, %v1201_v22  ;;  %v1030_v22 = vsel %vm1023_vm0, %v8169_v21, %v8168_v30 }
 0x316   : > { %v1413_v19 = vsel %vm1242_vm1, %v1365_v17, %v1397_v25  ;;  %v1301_v18 = vsel %vm1293_vm6, %v1292_v43, %v1233_v41  ;;  %v1039_v4 = vsel %vm1032_vm2, %v1030_v22, %v988_v40  ;;  %v8172_v40 = vld [vmem:[#allocation22_spill] sm:$0xff] }
 0x317   : > { %v1421_v14 = vsel %vm1023_vm0, %v1413_v19, %v1365_v17  ;;  %v1012_v39 = vpop.permute.xlu1 %1011  ;;  %v1309_v20 = vmul.f32 %v1301_v18, %v1161_v51 }
 0x318   : > { %v1429_v52 = vsel %vm1259_vm3, %v1421_v14, %v1397_v25  ;;  %v1048_v28 = vsel %vm1041_vm4, %v1039_v4, %v1012_v39 }
 0x319   : > { %v1437_v0 = vsel %vm1032_vm2, %v1429_v52, %v1365_v17  ;;  %v1079_v2 = vpop.permute.xlu0 %1078  ;;  %v1168_v14 = vmul.f32 %v1048_v28, %v8172_v40  ;;  %v1332_v58 = vmul.f32 %v1048_v28, %v8173_v44  ;;  %v1317_v50 = vadd.f32 %v1309_v20, %v1169_v60 }
 0x31a   : > { %v1445_v33 = vsel %vm1276_vm5, %v1437_v0, %v1397_v25  ;;  %v7388_v0 = vpop.f32.mrf.mxu1 }
 0x31b   : > { %v1453_v49 = vsel %vm1041_vm4, %v1445_v33, %v1365_v17  ;;  %v8170_v17 = vld [vmem:[#allocation31_spill] sm:$0xff]  ;;  %v7402_v33 = vmul.f32 0.17677669, %v1317_v50 }
 0x31c   : > { %v1461_v37 = vsel %vm1293_vm6, %v1453_v49, %v1397_v25  ;;  %v1291_v25 = vsel %vm1041_vm4, %v1283_v15, %v1199_v61  ;;  %v1144_v53 = vsel %vm1023_vm0, %v8170_v17, %v1079_v2  ;;  %v1460_v61 = vsel %vm1293_vm6, %v1452_v59, %v1395_v13  ;;  %v906_v2 = vpop.f32.mrf.mxu0  ;;  %v5377_v16 = vpop.f32.mrf.mxu1 }
 0x31d   : > { %v1469_v29 = vmul.f32 %v1461_v37, %v1161_v51  ;;  %v1103_v27 = vpop.permute.xlu0 %1102  ;;  %v1300_v19 = vsel %vm1293_vm6, %v1291_v25, %v1231_v12  ;;  %v7391_v12 = vadd.f32 %v5371_v5, %v7278_v62  ;;  %v7405_v31 = vadd.f32 %v906_v2, %v7278_v62 }
 0x31e   : > { %v1152_v6 = vsel %vm1032_vm2, %v1144_v53, %v1103_v27  ;;  %v7411_v43 = vadd.f32 %v5377_v16, %v7278_v62  ;;  %v7416_v49 = vpop.f32.mrf.mxu1 }
 0x31f   : > { %v7368_v3 = vadd.f32 %v1469_v29, %v1333_v55 }
 0x321   : > { %5399 = vmatprep.subr.msk.mxu1 %vm1023_vm0, %v7368_v3  ;;  %v1127_v41 = vpop.permute.xlu0 %1126 }
 0x322   : > { %v1160_v34 = vsel %vm1041_vm4, %v1152_v6, %v1127_v41  ;;  %5400 = vmatpush3.xpose.msk.msra.mxu1 %vm1023_vm0, %v7368_v3 }
 0x323   : > { %v1308_v36 = vmul.f32 %v1300_v19, %v1160_v34  ;;  %v1468_v52 = vmul.f32 %v1460_v61, %v1160_v34 }
 0x325   : > { %v1316_v56 = vadd.f32 %v1308_v36, %v1168_v14  ;;  %v7386_v26 = vadd.f32 %v1468_v52, %v1332_v58 }
 0x327   : > { %v7393_v13 = vmul.f32 0.17677669, %v1316_v56  ;;  %5401 = vmatprep.subr.msk.mxu1 %vm1023_vm0, %v7386_v26 }
 0x328   : > { %5402 = vmatpush3.xpose.msk.msra.mxu1 %vm1023_vm0, %v7386_v26 }
 0x329   : > { %5403 = vmatprep.mubr.msk.f32.mxu1 %vm1023_vm0, %v7393_v13  ;;  %5413 = vmatprep.subr.mxu1 %v7391_v12 }
 0x32b   : > { %5404 = vmatmul.mubr.msk.f32.vlgmr.msra.gmra.mxu1 %vm1023_vm0, %v7402_v33 }
 0x32c   : > { %5414 = vmatpush3.msra.mxu1 %v7391_v12 }
 0x32d   : > { %5415 = vmatprep.subr.mxu1 %v7405_v31 }
 0x32e   : > { %5416 = vmatpush3.msra.mxu1 %v7405_v31 }
 0x32f   : > { %5427 = vmatprep.subr.mxu1 %v7411_v43 }
 0x39a   : > { %v5384_v57 = vpop.f32.mrf.mxu1 }
 0x39b   : > { %v1829_v51 = vsel %vm1242_vm1, %v5384_v57, -inf }
 0x39c   : > { %1830 = vmax.xlane.f32.xlu0 %v1829_v51  ;;  %v1556_v37 = vpop.f32.mrf.mxu1 }
 0x39d   : > { %v1826_v15 = vsel %vm1242_vm1, %v1556_v37, -inf }
 0x39e   : > { %1827 = vmax.xlane.f32.xlu1 %v1826_v15 }
 0x3ae   : > { %v5391_v48 = vpop.f32.mrf.mxu1 }
 0x3af   : > { %v1835_v9 = vsel %vm1242_vm1, %v5391_v48, -inf }
 0x3b0   : > { %1836 = vmax.xlane.f32.xlu0 %v1835_v9  ;;  %v1643_v55 = vpop.f32.mrf.mxu1 }
 0x3b1   : > { %v1832_v29 = vsel %vm1242_vm1, %v1643_v55, -inf }
 0x3b4   : > { %1833 = vmax.xlane.f32.xlu0 %v1832_v29 }
 0x3b8   : > { %v5398_v39 = vpop.f32.mrf.mxu0 }
 0x3b9   : > { %v1841_v21 = vsel %vm1242_vm1, %v5398_v39, -inf }
 0x3ba   : > { %v1730_v27 = vpop.f32.mrf.mxu0 }
 0x3bb   : > { %v1838_v30 = vsel %vm1242_vm1, %v1730_v27, -inf }
 0x3bc   : > { %1839 = vmax.xlane.f32.xlu1 %v1838_v30 }
 0x3c0   : > { %1842 = vmax.xlane.f32.xlu1 %v1841_v21 }
 0x3eb   : > { %v5405_v22 = vpop.f32.mrf.mxu1 }
 0x3ec   : > { %v1847_v18 = vsel %vm1242_vm1, %v5405_v22, -inf }
 0x3ed   : > { %1848 = vmax.xlane.f32.xlu1 %v1847_v18  ;;  %v1817_v4 = vpop.f32.mrf.mxu1 }
 0x3ee   : > { %v1844_v25 = vsel %vm1242_vm1, %v1817_v4, -inf }
 0x3ef   : > { %1845 = vmax.xlane.f32.xlu0 %v1844_v25 }
 0x3fe   : > { %2242 = vrot.lane.b32.xlu1 %v7111_v32, %s6086_s19 }
 0x402   : > { %2335 = vrot.lane.b32.xlu1 %v7225_v24, %s6086_s19 }
 0x405   : > { %2244 = vrot.lane.b32.xlu0 %v7102_v45, %s6086_s19 }
 0x406   : > { %2333 = vrot.lane.b32.xlu1 %v7239_v63, %s6086_s19 }
 0x409   : > { %2238 = vrot.lane.b32.xlu0 %v7054_v35, %s6086_s19 }
 0x40a   : > { %2240 = vrot.lane.b32.xlu1 %v7140_v46, %s6086_s19 }
 0x40d   : > { %2426 = vrot.lane.b32.xlu0 %v7263_v47, %s6086_s19 }
 0x425   : > { %v1831_v59 = vpop.xlane.xlu0 %1830 }
 0x426   : > { %v1851_v28 = vsub.f32 %v5384_v57, %v1831_v59 }
 0x427   : > { %v1828_v17 = vpop.xlane.xlu1 %1827 }
 0x428   : > { %v1860_v53 = vmul.f32 1.442695, %v1851_v28  ;;  %v1850_v20 = vsub.f32 %v1556_v37, %v1828_v17 }
 0x42a   : > { %5824 = vpow2.f32 %v1860_v53  ;;  %v1858_v6 = vmul.f32 1.442695, %v1850_v20 }
 0x42c   : > { %5826 = vpow2.f32 %v1858_v6 }
 0x437   : > { %v7440_v41 = vpop.eup %5824 }
 0x438   : > { %v1877_v10 = vsel %vm1242_vm1, %v7440_v41, 0.0 }
 0x439   : > { %v7444_v60 = vpop.eup %5826  ;;  %1878 = vadd.xlane.f32.xlu1 %v1877_v10  ;;  %v1837_v19 = vpop.xlane.xlu0 %1836 }
 0x43a   : > { %v1853_v61 = vsub.f32 %v5391_v48, %v1837_v19  ;;  %v1874_v34 = vsel %vm1242_vm1, %v7444_v60, 0.0 }
 0x43b   : > { %1875 = vadd.xlane.f32.xlu0 %v1874_v34 }
 0x43c   : > { %v1864_v40 = vmul.f32 1.442695, %v1853_v61 }
 0x43d   : > { %v1834_v14 = vpop.xlane.xlu0 %1833 }
 0x43e   : > { %5828 = vpow2.f32 %v1864_v40  ;;  %v1852_v44 = vsub.f32 %v1643_v55, %v1834_v14 }
 0x440   : > { %v1862_v58 = vmul.f32 1.442695, %v1852_v44 }
 0x442   : > { %5830 = vpow2.f32 %v1862_v58 }
 0x445   : > { %v1840_v36 = vpop.xlane.xlu1 %1839 }
 0x446   : > { %v1854_v52 = vsub.f32 %v1730_v27, %v1840_v36  ;;  %v7496_v36 = vadd.f32 %v7388_v0, %v7278_v62 }
 0x448   : > { %v1866_v2 = vmul.f32 1.442695, %v1854_v52 }
 0x449   : > { %v1843_v5 = vpop.xlane.xlu1 %1842 }
 0x44a   : > { %v1855_v56 = vsub.f32 %v5398_v39, %v1843_v5 }
 0x44b   : > { %v7448_v50 = vpop.eup %5828 }
 0x44c   : > { %v1868_v16 = vmul.f32 1.442695, %v1855_v56  ;;  %v1883_v57 = vsel %vm1242_vm1, %v7448_v50, 0.0 }
 0x44d   : > { %1884 = vadd.xlane.f32.xlu0 %v1883_v57  ;;  %v7507_v57 = vadd.f32 %v7416_v49, %v7278_v62 }
 0x44e   : > { %5832 = vpow2.f32 %v1868_v16 }
 0x44f   : > { %v5831_v51 = vpop.eup %5830  ;;  %5834 = vpow2.f32 %v1866_v2 }
 0x450   : > { %v1880_v37 = vsel %vm1242_vm1, %v5831_v51, 0.0 }
 0x451   : > { %1881 = vadd.xlane.f32.xlu0 %v1880_v37 }
 0x45b   : > { %v7453_v15 = vpop.eup %5832 }
 0x45c   : > { %v1889_v48 = vsel %vm1242_vm1, %v7453_v15, 0.0  ;;  %v7457_v9 = vpop.eup %5834 }
 0x45d   : > { %1890 = vadd.xlane.f32.xlu1 %v1889_v48  ;;  %v1886_v55 = vsel %vm1242_vm1, %v7457_v9, 0.0 }
 0x461   : > { %1887 = vadd.xlane.f32.xlu1 %v1886_v55 }
 0x476   : > { %v1849_v29 = vpop.xlane.xlu1 %1848 }
 0x477   : > { %v1857_v39 = vsub.f32 %v5405_v22, %v1849_v29 }
 0x478   : > { %v1846_v27 = vpop.xlane.xlu0 %1845 }
 0x479   : > { %v1872_v30 = vmul.f32 1.442695, %v1857_v39  ;;  %v1856_v21 = vsub.f32 %v1817_v4, %v1846_v27 }
 0x47a   : > { %v2243_v22 = vpop.permute.xlu1 %2242 }
 0x47b   : > { %5836 = vpow2.f32 %v1872_v30  ;;  %v1870_v18 = vmul.f32 1.442695, %v1856_v21 }
 0x47c   : > { %v2245_v53 = vpop.permute.xlu0 %2244 }
 0x47d   : > { %5838 = vpow2.f32 %v1870_v18 }
 0x47e   : > { %v7485_v4 = vpop.permute.xlu1 %2335 }
 0x480   : > { %v2239_v6 = vpop.permute.xlu0 %2238 }
 0x482   : > { %v7489_v20 = vpop.permute.xlu1 %2333 }
 0x484   : > { %v2427_v19 = vpop.permute.xlu0 %2426 }
 0x486   : > { %v2241_v10 = vpop.permute.xlu1 %2240 }
 0x488   : > { %v7461_v25 = vpop.eup %5836 }
 0x489   : > { %v1895_v59 = vsel %vm1242_vm1, %v7461_v25, 0.0 }
 0x48a   : > { %v7465_v28 = vpop.eup %5838  ;;  %1896 = vadd.xlane.f32.xlu1 %v1895_v59 }
 0x48b   : > { %v1892_v17 = vsel %vm1242_vm1, %v7465_v28, 0.0 }
 0x48c   : > { %1893 = vadd.xlane.f32.xlu0 %v1892_v17 }
 0x49b   : > { %2424 = vrot.lane.b32.xlu1 %v7297_v38, %s6086_s19 }
 0x49f   : > { %2331 = vrot.lane.b32.xlu1 %v7275_v23, %s6086_s19 }
 0x4a2   : > { %2329 = vrot.lane.b32.xlu0 %v7161_v8, %s6086_s19 }
 0x4a3   : > { %2422 = vrot.lane.b32.xlu1 %v7311_v11, %s6086_s19 }
 0x4a6   : > { %2517 = vrot.lane.b32.xlu0 %v7368_v3, %s6086_s19 }
 0x4a7   : > { %2511 = vrot.lane.b32.xlu1 %v7393_v13, %s6086_s19 }
 0x4aa   : > { %2420 = vrot.lane.b32.xlu0 %v7290_v42, %s6086_s19 }
 0x4ae   : > { %2515 = vrot.lane.b32.xlu0 %v7386_v26, %s6086_s19 }
 0x4b2   : > { %2513 = vrot.lane.b32.xlu0 %v7402_v33, %s6086_s19 }
 0x4c2   : > { %v1879_v61 = vpop.xlane.xlu1 %1878 }
 0x4c3   : > { %5840 = vrcp.f32 %v1879_v61 }
 0x4c4   : > { %v1876_v34 = vpop.xlane.xlu0 %1875 }
 0x4c5   : > { %5842 = vrcp.f32 %v1876_v34 }
 0x4d0   : > { %v5841_v40 = vpop.eup %5840 }
 0x4d1   : > { %v1907_v58 = vmul.f32 %v5841_v40, %v7440_v41 }
 0x4d2   : > { %v5843_v14 = vpop.eup %5842 }
 0x4d3   : > { %v1906_v44 = vmul.f32 %v5843_v14, %v7444_v60 }
 0x4d5   : > { %5410 = vmatprep.mubr.msk.f32.mxu0 %vm1242_vm1, %v1906_v44 }
 0x4d6   : > { %5411 = vmatmul.mubr.msk.f32.vlgmr.msra.gmra.mxu0 %vm1242_vm1, %v1907_v58  ;;  %v1885_v52 = vpop.xlane.xlu0 %1884 }
 0x4d7   : > { %5421 = vmatpush3.msra.mxu0 %v7320_v1  ;;  %5844 = vrcp.f32 %v1885_v52 }
 0x4d8   : > { %5422 = vmatprep.subr.mxu0 %v7496_v36 }
 0x4d9   : > { %5423 = vmatpush3.msra.mxu0 %v7496_v36 }
 0x4da   : > { %5434 = vmatprep.subr.msk.mxu0 %vm1023_vm0, %v2245_v53  ;;  %v1882_v60 = vpop.xlane.xlu0 %1881 }
 0x4db   : > { %5846 = vrcp.f32 %v1882_v60 }
 0x4e4   : > { %v5845_v5 = vpop.eup %5844 }
 0x4e5   : > { %v1909_v16 = vmul.f32 %v5845_v5, %v7448_v50 }
 0x4e6   : > { %v1891_v41 = vpop.xlane.xlu1 %1890 }
 0x4e7   : > { %5848 = vrcp.f32 %v1891_v41 }
 0x4e8   : > { %v5847_v56 = vpop.eup %5846 }
 0x4e9   : > { %v1908_v2 = vmul.f32 %v5847_v56, %v5831_v51 }
 0x4ea   : > { %v1888_v0 = vpop.xlane.xlu1 %1887 }
 0x4eb   : > { %5850 = vrcp.f32 %v1888_v0  ;;  %5417 = vmatprep.mubr.msk.f32.mxu1 %vm1242_vm1, %v1908_v2 }
 0x4ec   : > { %5418 = vmatmul.mubr.msk.f32.vlgmr.msra.gmra.mxu1 %vm1242_vm1, %v1909_v16 }
 0x4ed   : > { %5428 = vmatpush3.msra.mxu1 %v7411_v43 }
 0x4ee   : > { %5429 = vmatprep.subr.mxu1 %v7507_v57 }
 0x4ef   : > { %5430 = vmatpush3.msra.mxu1 %v7507_v57 }
 0x4f0   : > { %5441 = vmatprep.subr.msk.mxu1 %vm1023_vm0, %v7485_v4 }
 0x4f4   : > { %v5849_v51 = vpop.eup %5848 }
 0x4f5   : > { %v1911_v48 = vmul.f32 %v5849_v51, %v7453_v15 }
 0x4f8   : > { %v5851_v50 = vpop.eup %5850 }
 0x4f9   : > { %v1910_v37 = vmul.f32 %v5851_v50, %v7457_v9 }
 0x4fb   : > { %5424 = vmatprep.mubr.msk.f32.mxu0 %vm1242_vm1, %v1910_v37 }
 0x4fc   : > { %5425 = vmatmul.mubr.msk.f32.vlgmr.msra.gmra.mxu0 %vm1242_vm1, %v1911_v48 }
 0x4fd   : > { %5435 = vmatpush3.xpose.msk.msra.mxu0 %vm1023_vm0, %v2245_v53  ;;  %5438 = vmatprep.mubr.msk.f32.mxu0 %vm1023_vm0, %v2239_v6 }
 0x4fe   : > { %5436 = vmatprep.subr.msk.mxu0 %vm1023_vm0, %v2243_v22 }
 0x501   : > { %5437 = vmatpush3.xpose.msk.msra.mxu0 %vm1023_vm0, %v2243_v22 }
 0x502   : > { %5448 = vmatprep.subr.msk.mxu0 %vm1023_vm0, %v2427_v19 }
 0x504   : > { %5439 = vmatmul.mubr.msk.f32.vlgmr.msra.gmra.mxu0 %vm1023_vm0, %v2241_v10 }
 0x505   : > { %5449 = vmatpush3.xpose.msk.msra.mxu0 %vm1023_vm0, %v2427_v19 }
 0x513   : > { %v1897_v62 = vpop.xlane.xlu1 %1896 }
 0x514   : > { %5852 = vrcp.f32 %v1897_v62 }
 0x515   : > { %v1894_v49 = vpop.xlane.xlu0 %1893 }
 0x516   : > { %5854 = vrcp.f32 %v1894_v49 }
 0x517   : > { %v2425_v15 = vpop.permute.xlu1 %2424 }
 0x518   : > { %5450 = vmatprep.subr.msk.mxu0 %vm1023_vm0, %v2425_v15 }
 0x519   : > { %5451 = vmatpush3.xpose.msk.msra.mxu0 %vm1023_vm0, %v2425_v15  ;;  %v2330_v9 = vpop.permute.xlu0 %2329 }
 0x51b   : > { %v2332_v55 = vpop.permute.xlu1 %2331 }
 0x51d   : > { %v2518_v29 = vpop.permute.xlu0 %2517 }
 0x51f   : > { %v2423_v30 = vpop.permute.xlu1 %2422 }
 0x521   : > { %v2421_v39 = vpop.permute.xlu0 %2420  ;;  %v5853_v27 = vpop.eup %5852 }
 0x522   : > { %5452 = vmatprep.mubr.msk.f32.mxu0 %vm1023_vm0, %v2421_v39  ;;  %v1913_v59 = vmul.f32 %v5853_v27, %v7461_v25 }
 0x523   : > { %v5855_v21 = vpop.eup %5854  ;;  %5453 = vmatmul.mubr.msk.f32.vlgmr.msra.gmra.mxu0 %vm1023_vm0, %v2423_v30 }
 0x524   : > { %v1912_v18 = vmul.f32 %v5855_v21, %v7465_v28  ;;  %v2512_v28 = vpop.permute.xlu1 %2511 }
 0x525   : > { %v2516_v25 = vpop.permute.xlu0 %2515 }
 0x526   : > { %5431 = vmatprep.mubr.msk.f32.mxu1 %vm1242_vm1, %v1912_v18 }
 0x527   : > { %5432 = vmatmul.mubr.msk.f32.vlgmr.msra.gmra.mxu1 %vm1242_vm1, %v1913_v59 }
 0x528   : > { %5442 = vmatpush3.xpose.msk.msra.mxu1 %vm1023_vm0, %v7485_v4  ;;  %5445 = vmatprep.mubr.msk.f32.mxu1 %vm1023_vm0, %v2330_v9 }
 0x529   : > { %5443 = vmatprep.subr.msk.mxu1 %vm1023_vm0, %v7489_v20  ;;  %v2514_v17 = vpop.permute.xlu0 %2513 }
 0x52c   : > { %5444 = vmatpush3.xpose.msk.msra.mxu1 %vm1023_vm0, %v7489_v20 }
 0x52d   : > { %5455 = vmatprep.subr.msk.mxu1 %vm1023_vm0, %v2518_v29 }
 0x52f   : > { %5446 = vmatmul.mubr.msk.f32.vlgmr.msra.gmra.mxu1 %vm1023_vm0, %v2332_v55 }
 0x530   : > { %5456 = vmatpush3.xpose.msk.msra.mxu1 %vm1023_vm0, %v2518_v29  ;;  %5459 = vmatprep.mubr.msk.f32.mxu1 %vm1023_vm0, %v2512_v28 }
 0x531   : > { %5457 = vmatprep.subr.msk.mxu1 %vm1023_vm0, %v2516_v25 }
 0x534   : > { %5458 = vmatpush3.xpose.msk.msra.mxu1 %vm1023_vm0, %v2516_v25 }
 0x537   : > { %5460 = vmatmul.mubr.msk.f32.vlgmr.msra.gmra.mxu1 %vm1023_vm0, %v2514_v17 }
 0x596   : > { %v7548_v22 = vpop.f32.mrf.mxu0 }
 0x598   : > { %v7550_v4 = vpop.f32.mrf.mxu0 }
 0x5ac   : > { %v7558_v34 = vpop.f32.mrf.mxu1 }
 0x5ae   : > { %v7561_v58 = vpop.f32.mrf.mxu1 }
 0x5bc   : > { %v7552_v53 = vpop.f32.mrf.mxu0 }
 0x5be   : > { %v7554_v20 = vpop.f32.mrf.mxu0 }
 0x5c4   : > { %v5440_v6 = vpop.f32.mrf.mxu0 }
 0x5c5   : > { %v2605_v10 = vsel %vm1242_vm1, %v5440_v6, -inf }
 0x5c6   : > { %2606 = vmax.xlane.f32.xlu0 %v2605_v10  ;;  %v2320_v19 = vpop.f32.mrf.mxu0 }
 0x5c7   : > { %v2602_v61 = vsel %vm1242_vm1, %v2320_v19, -inf }
 0x5c8   : > { %2603 = vmax.xlane.f32.xlu1 %v2602_v61 }
 0x5e3   : > { %v5454_v40 = vpop.f32.mrf.mxu0 }
 0x5e4   : > { %v2617_v14 = vsel %vm1242_vm1, %v5454_v40, -inf }
 0x5e5   : > { %2618 = vmax.xlane.f32.xlu1 %v2617_v14  ;;  %v2502_v44 = vpop.f32.mrf.mxu0 }
 0x5e6   : > { %v2614_v52 = vsel %vm1242_vm1, %v2502_v44, -inf }
 0x5e7   : > { %v7564_v60 = vpop.f32.mrf.mxu1 }
 0x5e9   : > { %2615 = vmax.xlane.f32.xlu1 %v2614_v52  ;;  %v7566_v41 = vpop.f32.mrf.mxu1 }
 0x5ef   : > { %v5447_v5 = vpop.f32.mrf.mxu1 }
 0x5f0   : > { %v2611_v56 = vsel %vm1242_vm1, %v5447_v5, -inf }
 0x5f1   : > { %2612 = vmax.xlane.f32.xlu0 %v2611_v56  ;;  %v2411_v2 = vpop.f32.mrf.mxu1 }
 0x5f2   : > { %v2608_v0 = vsel %vm1242_vm1, %v2411_v2, -inf }
 0x5f5   : > { %2609 = vmax.xlane.f32.xlu0 %v2608_v0 }
 0x5f7   : > { %v5461_v16 = vpop.f32.mrf.mxu1 }
 0x5f8   : > { %v2623_v51 = vsel %vm1242_vm1, %v5461_v16, -inf }
 0x5f9   : > { %2624 = vmax.xlane.f32.xlu1 %v2623_v51  ;;  %v2593_v50 = vpop.f32.mrf.mxu1 }
 0x5fa   : > { %v2620_v37 = vsel %vm1242_vm1, %v2593_v50, -inf }
 0x5fb   : > { %2621 = vmax.xlane.f32.xlu0 %v2620_v37 }
 0x60a   : > { %2692 = vrot.lane.b32.xlu1 %v7314_v54, %s6086_s19 }
 0x60e   : > { %2783 = vrot.lane.b32.xlu1 %v7391_v12, %s6086_s19 }
 0x611   : > { %2694 = vrot.lane.b32.xlu0 %v7302_v7, %s6086_s19 }
 0x612   : > { %2781 = vrot.lane.b32.xlu1 %v7405_v31, %s6086_s19 }
 0x615   : > { %2872 = vrot.lane.b32.xlu0 %v7320_v1, %s6086_s19 }
 0x616   : > { %2961 = vrot.lane.b32.xlu1 %v7411_v43, %s6086_s19 }
 0x619   : > { %2870 = vrot.lane.b32.xlu0 %v7496_v36, %s6086_s19 }
 0x61a   : > { %2959 = vrot.lane.b32.xlu1 %v7507_v57, %s6086_s19 }
 0x61d   : > { %3052 = vrot.lane.b32.xlu0 %v7102_v45, %s6085_s28 }
 0x61e   : > { %3143 = vrot.lane.b32.xlu1 %v7225_v24, %s6085_s28 }
 0x621   : > { %3050 = vrot.lane.b32.xlu0 %v7111_v32, %s6085_s28 }
 0x622   : > { %3141 = vrot.lane.b32.xlu1 %v7239_v63, %s6085_s28 }
 0x625   : > { %3046 = vrot.lane.b32.xlu0 %v7054_v35, %s6085_s28 }
 0x626   : > { %3048 = vrot.lane.b32.xlu1 %v7140_v46, %s6085_s28 }
 0x629   : > { %3234 = vrot.lane.b32.xlu0 %v7263_v47, %s6085_s28 }
 0x64f   : > { %v2607_v48 = vpop.xlane.xlu0 %2606 }
 0x650   : > { %v2627_v62 = vsub.f32 %v5440_v6, %v2607_v48 }
 0x651   : > { %v2604_v49 = vpop.xlane.xlu1 %2603 }
 0x652   : > { %v2636_v15 = vmul.f32 1.442695, %v2627_v62  ;;  %v2626_v9 = vsub.f32 %v2320_v19, %v2604_v49 }
 0x654   : > { %5856 = vpow2.f32 %v2636_v15  ;;  %v2634_v55 = vmul.f32 1.442695, %v2626_v9 }
 0x656   : > { %5858 = vpow2.f32 %v2634_v55 }
 0x661   : > { %v7602_v29 = vpop.eup %5856 }
 0x662   : > { %v2653_v39 = vsel %vm1242_vm1, %v7602_v29, 0.0 }
 0x663   : > { %v7606_v27 = vpop.eup %5858  ;;  %2654 = vadd.xlane.f32.xlu1 %v2653_v39 }
 0x664   : > { %v2650_v30 = vsel %vm1242_vm1, %v7606_v27, 0.0 }
 0x665   : > { %2651 = vadd.xlane.f32.xlu0 %v2650_v30 }
 0x66e   : > { %v2619_v21 = vpop.xlane.xlu1 %2618 }
 0x66f   : > { %v2631_v18 = vsub.f32 %v5454_v40, %v2619_v21 }
 0x671   : > { %v2644_v59 = vmul.f32 1.442695, %v2631_v18 }
 0x672   : > { %v2616_v28 = vpop.xlane.xlu1 %2615 }
 0x673   : > { %5860 = vpow2.f32 %v2644_v59  ;;  %v2630_v25 = vsub.f32 %v2502_v44, %v2616_v28 }
 0x675   : > { %v2642_v17 = vmul.f32 1.442695, %v2630_v25 }
 0x677   : > { %5862 = vpow2.f32 %v2642_v17 }
 0x67a   : > { %v2613_v6 = vpop.xlane.xlu0 %2612 }
 0x67b   : > { %v2629_v10 = vsub.f32 %v5447_v5, %v2613_v6 }
 0x67d   : > { %v2640_v19 = vmul.f32 1.442695, %v2629_v10 }
 0x67e   : > { %v2610_v61 = vpop.xlane.xlu0 %2609 }
 0x67f   : > { %5864 = vpow2.f32 %v2640_v19  ;;  %v2628_v14 = vsub.f32 %v2411_v2, %v2610_v61 }
 0x680   : > { %v7610_v52 = vpop.eup %5860 }
 0x681   : > { %v2638_v56 = vmul.f32 1.442695, %v2628_v14  ;;  %v2665_v0 = vsel %vm1242_vm1, %v7610_v52, 0.0 }
 0x682   : > { %v2625_v51 = vpop.xlane.xlu1 %2624  ;;  %2666 = vadd.xlane.f32.xlu1 %v2665_v0 }
 0x683   : > { %5866 = vpow2.f32 %v2638_v56  ;;  %v2633_v40 = vsub.f32 %v5461_v16, %v2625_v51 }
 0x684   : > { %v7614_v37 = vpop.eup %5862  ;;  %v2622_v44 = vpop.xlane.xlu0 %2621 }
 0x685   : > { %v2648_v48 = vmul.f32 1.442695, %v2633_v40  ;;  %v2632_v62 = vsub.f32 %v2593_v50, %v2622_v44  ;;  %v2662_v5 = vsel %vm1242_vm1, %v7614_v37, 0.0 }
 0x686   : > { %v2693_v49 = vpop.permute.xlu1 %2692  ;;  %2663 = vadd.xlane.f32.xlu1 %v2662_v5 }
 0x687   : > { %5868 = vpow2.f32 %v2648_v48  ;;  %v2646_v2 = vmul.f32 1.442695, %v2632_v62 }
 0x688   : > { %v2695_v15 = vpop.permute.xlu0 %2694 }
 0x689   : > { %5870 = vpow2.f32 %v2646_v2  ;;  %5462 = vmatprep.subr.mxu0 %v2695_v15 }
 0x68a   : > { %v2784_v9 = vpop.permute.xlu1 %2783  ;;  %5463 = vmatpush3.msra.mxu0 %v2695_v15 }
 0x68b   : > { %5464 = vmatprep.subr.mxu0 %v2693_v49  ;;  %5469 = vmatprep.subr.mxu1 %v2784_v9 }
 0x68c   : > { %v7618_v16 = vpop.eup %5864  ;;  %5465 = vmatpush3.msra.mxu0 %v2693_v49  ;;  %5470 = vmatpush3.msra.mxu1 %v2784_v9  ;;  %v2873_v55 = vpop.permute.xlu0 %2872 }
 0x68d   : > { %5476 = vmatprep.subr.mxu0 %v2873_v55  ;;  %v2659_v50 = vsel %vm1242_vm1, %v7618_v16, 0.0 }
 0x68e   : > { %v2782_v39 = vpop.permute.xlu1 %2781  ;;  %2660 = vadd.xlane.f32.xlu0 %v2659_v50 }
 0x68f   : > { %5471 = vmatprep.subr.mxu1 %v2782_v39 }
 0x690   : > { %v7622_v30 = vpop.eup %5866  ;;  %5472 = vmatpush3.msra.mxu1 %v2782_v39  ;;  %v2871_v6 = vpop.permute.xlu0 %2870 }
 0x691   : > { %v2656_v21 = vsel %vm1242_vm1, %v7622_v30, 0.0 }
 0x692   : > { %v7626_v18 = vpop.permute.xlu1 %2961  ;;  %2657 = vadd.xlane.f32.xlu0 %v2656_v21 }
 0x693   : > { %5483 = vmatprep.subr.mxu1 %v7626_v18 }
 0x694   : > { %v7629_v59 = vpop.eup %5868  ;;  %v3053_v19 = vpop.permute.xlu0 %3052 }
 0x695   : > { %v2671_v28 = vsel %vm1242_vm1, %v7629_v59, 0.0 }
 0x696   : > { %v7633_v25 = vpop.eup %5870  ;;  %2672 = vadd.xlane.f32.xlu1 %v2671_v28  ;;  %v7655_v10 = vpop.permute.xlu1 %2959 }
 0x697   : > { %v2668_v17 = vsel %vm1242_vm1, %v7633_v25, 0.0 }
 0x698   : > { %2669 = vadd.xlane.f32.xlu0 %v2668_v17  ;;  %v3051_v14 = vpop.permute.xlu0 %3050 }
 0x69a   : > { %v7657_v61 = vpop.permute.xlu1 %3143 }
 0x69c   : > { %v3047_v0 = vpop.permute.xlu0 %3046 }
 0x69e   : > { %v7659_v56 = vpop.permute.xlu1 %3141 }
 0x6a0   : > { %v3235_v40 = vpop.permute.xlu0 %3234 }
 0x6a2   : > { %v3049_v51 = vpop.permute.xlu1 %3048 }
 0x6a7   : > { %3232 = vrot.lane.b32.xlu1 %v7297_v38, %s6085_s28 }
 0x6ab   : > { %3139 = vrot.lane.b32.xlu1 %v7275_v23, %s6085_s28 }
 0x6ae   : > { %3137 = vrot.lane.b32.xlu0 %v7161_v8, %s6085_s28 }
 0x6af   : > { %3230 = vrot.lane.b32.xlu1 %v7311_v11, %s6085_s28 }
 0x6b2   : > { %3325 = vrot.lane.b32.xlu0 %v7368_v3, %s6085_s28 }
 0x6b3   : > { %3319 = vrot.lane.b32.xlu1 %v7393_v13, %s6085_s28 }
 0x6b6   : > { %3228 = vrot.lane.b32.xlu0 %v7290_v42, %s6085_s28 }
 0x6ba   : > { %3323 = vrot.lane.b32.xlu0 %v7386_v26, %s6085_s28 }
 0x6be   : > { %3321 = vrot.lane.b32.xlu0 %v7402_v33, %s6085_s28 }
 0x6ec   : > { %v2655_v44 = vpop.xlane.xlu1 %2654 }
 0x6ed   : > { %5872 = vrcp.f32 %v2655_v44 }
 0x6ee   : > { %v2652_v48 = vpop.xlane.xlu0 %2651 }
 0x6ef   : > { %5874 = vrcp.f32 %v2652_v48 }
 0x6fa   : > { %v5873_v62 = vpop.eup %5872 }
 0x6fb   : > { %v2683_v2 = vmul.f32 %v5873_v62, %v7602_v29 }
 0x6fc   : > { %v5875_v5 = vpop.eup %5874 }
 0x6fd   : > { %v2682_v49 = vmul.f32 %v5875_v5, %v7606_v27 }
 0x6ff   : > { %5466 = vmatprep.mubr.msk.f32.mxu0 %vm1242_vm1, %v2682_v49 }
 0x700   : > { %5467 = vmatmul.mubr.msk.f32.vlgmr.msra.gmra.mxu0 %vm1242_vm1, %v2683_v2 }
 0x701   : > { %5477 = vmatpush3.msra.mxu0 %v2873_v55 }
 0x702   : > { %5478 = vmatprep.subr.mxu0 %v2871_v6 }
 0x703   : > { %5479 = vmatpush3.msra.mxu0 %v2871_v6 }
 0x704   : > { %5490 = vmatprep.subr.msk.mxu0 %vm1023_vm0, %v3053_v19 }
 0x70b   : > { %v2667_v15 = vpop.xlane.xlu1 %2666 }
 0x70c   : > { %5876 = vrcp.f32 %v2667_v15 }
 0x70f   : > { %v2664_v9 = vpop.xlane.xlu1 %2663 }
 0x710   : > { %5878 = vrcp.f32 %v2664_v9 }
 0x717   : > { %v2661_v50 = vpop.xlane.xlu0 %2660 }
 0x718   : > { %5880 = vrcp.f32 %v2661_v50 }
 0x719   : > { %v5877_v21 = vpop.eup %5876 }
 0x71a   : > { %v2687_v17 = vmul.f32 %v5877_v21, %v7610_v52 }
 0x71b   : > { %v2658_v39 = vpop.xlane.xlu0 %2657 }
 0x71c   : > { %5882 = vrcp.f32 %v2658_v39 }
 0x71d   : > { %v5879_v27 = vpop.eup %5878 }
 0x71e   : > { %v2686_v29 = vmul.f32 %v5879_v27, %v7614_v37 }
 0x71f   : > { %v2673_v28 = vpop.xlane.xlu1 %2672 }
 0x720   : > { %5480 = vmatprep.mubr.msk.f32.mxu0 %vm1242_vm1, %v2686_v29  ;;  %5884 = vrcp.f32 %v2673_v28 }
 0x721   : > { %v2670_v55 = vpop.xlane.xlu0 %2669  ;;  %5481 = vmatmul.mubr.msk.f32.vlgmr.msra.gmra.mxu0 %vm1242_vm1, %v2687_v17 }
 0x722   : > { %5886 = vrcp.f32 %v2670_v55  ;;  %5491 = vmatpush3.xpose.msk.msra.mxu0 %vm1023_vm0, %v3053_v19  ;;  %5494 = vmatprep.mubr.msk.f32.mxu0 %vm1023_vm0, %v3047_v0 }
 0x723   : > { %5492 = vmatprep.subr.msk.mxu0 %vm1023_vm0, %v3051_v14  ;;  %v3233_v6 = vpop.permute.xlu1 %3232 }
 0x725   : > { %v3138_v44 = vpop.permute.xlu0 %3137  ;;  %v5881_v52 = vpop.eup %5880 }
 0x726   : > { %5493 = vmatpush3.xpose.msk.msra.mxu0 %vm1023_vm0, %v3051_v14  ;;  %v2685_v0 = vmul.f32 %v5881_v52, %v7618_v16 }
 0x727   : > { %5504 = vmatprep.subr.msk.mxu0 %vm1023_vm0, %v3235_v40  ;;  %v3140_v62 = vpop.permute.xlu1 %3139 }
 0x729   : > { %v5883_v37 = vpop.eup %5882  ;;  %5495 = vmatmul.mubr.msk.f32.vlgmr.msra.gmra.mxu0 %vm1023_vm0, %v3049_v51  ;;  %v3326_v48 = vpop.permute.xlu0 %3325 }
 0x72a   : > { %5505 = vmatpush3.xpose.msk.msra.mxu0 %vm1023_vm0, %v3235_v40  ;;  %v2684_v19 = vmul.f32 %v5883_v37, %v7622_v30 }
 0x72b   : > { %5506 = vmatprep.subr.msk.mxu0 %vm1023_vm0, %v3233_v6  ;;  %v3231_v30 = vpop.permute.xlu1 %3230 }
 0x72c   : > { %5473 = vmatprep.mubr.msk.f32.mxu1 %vm1242_vm1, %v2684_v19 }
 0x72d   : > { %5474 = vmatmul.mubr.msk.f32.vlgmr.msra.gmra.mxu1 %vm1242_vm1, %v2685_v0  ;;  %v3229_v14 = vpop.permute.xlu0 %3228  ;;  %v5885_v5 = vpop.eup %5884 }
 0x72e   : > { %5484 = vmatpush3.msra.mxu1 %v7626_v18  ;;  %5507 = vmatpush3.xpose.msk.msra.mxu0 %vm1023_vm0, %v3233_v6  ;;  %v2689_v40 = vmul.f32 %v5885_v5, %v7629_v59 }
 0x72f   : > { %v5887_v51 = vpop.eup %5886  ;;  %5485 = vmatprep.subr.mxu1 %v7655_v10  ;;  %5508 = vmatprep.mubr.msk.f32.mxu0 %vm1023_vm0, %v3229_v14  ;;  %v3320_v18 = vpop.permute.xlu1 %3319 }
 0x730   : > { %5486 = vmatpush3.msra.mxu1 %v7655_v10  ;;  %v2688_v16 = vmul.f32 %v5887_v51, %v7633_v25 }
 0x731   : > { %5497 = vmatprep.subr.msk.mxu1 %vm1023_vm0, %v7657_v61  ;;  %5509 = vmatmul.mubr.msk.f32.vlgmr.msra.gmra.mxu0 %vm1023_vm0, %v3231_v30  ;;  %v3324_v59 = vpop.permute.xlu0 %3323 }
 0x732   : > { %5487 = vmatprep.mubr.msk.f32.mxu1 %vm1242_vm1, %v2688_v16 }
 0x733   : > { %5488 = vmatmul.mubr.msk.f32.vlgmr.msra.gmra.mxu1 %vm1242_vm1, %v2689_v40 }
 0x734   : > { %5498 = vmatpush3.xpose.msk.msra.mxu1 %vm1023_vm0, %v7657_v61  ;;  %5501 = vmatprep.mubr.msk.f32.mxu1 %vm1023_vm0, %v3138_v44 }
 0x735   : > { %5499 = vmatprep.subr.msk.mxu1 %vm1023_vm0, %v7659_v56  ;;  %v3322_v25 = vpop.permute.xlu0 %3321 }
 0x738   : > { %5500 = vmatpush3.xpose.msk.msra.mxu1 %vm1023_vm0, %v7659_v56 }
 0x739   : > { %5511 = vmatprep.subr.msk.mxu1 %vm1023_vm0, %v3326_v48 }
 0x73b   : > { %5502 = vmatmul.mubr.msk.f32.vlgmr.msra.gmra.mxu1 %vm1023_vm0, %v3140_v62 }
 0x73c   : > { %5512 = vmatpush3.xpose.msk.msra.mxu1 %vm1023_vm0, %v3326_v48  ;;  %5515 = vmatprep.mubr.msk.f32.mxu1 %vm1023_vm0, %v3320_v18 }
 0x73d   : > { %5513 = vmatprep.subr.msk.mxu1 %vm1023_vm0, %v3324_v59 }
 0x740   : > { %5514 = vmatpush3.xpose.msk.msra.mxu1 %vm1023_vm0, %v3324_v59 }
 0x743   : > { %5516 = vmatmul.mubr.msk.f32.vlgmr.msra.gmra.mxu1 %vm1023_vm0, %v3322_v25 }
 0x7c0   : > { %v7708_v10 = vpop.f32.mrf.mxu0 }
 0x7c2   : > { %v7710_v61 = vpop.f32.mrf.mxu0 }
 0x7c3   : > { %v5748_v56 = vpack.i.bf16 %v7708_v10, %v7710_v61 }
 0x7e1   : > { %v7714_v49 = vpop.f32.mrf.mxu0 }
 0x7e3   : > { %v7716_v2 = vpop.f32.mrf.mxu0 }
 0x7e4   : > { %v5773_v15 = vpack.i.bf16 %v7714_v49, %v7716_v2 }
 0x7e9   : > { %v5496_v9 = vpop.f32.mrf.mxu0 }
 0x7ea   : > { %v3413_v50 = vsel %vm1242_vm1, %v5496_v9, -inf }
 0x7eb   : > { %3414 = vmax.xlane.f32.xlu0 %v3413_v50  ;;  %v3128_v39 = vpop.f32.mrf.mxu0 }
 0x7ec   : > { %v3410_v21 = vsel %vm1242_vm1, %v3128_v39, -inf }
 0x7ed   : > { %3411 = vmax.xlane.f32.xlu1 %v3410_v21  ;;  %v7722_v27 = vpop.f32.mrf.mxu1 }
 0x7ef   : > { %v7724_v29 = vpop.f32.mrf.mxu1 }
 0x7f0   : > { %v5758_v28 = vpack.i.bf16 %v7722_v27, %v7724_v29 }
 0x7f1   : > { %v5510_v17 = vpop.f32.mrf.mxu0 }
 0x7f2   : > { %v3425_v55 = vsel %vm1242_vm1, %v5510_v17, -inf }
 0x7f3   : > { %v7729_v6 = vpop.f32.mrf.mxu1  ;;  %3426 = vmax.xlane.f32.xlu1 %v3425_v55  ;;  %v3310_v44 = vpop.f32.mrf.mxu0 }
 0x7f4   : > { %v3422_v48 = vsel %vm1242_vm1, %v3310_v44, -inf }
 0x7f5   : > { %v7731_v52 = vpop.f32.mrf.mxu1 }
 0x7f6   : > { %v5788_v37 = vpack.i.bf16 %v7729_v6, %v7731_v52 }
 0x7f7   : > { %3423 = vmax.xlane.f32.xlu1 %v3422_v48 }
 0x7fb   : > { %v5503_v62 = vpop.f32.mrf.mxu1 }
 0x7fc   : > { %v3419_v19 = vsel %vm1242_vm1, %v5503_v62, -inf }
 0x7fd   : > { %3420 = vmax.xlane.f32.xlu0 %v3419_v19  ;;  %v3219_v0 = vpop.f32.mrf.mxu1 }
 0x7fe   : > { %v3416_v14 = vsel %vm1242_vm1, %v3219_v0, -inf }
 0x801   : > { %3417 = vmax.xlane.f32.xlu0 %v3416_v14 }
 0x803   : > { %v5517_v5 = vpop.f32.mrf.mxu1 }
 0x804   : > { %v3431_v51 = vsel %vm1242_vm1, %v5517_v5, -inf }
 0x805   : > { %3432 = vmax.xlane.f32.xlu1 %v3431_v51  ;;  %v3401_v30 = vpop.f32.mrf.mxu1 }
 0x806   : > { %v3428_v16 = vsel %vm1242_vm1, %v3401_v30, -inf }
 0x807   : > { %3429 = vmax.xlane.f32.xlu0 %v3428_v16 }
 0x816   : > { %3498 = vrot.lane.b32.xlu1 %v7314_v54, %s6085_s28 }
 0x81a   : > { %3587 = vrot.lane.b32.xlu1 %v7391_v12, %s6085_s28 }
 0x81d   : > { %3500 = vrot.lane.b32.xlu0 %v7302_v7, %s6085_s28 }
 0x81e   : > { %3585 = vrot.lane.b32.xlu1 %v7405_v31, %s6085_s28 }
 0x821   : > { %3674 = vrot.lane.b32.xlu0 %v7320_v1, %s6085_s28 }
 0x822   : > { %3761 = vrot.lane.b32.xlu1 %v7411_v43, %s6085_s28 }
 0x825   : > { %3672 = vrot.lane.b32.xlu0 %v7496_v36, %s6085_s28 }
 0x826   : > { %3759 = vrot.lane.b32.xlu1 %v7507_v57, %s6085_s28 }
 0x829   : > { %3852 = vrot.lane.b32.xlu0 %v7102_v45, %s6084_s27 }
 0x82a   : > { %3943 = vrot.lane.b32.xlu1 %v7225_v24, %s6084_s27 }
 0x82d   : > { %3850 = vrot.lane.b32.xlu0 %v7111_v32, %s6084_s27 }
 0x82e   : > { %3848 = vrot.lane.b32.xlu1 %v7140_v46, %s6084_s27 }
 0x831   : > { %3846 = vrot.lane.b32.xlu0 %v7054_v35, %s6084_s27 }
 0x832   : > { %4034 = vrot.lane.b32.xlu1 %v7263_v47, %s6084_s27 }
 0x835   : > { %3941 = vrot.lane.b32.xlu0 %v7239_v63, %s6084_s27 }
 0x874   : > { %v3415_v40 = vpop.xlane.xlu0 %3414 }
 0x875   : > { %v3435_v45 = vsub.f32 %v5496_v9, %v3415_v40 }
 0x876   : > { %v3412_v18 = vpop.xlane.xlu1 %3411 }
 0x877   : > { %v3444_v59 = vmul.f32 1.442695, %v3435_v45  ;;  %v3434_v24 = vsub.f32 %v3128_v39, %v3412_v18 }
 0x879   : > { %5888 = vpow2.f32 %v3444_v59  ;;  %v3442_v25 = vmul.f32 1.442695, %v3434_v24 }
 0x87b   : > { %5890 = vpow2.f32 %v3442_v25 }
 0x87c   : > { %v3427_v32 = vpop.xlane.xlu1 %3426 }
 0x87d   : > { %v3439_v50 = vsub.f32 %v5510_v17, %v3427_v32 }
 0x87f   : > { %v3452_v46 = vmul.f32 1.442695, %v3439_v50 }
 0x880   : > { %v3424_v21 = vpop.xlane.xlu1 %3423 }
 0x881   : > { %5892 = vpow2.f32 %v3452_v46  ;;  %v3438_v35 = vsub.f32 %v3310_v44, %v3424_v21 }
 0x883   : > { %v3450_v55 = vmul.f32 1.442695, %v3438_v35 }
 0x885   : > { %5894 = vpow2.f32 %v3450_v55 }
 0x886   : > { %v7770_v47 = vpop.eup %5888  ;;  %v3421_v48 = vpop.xlane.xlu0 %3420 }
 0x887   : > { %v3437_v63 = vsub.f32 %v5503_v62, %v3421_v48  ;;  %v3461_v9 = vsel %vm1242_vm1, %v7770_v47, 0.0 }
 0x888   : > { %v7774_v19 = vpop.eup %5890  ;;  %3462 = vadd.xlane.f32.xlu1 %v3461_v9 }
 0x889   : > { %v3448_v39 = vmul.f32 1.442695, %v3437_v63  ;;  %v3458_v17 = vsel %vm1242_vm1, %v7774_v19, 0.0 }
 0x88a   : > { %v3418_v14 = vpop.xlane.xlu0 %3417  ;;  %3459 = vadd.xlane.f32.xlu0 %v3458_v17 }
 0x88b   : > { %5896 = vpow2.f32 %v3448_v39  ;;  %v3436_v44 = vsub.f32 %v3219_v0, %v3418_v14 }
 0x88d   : > { %v3446_v51 = vmul.f32 1.442695, %v3436_v44 }
 0x88e   : > { %v7778_v16 = vpop.eup %5892  ;;  %v3433_v40 = vpop.xlane.xlu1 %3432 }
 0x88f   : > { %5898 = vpow2.f32 %v3446_v51  ;;  %v3441_v62 = vsub.f32 %v5517_v5, %v3433_v40  ;;  %v3473_v45 = vsel %vm1242_vm1, %v7778_v16, 0.0 }
 0x890   : > { %v3430_v18 = vpop.xlane.xlu0 %3429  ;;  %3474 = vadd.xlane.f32.xlu1 %v3473_v45 }
 0x891   : > { %v3456_v59 = vmul.f32 1.442695, %v3441_v62  ;;  %v3440_v24 = vsub.f32 %v3401_v30, %v3430_v18 }
 0x892   : > { %v7782_v25 = vpop.eup %5894  ;;  %v3499_v32 = vpop.permute.xlu1 %3498 }
 0x893   : > { %5900 = vpow2.f32 %v3456_v59  ;;  %v3454_v50 = vmul.f32 1.442695, %v3440_v24  ;;  %v3470_v0 = vsel %vm1242_vm1, %v7782_v25, 0.0 }
 0x894   : > { %v3501_v46 = vpop.permute.xlu0 %3500  ;;  %3471 = vadd.xlane.f32.xlu1 %v3470_v0 }
 0x895   : > { %5902 = vpow2.f32 %v3454_v50  ;;  %5518 = vmatprep.subr.mxu0 %v3501_v46 }
 0x896   : > { %v3588_v5 = vpop.permute.xlu1 %3587  ;;  %5519 = vmatpush3.msra.mxu0 %v3501_v46 }
 0x897   : > { %5520 = vmatprep.subr.mxu0 %v3499_v32  ;;  %5525 = vmatprep.subr.mxu1 %v3588_v5 }
 0x898   : > { %v7786_v21 = vpop.eup %5896  ;;  %5521 = vmatpush3.msra.mxu0 %v3499_v32  ;;  %5526 = vmatpush3.msra.mxu1 %v3588_v5  ;;  %v3675_v30 = vpop.permute.xlu0 %3674 }
 0x899   : > { %5532 = vmatprep.subr.mxu0 %v3675_v30  ;;  %v3467_v35 = vsel %vm1242_vm1, %v7786_v21, 0.0 }
 0x89a   : > { %v3586_v55 = vpop.permute.xlu1 %3585  ;;  %3468 = vadd.xlane.f32.xlu0 %v3467_v35 }
 0x89b   : > { %5527 = vmatprep.subr.mxu1 %v3586_v55 }
 0x89c   : > { %v7790_v48 = vpop.eup %5898  ;;  %5528 = vmatpush3.msra.mxu1 %v3586_v55 }
 0x89d   : > { %v3464_v63 = vsel %vm1242_vm1, %v7790_v48, 0.0 }
 0x89e   : > { %v7794_v9 = vpop.permute.xlu1 %3761  ;;  %3465 = vadd.xlane.f32.xlu0 %v3464_v63 }
 0x89f   : > { %5539 = vmatprep.subr.mxu1 %v7794_v9 }
 0x8a0   : > { %v7797_v39 = vpop.eup %5900 }
 0x8a1   : > { %v3479_v17 = vsel %vm1242_vm1, %v7797_v39, 0.0 }
 0x8a2   : > { %v7801_v14 = vpop.eup %5902  ;;  %3480 = vadd.xlane.f32.xlu1 %v3479_v17 }
 0x8a3   : > { %v3476_v44 = vsel %vm1242_vm1, %v7801_v14, 0.0 }
 0x8a4   : > { %3477 = vadd.xlane.f32.xlu0 %v3476_v44 }
 0x8b3   : > { %3939 = vrot.lane.b32.xlu1 %v7275_v23, %s6084_s27  ;;  %v3673_v23 = vpop.permute.xlu0 %3672 }
 0x8b7   : > { %4125 = vrot.lane.b32.xlu1 %v7368_v3, %s6084_s27  ;;  %v3853_v3 = vpop.permute.xlu0 %3852 }
 0x8ba   : > { %3937 = vrot.lane.b32.xlu0 %v7161_v8, %s6084_s27  ;;  %v7823_v8 = vpop.permute.xlu1 %3759 }
 0x8bb   : > { %4030 = vrot.lane.b32.xlu1 %v7311_v11, %s6084_s27  ;;  %v3851_v51 = vpop.permute.xlu0 %3850 }
 0x8be   : > { %4032 = vrot.lane.b32.xlu0 %v7297_v38, %s6084_s27  ;;  %v7825_v11 = vpop.permute.xlu1 %3943 }
 0x8bf   : > { %4119 = vrot.lane.b32.xlu1 %v7393_v13, %s6084_s27  ;;  %v3847_v40 = vpop.permute.xlu0 %3846 }
 0x8c2   : > { %4028 = vrot.lane.b32.xlu0 %v7290_v42, %s6084_s27  ;;  %v3849_v38 = vpop.permute.xlu1 %3848 }
 0x8c3   : > { %v7827_v13 = vpop.permute.xlu0 %3941 }
 0x8c6   : > { %4123 = vrot.lane.b32.xlu0 %v7386_v26, %s6084_s27  ;;  %v4035_v62 = vpop.permute.xlu1 %4034 }
 0x8ca   : > { %4121 = vrot.lane.b32.xlu0 %v7402_v33, %s6084_s27 }
 0x911   : > { %v3463_v45 = vpop.xlane.xlu1 %3462 }
 0x912   : > { %5904 = vrcp.f32 %v3463_v45 }
 0x913   : > { %v3460_v42 = vpop.xlane.xlu0 %3459 }
 0x914   : > { %5906 = vrcp.f32 %v3460_v42 }
 0x919   : > { %v3475_v26 = vpop.xlane.xlu1 %3474 }
 0x91a   : > { %5908 = vrcp.f32 %v3475_v26 }
 0x91d   : > { %v3472_v18 = vpop.xlane.xlu1 %3471 }
 0x91e   : > { %5910 = vrcp.f32 %v3472_v18 }
 0x91f   : > { %v5905_v33 = vpop.eup %5904 }
 0x920   : > { %v3491_v50 = vmul.f32 %v5905_v33, %v7770_v47 }
 0x921   : > { %v5907_v59 = vpop.eup %5906 }
 0x922   : > { %v3490_v24 = vmul.f32 %v5907_v59, %v7774_v19 }
 0x923   : > { %v3469_v32 = vpop.xlane.xlu0 %3468 }
 0x924   : > { %5522 = vmatprep.mubr.msk.f32.mxu0 %vm1242_vm1, %v3490_v24  ;;  %5912 = vrcp.f32 %v3469_v32 }
 0x925   : > { %5523 = vmatmul.mubr.msk.f32.vlgmr.msra.gmra.mxu0 %vm1242_vm1, %v3491_v50 }
 0x926   : > { %5533 = vmatpush3.msra.mxu0 %v3675_v30 }
 0x927   : > { %5534 = vmatprep.subr.mxu0 %v3673_v23  ;;  %v3466_v0 = vpop.xlane.xlu0 %3465  ;;  %v5909_v46 = vpop.eup %5908 }
 0x928   : > { %5914 = vrcp.f32 %v3466_v0  ;;  %5535 = vmatpush3.msra.mxu0 %v3673_v23  ;;  %v3495_v47 = vmul.f32 %v5909_v46, %v7778_v16 }
 0x929   : > { %5546 = vmatprep.subr.msk.mxu0 %vm1023_vm0, %v3853_v3 }
 0x92b   : > { %v5911_v5 = vpop.eup %5910  ;;  %v3481_v35 = vpop.xlane.xlu1 %3480 }
 0x92c   : > { %v3494_v19 = vmul.f32 %v5911_v5, %v7782_v25  ;;  %5916 = vrcp.f32 %v3481_v35 }
 0x92d   : > { %v3478_v55 = vpop.xlane.xlu0 %3477 }
 0x92e   : > { %5918 = vrcp.f32 %v3478_v55  ;;  %5536 = vmatprep.mubr.msk.f32.mxu0 %vm1242_vm1, %v3494_v19 }
 0x92f   : > { %5537 = vmatmul.mubr.msk.f32.vlgmr.msra.gmra.mxu0 %vm1242_vm1, %v3495_v47  ;;  %v3940_v63 = vpop.permute.xlu1 %3939 }
 0x930   : > { %5547 = vmatpush3.xpose.msk.msra.mxu0 %vm1023_vm0, %v3853_v3  ;;  %5550 = vmatprep.mubr.msk.f32.mxu0 %vm1023_vm0, %v3847_v40 }
 0x931   : > { %5548 = vmatprep.subr.msk.mxu0 %vm1023_vm0, %v3851_v51  ;;  %v3938_v30 = vpop.permute.xlu0 %3937  ;;  %v5913_v17 = vpop.eup %5912 }
 0x932   : > { %v3493_v23 = vmul.f32 %v5913_v17, %v7786_v21 }
 0x933   : > { %v4126_v3 = vpop.permute.xlu1 %4125 }
 0x934   : > { %5549 = vmatpush3.xpose.msk.msra.mxu0 %vm1023_vm0, %v3851_v51 }
 0x935   : > { %v5915_v25 = vpop.eup %5914  ;;  %5560 = vmatprep.subr.msk.mxu0 %vm1023_vm0, %v4035_v62  ;;  %v4033_v16 = vpop.permute.xlu0 %4032 }
 0x936   : > { %v3492_v44 = vmul.f32 %v5915_v25, %v7790_v48 }
 0x937   : > { %5551 = vmatmul.mubr.msk.f32.vlgmr.msra.gmra.mxu0 %vm1023_vm0, %v3849_v38 }
 0x938   : > { %5529 = vmatprep.mubr.msk.f32.mxu1 %vm1242_vm1, %v3492_v44  ;;  %5561 = vmatpush3.xpose.msk.msra.mxu0 %vm1023_vm0, %v4035_v62  ;;  %v4031_v62 = vpop.permute.xlu1 %4030 }
 0x939   : > { %5530 = vmatmul.mubr.msk.f32.vlgmr.msra.gmra.mxu1 %vm1242_vm1, %v3493_v23  ;;  %5562 = vmatprep.subr.msk.mxu0 %vm1023_vm0, %v4033_v16  ;;  %v4029_v51 = vpop.permute.xlu0 %4028  ;;  %v5917_v40 = vpop.eup %5916 }
 0x93a   : > { %5540 = vmatpush3.msra.mxu1 %v7794_v9  ;;  %5564 = vmatprep.mubr.msk.f32.mxu0 %vm1023_vm0, %v4029_v51  ;;  %v3497_v38 = vmul.f32 %v5917_v40, %v7797_v39 }
 0x93b   : > { %v5919_v48 = vpop.eup %5918  ;;  %5541 = vmatprep.subr.mxu1 %v7823_v8 }
 0x93c   : > { %5542 = vmatpush3.msra.mxu1 %v7823_v8  ;;  %5563 = vmatpush3.xpose.msk.msra.mxu0 %vm1023_vm0, %v4033_v16  ;;  %v3496_v21 = vmul.f32 %v5919_v48, %v7801_v14  ;;  %v4120_v9 = vpop.permute.xlu1 %4119 }
 0x93d   : > { %5553 = vmatprep.subr.msk.mxu1 %vm1023_vm0, %v7825_v11  ;;  %v4124_v39 = vpop.permute.xlu0 %4123 }
 0x93e   : > { %5543 = vmatprep.mubr.msk.f32.mxu1 %vm1242_vm1, %v3496_v21 }
 0x93f   : > { %5544 = vmatmul.mubr.msk.f32.vlgmr.msra.gmra.mxu1 %vm1242_vm1, %v3497_v38  ;;  %5565 = vmatmul.mubr.msk.f32.vlgmr.msra.gmra.mxu0 %vm1023_vm0, %v4031_v62 }
 0x940   : > { %5554 = vmatpush3.xpose.msk.msra.mxu1 %vm1023_vm0, %v7825_v11  ;;  %5557 = vmatprep.mubr.msk.f32.mxu1 %vm1023_vm0, %v3938_v30 }
 0x941   : > { %5555 = vmatprep.subr.msk.mxu1 %vm1023_vm0, %v7827_v13  ;;  %v4122_v14 = vpop.permute.xlu0 %4121 }
 0x944   : > { %5556 = vmatpush3.xpose.msk.msra.mxu1 %vm1023_vm0, %v7827_v13 }
 0x945   : > { %5567 = vmatprep.subr.msk.mxu1 %vm1023_vm0, %v4126_v3 }
 0x947   : > { %5558 = vmatmul.mubr.msk.f32.vlgmr.msra.gmra.mxu1 %vm1023_vm0, %v3940_v63 }
 0x948   : > { %5568 = vmatpush3.xpose.msk.msra.mxu1 %vm1023_vm0, %v4126_v3  ;;  %5571 = vmatprep.mubr.msk.f32.mxu1 %vm1023_vm0, %v4120_v9 }
 0x949   : > { %5569 = vmatprep.subr.msk.mxu1 %vm1023_vm0, %v4124_v39 }
 0x94c   : > { %5570 = vmatpush3.xpose.msk.msra.mxu1 %vm1023_vm0, %v4124_v39 }
 0x94f   : > { %5572 = vmatmul.mubr.msk.f32.vlgmr.msra.gmra.mxu1 %vm1023_vm0, %v4122_v14 }
 0x9e5   : > { %v7876_v8 = vpop.f32.mrf.mxu0 }
 0x9e7   : > { %v7878_v11 = vpop.f32.mrf.mxu0 }
 0x9e8   : > { %v5753_v13 = vpack.i.bf16 %v7876_v8, %v7878_v11 }
 0x9ef   : > { %v7882_v45 = vpop.f32.mrf.mxu0 }
 0x9f1   : > { %v7884_v42 = vpop.f32.mrf.mxu0 }
 0x9f2   : > { %v5778_v26 = vpack.i.bf16 %v7882_v45, %v7884_v42 }
 0x9f7   : > { %v5552_v18 = vpop.f32.mrf.mxu0 }
 0x9f8   : > { %v4213_v33 = vsel %vm1242_vm1, %v5552_v18, -inf }
 0x9f9   : > { %4214 = vmax.xlane.f32.xlu0 %v4213_v33  ;;  %v7889_v59 = vpop.f32.mrf.mxu1  ;;  %v3928_v24 = vpop.f32.mrf.mxu0 }
 0x9fa   : > { %v4210_v32 = vsel %vm1242_vm1, %v3928_v24, -inf }
 0x9fb   : > { %4211 = vmax.xlane.f32.xlu1 %v4210_v32  ;;  %v7892_v50 = vpop.f32.mrf.mxu1 }
 0x9fc   : > { %v5763_v0 = vpack.i.bf16 %v7889_v59, %v7892_v50 }
 0x9ff   : > { %v7896_v46 = vpop.f32.mrf.mxu1  ;;  %v5566_v19 = vpop.f32.mrf.mxu0 }
 0xa00   : > { %v4225_v25 = vsel %vm1242_vm1, %v5566_v19, -inf }
 0xa01   : > { %v7898_v5 = vpop.f32.mrf.mxu1  ;;  %v4110_v17 = vpop.f32.mrf.mxu0 }
 0xa02   : > { %v5798_v35 = vpack.i.bf16 %v7896_v46, %v7898_v5  ;;  %v4222_v16 = vsel %vm1242_vm1, %v4110_v17, -inf }
 0xa07   : > { %v5559_v55 = vpop.f32.mrf.mxu1 }
 0xa08   : > { %v4219_v47 = vsel %vm1242_vm1, %v5559_v55, -inf }
 0xa09   : > { %4220 = vmax.xlane.f32.xlu1 %v4219_v47  ;;  %v4019_v30 = vpop.f32.mrf.mxu1 }
 0xa0a   : > { %v4216_v63 = vsel %vm1242_vm1, %v4019_v30, -inf }
 0xa0b   : > { %4217 = vmax.xlane.f32.xlu0 %v4216_v63 }
 0xa0d   : > { %4226 = vmax.xlane.f32.xlu1 %v4225_v25 }
 0xa0f   : > { %4223 = vmax.xlane.f32.xlu0 %v4222_v16  ;;  %v5573_v44 = vpop.f32.mrf.mxu1 }
 0xa10   : > { %v4231_v23 = vsel %vm1242_vm1, %v5573_v44, -inf }
 0xa11   : > { %4232 = vmax.xlane.f32.xlu1 %v4231_v23  ;;  %v4201_v3 = vpop.f32.mrf.mxu1 }
 0xa12   : > { %v4228_v51 = vsel %vm1242_vm1, %v4201_v3, -inf }
 0xa13   : > { %4229 = vmax.xlane.f32.xlu0 %v4228_v51 }
 0xa22   : > { %4298 = vrot.lane.b32.xlu1 %v7314_v54, %s6084_s27 }
 0xa26   : > { %4387 = vrot.lane.b32.xlu1 %v7391_v12, %s6084_s27 }
 0xa29   : > { %4300 = vrot.lane.b32.xlu0 %v7302_v7, %s6084_s27 }
 0xa2a   : > { %4474 = vrot.lane.b32.xlu1 %v7320_v1, %s6084_s27 }
 0xa2d   : > { %4385 = vrot.lane.b32.xlu0 %v7405_v31, %s6084_s27 }
 0xa31   : > { %4472 = vrot.lane.b32.xlu0 %v7496_v36, %s6084_s27 }
 0xa82   : > { %v4215_v40 = vpop.xlane.xlu0 %4214 }
 0xa83   : > { %v4235_v48 = vsub.f32 %v5552_v18, %v4215_v40 }
 0xa84   : > { %v4212_v21 = vpop.xlane.xlu1 %4211 }
 0xa85   : > { %v4244_v38 = vmul.f32 1.442695, %v4235_v48  ;;  %v4234_v54 = vsub.f32 %v3928_v24, %v4212_v21 }
 0xa87   : > { %5920 = vpow2.f32 %v4244_v38  ;;  %v4242_v62 = vmul.f32 1.442695, %v4234_v54 }
 0xa89   : > { %5922 = vpow2.f32 %v4242_v62 }
 0xa92   : > { %v4221_v12 = vpop.xlane.xlu1 %4220 }
 0xa93   : > { %v4237_v9 = vsub.f32 %v5559_v55, %v4221_v12 }
 0xa94   : > { %v7920_v7 = vpop.eup %5920  ;;  %v4218_v39 = vpop.xlane.xlu0 %4217 }
 0xa95   : > { %v4248_v1 = vmul.f32 1.442695, %v4237_v9  ;;  %v4236_v14 = vsub.f32 %v4019_v30, %v4218_v39  ;;  %v4261_v31 = vsel %vm1242_vm1, %v7920_v7, 0.0 }
 0xa96   : > { %v7924_v33 = vpop.eup %5922  ;;  %v4227_v36 = vpop.xlane.xlu1 %4226  ;;  %4262 = vadd.xlane.f32.xlu1 %v4261_v31 }
 0xa97   : > { %5924 = vpow2.f32 %v4248_v1  ;;  %v4246_v18 = vmul.f32 1.442695, %v4236_v14  ;;  %v4239_v24 = vsub.f32 %v5566_v19, %v4227_v36  ;;  %v4258_v32 = vsel %vm1242_vm1, %v7924_v33, 0.0 }
 0xa98   : > { %v4224_v47 = vpop.xlane.xlu0 %4223  ;;  %4259 = vadd.xlane.f32.xlu0 %v4258_v32 }
 0xa99   : > { %5926 = vpow2.f32 %v4246_v18  ;;  %v4252_v55 = vmul.f32 1.442695, %v4239_v24  ;;  %v4238_v63 = vsub.f32 %v4110_v17, %v4224_v47 }
 0xa9a   : > { %v4233_v25 = vpop.xlane.xlu1 %4232 }
 0xa9b   : > { %5928 = vpow2.f32 %v4252_v55  ;;  %v4250_v30 = vmul.f32 1.442695, %v4238_v63  ;;  %v4241_v16 = vsub.f32 %v5573_v44, %v4233_v25 }
 0xa9c   : > { %v4230_v23 = vpop.xlane.xlu0 %4229 }
 0xa9d   : > { %5930 = vpow2.f32 %v4250_v30  ;;  %v4256_v51 = vmul.f32 1.442695, %v4241_v16  ;;  %v4240_v40 = vsub.f32 %v4201_v3, %v4230_v23 }
 0xa9e   : > { %v4299_v48 = vpop.permute.xlu1 %4298 }
 0xa9f   : > { %5932 = vpow2.f32 %v4256_v51  ;;  %v4254_v21 = vmul.f32 1.442695, %v4240_v40  ;;  %v4781_v51 = vld [vmem:[#allocation5 + $0x78] sm:$0xff]  ;;  %v4780_v40 = vld [vmem:[#allocation5 + $0x70] sm:$0xff] }
 0xaa0   : > { %v4301_v19 = vpop.permute.xlu0 %4300 }
 0xaa1   : > { %5934 = vpow2.f32 %v4254_v21  ;;  %5574 = vmatprep.subr.mxu0 %v4301_v19  ;;  %v4778_v21 = vld [vmem:[#allocation5 + $0x60] sm:$0xff] }
 0xaa2   : > { %v4388_v38 = vpop.permute.xlu1 %4387  ;;  %5575 = vmatpush3.msra.mxu0 %v4301_v19  ;;  %v4777_v19 = vld [vmem:[#allocation5 + $0x58] sm:$0xff] }
 0xaa3   : > { %5576 = vmatprep.subr.mxu0 %v4299_v48  ;;  %5581 = vmatprep.subr.mxu1 %v4388_v38 }
 0xaa4   : > { %v7928_v54 = vpop.eup %5924  ;;  %5577 = vmatpush3.msra.mxu0 %v4299_v48  ;;  %5582 = vmatpush3.msra.mxu1 %v4388_v38  ;;  %v4386_v17 = vpop.permute.xlu0 %4385  ;;  %v4779_v48 = vld [vmem:[#allocation5 + $0x68] sm:$0xff]  ;;  %v4776_v38 = vld [vmem:[#allocation5 + $0x50] sm:$0xff] }
 0xaa5   : > { %5583 = vmatprep.subr.mxu1 %v4386_v17  ;;  %v4267_v44 = vsel %vm1242_vm1, %v7928_v54, 0.0 }
 0xaa6   : > { %v5927_v3 = vpop.eup %5926  ;;  %v4475_v62 = vpop.permute.xlu1 %4474  ;;  %4268 = vadd.xlane.f32.xlu1 %v4267_v44  ;;  %5584 = vmatpush3.msra.mxu1 %v4386_v17  ;;  %v4774_v17 = vld [vmem:[#allocation5 + $0x40] sm:$0xff]  ;;  %v4773_v44 = vld [vmem:[#allocation5 + $0x38] sm:$0xff] }
 0xaa7   : > { %5588 = vmatprep.subr.mxu0 %v4475_v62  ;;  %v4264_v12 = vsel %vm1242_vm1, %v5927_v3, 0.0 }
 0xaa8   : > { %v5929_v9 = vpop.eup %5928  ;;  %4265 = vadd.xlane.f32.xlu0 %v4264_v12  ;;  %v4770_v12 = vld [vmem:[#allocation5 + $0x20] sm:$0xff] }
 0xaa9   : > { %v4273_v39 = vsel %vm1242_vm1, %v5929_v9, 0.0 }
 0xaaa   : > { %v5931_v1 = vpop.eup %5930  ;;  %4274 = vadd.xlane.f32.xlu1 %v4273_v39  ;;  %v4768_v39 = vld [vmem:[#allocation5 + $0x10] sm:$0xff] }
 0xaab   : > { %v4270_v14 = vsel %vm1242_vm1, %v5931_v1, 0.0 }
 0xaac   : > { %v5933_v31 = vpop.eup %5932  ;;  %4271 = vadd.xlane.f32.xlu0 %v4270_v14  ;;  %v4766_v14 = vld [vmem:[#allocation5] sm:$0xff] }
 0xaad   : > { %v4279_v36 = vsel %vm1242_vm1, %v5933_v31, 0.0 }
 0xaae   : > { %v5935_v18 = vpop.eup %5934  ;;  %4280 = vadd.xlane.f32.xlu1 %v4279_v36 }
 0xaaf   : > { %v4276_v24 = vsel %vm1242_vm1, %v5935_v18, 0.0 }
 0xab0   : > { %4277 = vadd.xlane.f32.xlu0 %v4276_v24 }
 0xabf   : > { %4561 = vrot.lane.b32.xlu1 %v7411_v43, %s6084_s27  ;;  %v4473_v43 = vpop.permute.xlu0 %4472 }
 0xac3   : > { %5749 = vrot.lane.b32.xlu1 %v5748_v56, %s6084_s27 }
 0xac6   : > { %4559 = vrot.lane.b32.xlu0 %v7507_v57, %s6084_s27 }
 0xac7   : > { %5764 = vrot.lane.b32.xlu1 %v5763_v0, %s6085_s28 }
 0xaca   : > { %5754 = vrot.lane.b32.xlu0 %v5753_v13, %s6085_s28 }
 0xace   : > { %5759 = vrot.lane.b32.xlu0 %v5758_v28, %s6084_s27 }
 0xad2   : > { %5779 = vrot.lane.b32.xlu0 %v5778_v26, %s6085_s28 }
 0xb1f   : > { %v4263_v57 = vpop.xlane.xlu1 %4262 }
 0xb20   : > { %5936 = vrcp.f32 %v4263_v57 }
 0xb21   : > { %v4260_v10 = vpop.xlane.xlu0 %4259 }
 0xb22   : > { %5938 = vrcp.f32 %v4260_v10 }
 0xb2d   : > { %v5937_v61 = vpop.eup %5936 }
 0xb2e   : > { %v4291_v27 = vmul.f32 %v5937_v61, %v7920_v7 }
 0xb2f   : > { %v5939_v56 = vpop.eup %5938  ;;  %v4269_v59 = vpop.xlane.xlu1 %4268 }
 0xb30   : > { %v4290_v8 = vmul.f32 %v5939_v56, %v7924_v33  ;;  %5940 = vrcp.f32 %v4269_v59 }
 0xb31   : > { %v4266_v11 = vpop.xlane.xlu0 %4265 }
 0xb32   : > { %5942 = vrcp.f32 %v4266_v11  ;;  %5578 = vmatprep.mubr.msk.f32.mxu0 %vm1242_vm1, %v4290_v8 }
 0xb33   : > { %v4275_v29 = vpop.xlane.xlu1 %4274  ;;  %5579 = vmatmul.mubr.msk.f32.vlgmr.msra.gmra.mxu0 %vm1242_vm1, %v4291_v27 }
 0xb34   : > { %5589 = vmatpush3.msra.mxu0 %v4475_v62  ;;  %5944 = vrcp.f32 %v4275_v29  ;;  %v4771_v62 = vld [vmem:[#allocation5 + $0x28] sm:$0xff] }
 0xb35   : > { %5590 = vmatprep.subr.mxu0 %v4473_v43  ;;  %v4272_v28 = vpop.xlane.xlu0 %4271 }
 0xb36   : > { %5946 = vrcp.f32 %v4272_v28  ;;  %5591 = vmatpush3.msra.mxu0 %v4473_v43 }
 0xb37   : > { %v4281_v13 = vpop.xlane.xlu1 %4280  ;;  %5602 = vmatprep.subr.mxu0 %v4781_v51 }
 0xb38   : > { %5948 = vrcp.f32 %v4281_v13 }
 0xb39   : > { %v4278_v45 = vpop.xlane.xlu0 %4277 }
 0xb3a   : > { %5950 = vrcp.f32 %v4278_v45 }
 0xb3b   : > { %v4562_v42 = vpop.permute.xlu1 %4561 }
 0xb3c   : > { %5595 = vmatprep.subr.mxu1 %v4562_v42 }
 0xb3d   : > { %v5941_v26 = vpop.eup %5940  ;;  %v4560_v47 = vpop.permute.xlu0 %4559 }
 0xb3e   : > { %v4293_v7 = vmul.f32 %v5941_v26, %v7928_v54  ;;  %v4775_v54 = vld [vmem:[#allocation5 + $0x48] sm:$0xff] }
 0xb3f   : > { %v5943_v50 = vpop.eup %5942  ;;  %v5750_v49 = vpop.permute.xlu1 %5749 }
 0xb40   : > { %v4292_v0 = vmul.f32 %v5943_v50, %v5927_v3  ;;  %v4772_v3 = vld [vmem:[#allocation5 + $0x30] sm:$0xff]  ;;  %v5752_v2 = vunpack.i.h.bf16 %v5750_v49 }
 0xb41   : > { %v5945_v33 = vpop.eup %5944  ;;  %v5755_v27 = vpop.permute.xlu0 %5754 }
 0xb42   : > { %5585 = vmatprep.mubr.msk.f32.mxu1 %vm1242_vm1, %v4292_v0  ;;  %v4295_v63 = vmul.f32 %v5945_v33, %v5929_v9  ;;  %v4769_v9 = vld [vmem:[#allocation5 + $0x18] sm:$0xff]  ;;  %v5757_v28 = vunpack.i.h.bf16 %v5755_v27  ;;  %v5756_v13 = vunpack.i.l.bf16 %v5755_v27  ;;  %v4743_v6 = vsel %vm1023_vm0, %v7548_v22, %v5752_v2 }
 0xb43   : > { %v5947_v32 = vpop.eup %5946  ;;  %5586 = vmatmul.mubr.msk.f32.vlgmr.msra.gmra.mxu1 %vm1242_vm1, %v4293_v7  ;;  %v5765_v29 = vpop.permute.xlu1 %5764 }
 0xb44   : > { %5596 = vmatpush3.msra.mxu1 %v4562_v42  ;;  %v4294_v55 = vmul.f32 %v5947_v32, %v5931_v1  ;;  %v4767_v1 = vld [vmem:[#allocation5 + $0x8] sm:$0xff]  ;;  %v4751_v5 = vsel %vm1032_vm2, %v4743_v6, %v5757_v28 }
 0xb45   : > { %5597 = vmatprep.subr.mxu1 %v4560_v47  ;;  %v5949_v25 = vpop.eup %5948  ;;  %v5760_v50 = vpop.permute.xlu0 %5759 }
 0xb46   : > { %5598 = vmatpush3.msra.mxu1 %v4560_v47  ;;  %5592 = vmatprep.mubr.msk.f32.mxu0 %vm1242_vm1, %v4294_v55  ;;  %v4297_v23 = vmul.f32 %v5949_v25, %v5933_v31  ;;  %v5762_v0 = vunpack.i.h.bf16 %v5760_v50  ;;  %v5761_v7 = vunpack.i.l.bf16 %v5760_v50  ;;  %v5766_v25 = vunpack.i.l.bf16 %v5765_v29 }
 0xb47   : > { %v5951_v30 = vpop.eup %5950  ;;  %5593 = vmatmul.mubr.msk.f32.vlgmr.msra.gmra.mxu0 %vm1242_vm1, %v4295_v63  ;;  %v5767_v63 = vunpack.i.h.bf16 %v5765_v29 }
 0xb48   : > { %v4296_v16 = vmul.f32 %v5951_v30, %v5935_v18  ;;  %5603 = vmatpush3.msra.mxu0 %v4781_v51  ;;  %v4744_v47 = vsel %vm1023_vm0, %v7561_v58, %v5761_v7  ;;  %v4745_v55 = vsel %vm1023_vm0, %v7558_v34, %v5762_v0 }
 0xb49   : > { %5604 = vmatprep.subr.mxu0 %v4780_v40  ;;  %v5780_v22 = vpop.permute.xlu0 %5779  ;;  %v4752_v51 = vsel %vm1032_vm2, %v4744_v47, %v5766_v25 }
 0xb4a   : > { %5599 = vmatprep.mubr.msk.f32.mxu1 %vm1242_vm1, %v4296_v16  ;;  %5605 = vmatpush3.msra.mxu0 %v4780_v40  ;;  %v4753_v40 = vsel %vm1032_vm2, %v4745_v55, %v5767_v63  ;;  %v5782_v34 = vunpack.i.h.bf16 %v5780_v22 }
 0xb4b   : > { %5600 = vmatmul.mubr.msk.f32.vlgmr.msra.gmra.mxu1 %vm1242_vm1, %v4297_v23  ;;  %5606 = vmatprep.subr.mxu0 %v4779_v48 }
 0xb4c   : > { %5607 = vmatpush3.msra.mxu0 %v4779_v48 }
 0xb4d   : > { %5608 = vmatprep.subr.mxu0 %v4778_v21 }
 0xb4e   : > { %5609 = vmatpush3.msra.mxu0 %v4778_v21 }
 0xb4f   : > { %5610 = vmatprep.subr.mxu0 %v4777_v19 }
 0xb50   : > { %5611 = vmatpush3.msra.mxu0 %v4777_v19 }
 0xb51   : > { %5612 = vmatprep.subr.mxu0 %v4776_v38 }
 0xb52   : > { %5613 = vmatpush3.msra.mxu0 %v4776_v38  ;;  %v5781_v38 = vunpack.i.l.bf16 %v5780_v22 }
 0xb53   : > { %5614 = vmatprep.subr.mxu0 %v4775_v54 }
 0xb54   : > { %5615 = vmatpush3.msra.mxu0 %v4775_v54 }
 0xb55   : > { %5616 = vmatprep.subr.mxu0 %v4774_v17 }
 0xb56   : > { %5617 = vmatpush3.msra.mxu0 %v4774_v17 }
 0xb57   : > { %5618 = vmatprep.subr.mxu0 %v4773_v44 }
 0xb58   : > { %5619 = vmatpush3.msra.mxu0 %v4773_v44 }
 0xb59   : > { %5620 = vmatprep.subr.mxu0 %v4772_v3 }
 0xb5a   : > { %5621 = vmatpush3.msra.mxu0 %v4772_v3 }
 0xb5b   : > { %5622 = vmatprep.subr.mxu0 %v4771_v62 }
 0xb5c   : > { %5623 = vmatpush3.msra.mxu0 %v4771_v62 }
 0xb5d   : > { %5624 = vmatprep.subr.mxu0 %v4770_v12 }
 0xb5e   : > { %5625 = vmatpush3.msra.mxu0 %v4770_v12 }
 0xb5f   : > { %5626 = vmatprep.subr.mxu0 %v4769_v9 }
 0xb60   : > { %5627 = vmatpush3.msra.mxu0 %v4769_v9 }
 0xb61   : > { %5628 = vmatprep.subr.mxu0 %v4768_v39 }
 0xb62   : > { %5629 = vmatpush3.msra.mxu0 %v4768_v39 }
 0xb63   : > { %5630 = vmatprep.subr.mxu0 %v4767_v1 }
 0xb64   : > { %5631 = vmatpush3.msra.mxu0 %v4767_v1 }
 0xb65   : > { %5632 = vmatprep.subr.mxu0 %v4766_v14 }
 0xb66   : > { %5633 = vmatpush3.msra.mxu0 %v4766_v14 }
 0xbf3   : > { %v5580_v31 = vpop.f32.mrf.mxu0 }
 0xbf5   : > { %v4376_v36 = vpop.f32.mrf.mxu0 }
 0xbf6   : > { %v5768_v18 = vpack.i.bf16 %v5580_v31, %v4376_v36 }
 0xbf8   : > { %5769 = vrot.lane.b32.xlu1 %v5768_v18, %s6086_s19 }
 0xbfc   : > { %5774 = vrot.lane.b32.xlu1 %v5773_v15, %s6084_s27  ;;  %v5751_v15 = vunpack.i.l.bf16 %v5750_v49 }
 0xbfe   : > { %v4742_v52 = vsel %vm1023_vm0, %v7550_v4, %v5751_v15 }
 0xbff   : > { %v4750_v46 = vsel %vm1032_vm2, %v4742_v52, %v5756_v13 }
 0xc03   : > { %v5587_v24 = vpop.f32.mrf.mxu1 }
 0xc05   : > { %v4463_v43 = vpop.f32.mrf.mxu1 }
 0xc06   : > { %v5783_v57 = vpack.i.bf16 %v5587_v24, %v4463_v43 }
 0xc07   : > { %v5594_v10 = vpop.f32.mrf.mxu0 }
 0xc08   : > { %5784 = vrot.lane.b32.xlu0 %v5783_v57, %s6086_s19 }
 0xc09   : > { %v4550_v61 = vpop.f32.mrf.mxu0 }
 0xc0a   : > { %v5793_v56 = vpack.i.bf16 %v5594_v10, %v4550_v61 }
 0xc0b   : > { %v5601_v59 = vpop.f32.mrf.mxu1 }
 0xc0c   : > { %5789 = vrot.lane.b32.xlu0 %v5788_v37, %s6084_s27  ;;  %5794 = vrot.lane.b32.xlu1 %v5793_v56, %s6086_s19 }
 0xc0d   : > { %v4637_v8 = vpop.f32.mrf.mxu1 }
 0xc0e   : > { %v5803_v11 = vpack.i.bf16 %v5601_v59, %v4637_v8  ;;  %v5150_v8 = vld [vmem:[%s8083_s9] ss:$0 sm:$0xff] }
 0xc10   : > { %5799 = vrot.lane.b32.xlu1 %v5798_v35, %s6085_s28  ;;  %5804 = vrot.lane.b32.xlu0 %v5803_v11, %s6086_s19  ;;  %s440_s28 = scalar_lea.vmem [#allocation7], %s5043_s8 }
 0xc11   : > { %s4916_s19 = sshll.u32 %s440_s28, 4  ;;  %s8026_s19 = int_to_ptr.vmem [resolvable:$true] %s4916_s19 }
 0xc12   : > { %s6008_s13 = scalar_lea.vmem %s8026_s19, 1024  ;;  %p6015_p12 = scmp.lt.s32.totalorder %s8026_s19, %s6013_s29 }
 0xc13   : > { %p6009_p11 = scmp.ne.s32.totalorder %s8026_s19, %s6008_s13  ;;  %p6016_p13 = scmp.lt.s32.totalorder %s6014_s20, %s6008_s13 }
 0xc15   : > { %p6010_p9 = pnand %p6009_p11, %p8174_p7  ;;  %p6017_p0 = por %p6016_p13, %p6015_p12 }
 0xc17   : > { %p6011_p10 = pneg %p6010_p9 }
 0xc19   : > { %p6018_p5 = pnand %p6017_p0, %p6011_p10 }
 0xc6a   : > { %v5770_v37 = vpop.permute.xlu1 %5769 }
 0xc6b   : > { %v5772_v45 = vunpack.i.h.bf16 %v5770_v37  ;;  %v5771_v42 = vunpack.i.l.bf16 %v5770_v37 }
 0xc6d   : > { %v4758_v35 = vsel %vm1041_vm4, %v4750_v46, %v5771_v42  ;;  %v4759_v26 = vsel %vm1041_vm4, %v4751_v5, %v5772_v45 }
 0xc6e   : > { %5634 = vmatprep.mubr.f32.mxu0 %v4758_v35  ;;  %v5775_v33 = vpop.permute.xlu1 %5774 }
 0xc6f   : > { %5635 = vmatmul.mubr.f32.vlgmr.msra.gmra.mxu0 %v4759_v26  ;;  %v5777_v32 = vunpack.i.h.bf16 %v5775_v33  ;;  %v5776_v4 = vunpack.i.l.bf16 %v5775_v33 }
 0xc71   : > { %v4746_v19 = vsel %vm1023_vm0, %v7554_v20, %v5776_v4  ;;  %v4747_v58 = vsel %vm1023_vm0, %v7552_v53, %v5777_v32 }
 0xc72   : > { %v4754_v9 = vsel %vm1032_vm2, %v4746_v19, %v5781_v38  ;;  %v4755_v39 = vsel %vm1032_vm2, %v4747_v58, %v5782_v34 }
 0xc7a   : > { %v5785_v30 = vpop.permute.xlu0 %5784 }
 0xc7b   : > { %v5787_v16 = vunpack.i.h.bf16 %v5785_v30  ;;  %v5786_v23 = vunpack.i.l.bf16 %v5785_v30 }
 0xc7d   : > { %v4760_v48 = vsel %vm1041_vm4, %v4752_v51, %v5786_v23  ;;  %v4761_v21 = vsel %vm1041_vm4, %v4753_v40, %v5787_v16 }
 0xc7e   : > { %v5795_v54 = vpop.permute.xlu1 %5794  ;;  %v5790_v17 = vpop.permute.xlu0 %5789  ;;  %5637 = vmatprep.mubr.f32.mxu0 %v4760_v48 }
 0xc7f   : > { %v5797_v44 = vunpack.i.h.bf16 %v5795_v54  ;;  %v5796_v3 = vunpack.i.l.bf16 %v5795_v54  ;;  %5638 = vmatmul.mubr.f32.gmra.mxu0 %v4761_v21  ;;  %v5792_v62 = vunpack.i.h.bf16 %v5790_v17  ;;  %v5791_v12 = vunpack.i.l.bf16 %v5790_v17 }
 0xc81   : > { %v4762_v1 = vsel %vm1041_vm4, %v4754_v9, %v5796_v3  ;;  %v4763_v20 = vsel %vm1041_vm4, %v4755_v39, %v5797_v44  ;;  %v4748_v43 = vsel %vm1023_vm0, %v7566_v41, %v5791_v12  ;;  %v4749_v57 = vsel %vm1023_vm0, %v7564_v60, %v5792_v62 }
 0xc82   : > { %v5800_v14 = vpop.permute.xlu1 %5799  ;;  %v5805_v53 = vpop.permute.xlu0 %5804  ;;  %5640 = vmatprep.mubr.f32.mxu0 %v4762_v1 }
 0xc83   : > { %v5802_v31 = vunpack.i.h.bf16 %v5800_v14  ;;  %v5801_v36 = vunpack.i.l.bf16 %v5800_v14  ;;  %v5807_v18 = vunpack.i.h.bf16 %v5805_v53  ;;  %v5806_v24 = vunpack.i.l.bf16 %v5805_v53  ;;  %5641 = vmatmul.mubr.f32.gmra.mxu0 %v4763_v20 }
 0xc85   : > { %v4756_v10 = vsel %vm1032_vm2, %v4748_v43, %v5801_v36  ;;  %v4757_v61 = vsel %vm1032_vm2, %v4749_v57, %v5802_v31 }
 0xc86   : > { %v4764_v56 = vsel %vm1041_vm4, %v4756_v10, %v5806_v24  ;;  %v4765_v59 = vsel %vm1041_vm4, %v4757_v61, %v5807_v18 }
 0xc87   : > { %5643 = vmatprep.mubr.f32.mxu0 %v4764_v56 }
 0xc88   : > { %5644 = vmatmul.mubr.f32.gmra.mxu0 %v4765_v59 }
 0xd2f   : > { %v5636_v11 = vpop.f32.mrf.mxu0 }
 0xd30   : > { %v4861_v49 = vadd.f32 %v5636_v11, %v5150_v8 }
 0xd31   : > { %v4855_v41 = vpop.f32.mrf.mxu0 }
 0xd32   : > { %4895 = vst [vmem:[%s440_s28 + $0x8] sm:$0xff] %v4861_v49  ;;  %v4856_v60 = vadd.f32 %v5150_v8, %v4855_v41 }
 0xd34   : > { %4894 = vst [vmem:[%s440_s28] sm:$0xff] %v4856_v60 }
 0xd3f   : > { %v5639_v2 = vpop.f32.mrf.mxu0 }
 0xd40   : > { %v4871_v15 = vadd.f32 %v5639_v2, %v5150_v8 }
 0xd41   : > { %v4865_v27 = vpop.f32.mrf.mxu0 }
 0xd42   : > { %4897 = vst [vmem:[%s440_s28 + $0x18] sm:$0xff] %v4871_v15  ;;  %v4866_v29 = vadd.f32 %v5150_v8, %v4865_v27 }
 0xd43   : > { %v5642_v28 = vpop.f32.mrf.mxu0 }
 0xd44   : > { %4896 = vst [vmem:[%s440_s28 + $0x10] sm:$0xff] %v4866_v29  ;;  %v4881_v13 = vadd.f32 %v5642_v28, %v5150_v8 }
 0xd45   : > { %v4875_v6 = vpop.f32.mrf.mxu0 }
 0xd46   : > { %4899 = vst [vmem:[%s440_s28 + $0x28] sm:$0xff] %v4881_v13  ;;  %v4876_v52 = vadd.f32 %v5150_v8, %v4875_v6 }
 0xd48   : > { %4898 = vst [vmem:[%s440_s28 + $0x20] sm:$0xff] %v4876_v52  ;;  %v5645_v37 = vpop.f32.mrf.mxu0 }
 0xd49   : > { %v4891_v45 = vadd.f32 %v5645_v37, %v5150_v8 }
 0xd4a   : > { %v4885_v42 = vpop.f32.mrf.mxu0 }
 0xd4b   : > { %4901 = vst [vmem:[%s440_s28 + $0x38] sm:$0xff] %v4891_v45  ;;  %v4886_v46 = vadd.f32 %v5150_v8, %v4885_v42 }
 0xd4d   : > { %4900 = vst [vmem:[%s440_s28 + $0x30] sm:$0xff] %v4886_v46 }
 0xd4e   : > { %6021 = shalt.err (!%p6018_p5)
}
 0xd4f   : > { %s6022_s21 = scalar_lea.hbm %s8031_s26, 1024  ;;  %s6026_s27 = scalar_lea.hbm %s8084_s10, 2048 }
 0xd50   : > { %p6023_p2 = scmp.ne.s32.totalorder %s8031_s26, %s6022_s21  ;;  %p6027_p6 = scmp.lt.s32.totalorder %s8031_s26, %s8084_s10 }
 0xd51   : > { %p6028_p8 = scmp.lt.s32.totalorder %s6026_s27, %s6022_s21 }
 0xd52   : > { %p6024_p1 = pnand %p6023_p2, %p8174_p7 }
 0xd53   : > { %p6029_p3 = por %p6028_p8, %p6027_p6 }
 0xd54   : > { %p6025_p4 = pneg %p6024_p1 }
 0xd56   : > { %p6030_p11 = pnand %p6029_p3, %p6025_p4 }
 0xd58   : > { %6033 = shalt.err (!%p6030_p11)
}
 0xd59   : > { %s6090_s8 = smov 128   ;;  %s6091_s23 = smov 8  }
 0xd5a   : > { %5684 = dma.vmem_to_hbm [thread:$0]  (%p8174_p7), %s8026_s19, 1024, %s8031_s26, %s4903_s24, %s6090_s8, %s6090_s8, %s6091_s23  }
 0xd5b PF: > { %s8175_s13 = sld [smem:[#allocation11_spill]]  ;;  %p8178_p10 = scmp.ge.s32.totalorder %s6076_s16, 2 }
 0xd5c   : > { %s8176_s17 = sld [smem:[#allocation12_spill]] }
 0xd61   : > { %s4931_s29 = sand.u32 1, %s8175_s13  }
 0xd62   : > { %p8177_p9 = scmp.ne.s32.totalorder %s8176_s17, 0  ;;  %s4932_s20 = scalar_lea.sflag [#allocation4], %s4931_s29 }
 0xd64   : > { %p5695_p12 = pnand %p8178_p10, %p8177_p9 }
 0xd66   : > { %p5696_p13 = pneg %p5695_p12 }
 0xd68   : > { %6059 = dma.done.wait (%p5696_p13), %s4932_s20, 1024  }
 0xd69   : > { %6061 = vsyncadd (%p5696_p13), %s4932_s20, 4294966272  ;;  %s8179_s16 = sld [smem:[#allocation13_spill]]  ;;  %s8180_s13 = smov %s6068_s14 }
 0xd6a   : > { %s8181_s14 = smov %s6072_s15  ;;  %s8182_s15 = smov %s6221_s18 }
 0xd6f   : > { %p24_p0 = scmp.ge.s32.totalorder %s8179_s16, 4  }
 0xd71   :  { %26 = sbr.rel (!%p24_p0) target bundleno = 8 (0x8), region = 118 }
 0xd76   :  { %4937 = vsyncpa [#allocation3], 1 }
 0xd77   :  { %4939 = vsyncpa [#allocation3 + $0x1], 1 }
 0xd78   :  { %4940 = vsyncpa [#allocation6], 1 }
 0xd79   :  { %4941 = vsyncpa [#allocation4], 1 }
 0xd7a   :  { %4943 = vsyncpa [#allocation4 + $0x1], 1 }

</bundles_post_ra>
